<compile_context>
chip_gen: v5e
topology: v5e:2x2
jax: 0.10.0
libtpu: 0.0.40
codegen_flags: <defaults>
</compile_context>

<pallas_src>
import math

import jax
import jax.numpy as jnp
from jax.experimental import pallas as pl
from jax.experimental.pallas import tpu as pltpu


def _filtergp_kernel(inv_ls_ref, ts_ref, zs_ref, thet_ref, wblk_ref, q_ref, o_ref):
    """One grid step = one lane-dense tile of T query points (all MC samples fused).

    inv_ls_ref : (d,)        SMEM   1/lengthscale per input dim
    ts_ref     : (d+1, TT)   VMEM   rows 0..d-1 = t^T (raw), row d = ones (bias row)
    zs_ref     : (M, d)      VMEM   Z / lengthscale                 — grid-resident
    thet_ref   : (mc*n, d+1) VMEM   cols 0..d-1 = thets, col d = betas — resident
    wblk_ref   : (mc, mc*n)  VMEM   block-diagonal random-feature weights — resident
    q_ref      : (mc, M)     VMEM   Kzz^{-1}(u - Phi(Z) w)           — resident
    o_ref      : (mc, TT)    VMEM   lane-dense output tile
    """
    ts = ts_ref[...]                                   # (d+1, TT)
    d = zs_ref.shape[1]

    # --- random-feature projection + phase on the MXU (K = d+1; betas via bias row) ---
    # Runs in the vector-extended slot, overlapping the cos polynomial on the VALU/EUP.
    proj = jnp.dot(thet_ref[...], ts, preferred_element_type=jnp.float32)  # (mc*n, TT)
    phit = jnp.cos(proj)                                                   # dominant cost

    # --- ARD-RBF cross covariance, transposed (lane axis = T), direct squared diffs ---
    # 1/lengthscale applied here from SMEM (d*TT extra VPU muls, negligible vs cos).
    zs = zs_ref[...]                                   # (M, d), already scaled
    dist2 = (zs[:, 0:1] - inv_ls_ref[0] * ts[0:1, :]) ** 2
    for k in range(1, d):
        dist2 = dist2 + (zs[:, k:k + 1] - inv_ls_ref[k] * ts[k:k + 1, :]) ** 2
    ktzT = jnp.exp(-0.5 * dist2)                       # (M, TT)

    # --- fused reductions -> lane-dense (mc, TT) output via two small MXU matmuls ---
    # NOTE: wblk is (mc, mc*n) block-diagonal (1/mc density). Fine at mc*n ~ 128; if
    # mc*n grows past a few hundred, switch to a per-sample contraction instead.
    out = jnp.dot(wblk_ref[...], phit, preferred_element_type=jnp.float32)      # random part
    out = out + jnp.dot(q_ref[...], ktzT, preferred_element_type=jnp.float32)   # basis part
    o_ref[...] = out


def _pick_t_tile(T):
    """Largest 128-multiple tile that still leaves enough tiles for megacore sharding."""
    n128 = pl.cdiv(T, 128)              # number of 128-lane chunks needed to cover T
    if n128 <= 1:
        return 128
    # >= 4 tiles (2 per TensorCore on v7x) once T allows it, else >= 2 tiles;
    # cap at 2048 lanes: phit/proj at (mc*n, 2048) f32 ~ 1 MiB each, far under VMEM.
    target_tiles = 4 if n128 >= 4 else 2
    chunks = max(1, min(16, n128 // target_tiles))
    return 128 * chunks


def filtergp_forward(t, Z, lengthscale, thets, betas, ws, qs, t_tile=None):
    """Pallas forward pass of FilterGP for a 2-D input t of shape (T, d_in).

    Returns (mc_samples, T) float32, matching torch's (batch=mc, time) convention.
    """
    t = jnp.asarray(t, jnp.float32)
    Z = jnp.asarray(Z, jnp.float32)
    lengthscale = jnp.asarray(lengthscale, jnp.float32)
    thets = jnp.asarray(thets, jnp.float32)
    betas = jnp.asarray(betas, jnp.float32)
    ws = jnp.asarray(ws, jnp.float32)
    qs = jnp.asarray(qs, jnp.float32)

    T, d = t.shape
    M = Z.shape[0]
    mc, _, n = thets.shape

    # ---- grid-invariant prework, hoisted out of the kernel ----
    inv_ls = 1.0 / lengthscale                                    # (d,) -> SMEM in-kernel

    # t transposed + a bias row of ones (folds betas into the MXU projection).
    # No 1/lengthscale pass over t here: the scale is applied in-kernel for the RBF only.
    ts_aug = jnp.concatenate([t.T, jnp.ones((1, T), jnp.float32)], axis=0)   # (d+1, T)

    # Z scaled (points-major: M on sublanes, T on lanes inside the kernel).
    zs = Z * inv_ls[None, :]                                      # (M, d)

    # thets flattened over (mc, n), augmented with betas as the bias column.
    thet_flat = jnp.transpose(thets, (0, 2, 1)).reshape(mc * n, d)
    thet_aug = jnp.concatenate([thet_flat, betas.reshape(mc * n, 1)], axis=1)  # (mc*n, d+1)

    # Block-diagonal random-feature weights: wblk[b, c*n + j] = ws[b, j] if b == c else 0.
    wblk = (jnp.eye(mc, dtype=jnp.float32)[:, :, None] * ws[None, :, :]).reshape(mc, mc * n)

    # ---- T tiling: lane-dense tiles, grid sized for megacore + step-overhead amortization ----
    if t_tile is None:
        t_tile = _pick_t_tile(T)
    num_tiles = pl.cdiv(T, t_tile)
    T_pad = num_tiles * t_tile
    if T_pad > T:
        ts_aug = jnp.pad(ts_aug, ((0, 0), (0, T_pad - T)))

    # Cost dominated by transcendentals (cos over mc*n*T, exp over M*T) — tell XLA.
    cost = pl.CostEstimate(
        flops=int(2 * T_pad * (mc * n * (d + 1) + mc * (mc * n) + mc * M)
                  + 3 * T_pad * M * d),
        transcendentals=int(T_pad * (mc * n + M)),
        bytes_accessed=int(4 * ((d + 1) * T_pad + mc * T_pad + M * d
                                + mc * n * (d + 1) + mc * mc * n + mc * M + d)),
    )

    out = pl.pallas_call(
        _filtergp_kernel,
        out_shape=jax.ShapeDtypeStruct((mc, T_pad), jnp.float32),
        grid=(num_tiles,),
        in_specs=[
            pl.BlockSpec(memory_space=pltpu.MemorySpace.SMEM),  # 1/lengthscale (d,)
            pl.BlockSpec((d + 1, t_tile), lambda i: (0, i)),    # t^T (+ bias row)
            pl.BlockSpec((M, d), lambda i: (0, 0)),             # Z/ls            — resident
            pl.BlockSpec((mc * n, d + 1), lambda i: (0, 0)),    # thets (+betas)  — resident
            pl.BlockSpec((mc, mc * n), lambda i: (0, 0)),       # block-diag ws   — resident
            pl.BlockSpec((mc, M), lambda i: (0, 0)),            # qs              — resident
        ],
        out_specs=pl.BlockSpec((mc, t_tile), lambda i: (0, i)),
        compiler_params=pltpu.CompilerParams(dimension_semantics=("parallel",)),
        cost_estimate=cost,
    )(inv_ls, ts_aug, zs, thet_aug, wblk, qs)
    return out[:, :T]


def reference_forward(t, Z, lengthscale, thets, betas, ws, qs):
    """Pure-JAX reference mirroring torch FilterGP.forward semantics (2-D t)."""
    inv_ls = 1.0 / lengthscale
    phit = jnp.cos(jnp.einsum('td,bdn->btn', t, thets) + betas[:, None, :])
    random_part = jnp.einsum('bn,btn->bt', ws, phit)
    ts = t * inv_ls
    zs = Z * inv_ls
    d2 = jnp.sum((ts[:, None, :] - zs[None, :, :]) ** 2, axis=-1)
    Ktz = jnp.exp(-0.5 * d2)                                  # (T, M)
    basis_part = jnp.einsum('bz,tz->bt', qs, Ktz)
    return basis_part + random_part


if __name__ == "__main__":
    # ----- small, FilterGP-consistent sizes (multi-tile grid gets exercised) -----
    mc_samples = 4          # mc_samples
    d_in = 2                # input dim of the filter GP
    M = 8                   # num_inducing_points
    n_basis = 32            # num_basis_functions
    T = 300                 # number of query points t (3 lane tiles of 128)
    init_lengthscale = 1.0
    jitter = 0.01
    prior_cov_factor = 1.0
    prior_mean_factor = 0.5

    key = jax.random.PRNGKey(0)
    k_z, k_thet, k_w, k_beta, k_eps, k_t = jax.random.split(key, 6)

    # ----- deterministic "parameters" (module __init__) -----
    raw_inducing_inputs = jax.random.uniform(k_z, (M, d_in), jnp.float32, -1.0, 1.0)
    input_scale = jnp.ones((d_in,), jnp.float32)                 # scale_inputs=False
    Z = raw_inducing_inputs * input_scale[None, :]               # inducing_inputs property
    lengthscale = jnp.full((d_in,), init_lengthscale, jnp.float32)
    var_mean = prior_mean_factor * jnp.ones((M,), jnp.float32)   # variational mean
    # chol_variational_covar = prior_cov_factor * eye(M)

    # ----- sample_basis (deterministic draws from PRNGKey(0)) -----
    thets = jax.random.normal(k_thet, (mc_samples, d_in, n_basis), jnp.float32) / lengthscale[None, :, None]
    ws = jnp.sqrt(2.0 / n_basis) * jax.random.normal(k_w, (mc_samples, n_basis), jnp.float32)
    betas = 2.0 * math.pi * jax.random.uniform(k_beta, (mc_samples, n_basis), jnp.float32)

    # ----- compute_q (plain-JAX glue: tiny M x M Cholesky solve) -----
    inv_ls = 1.0 / lengthscale
    zs = Z * inv_ls
    d2zz = jnp.sum((zs[:, None, :] - zs[None, :, :]) ** 2, axis=-1)
    Kzz = jnp.exp(-0.5 * d2zz) + jitter * jnp.eye(M, dtype=jnp.float32)      # prior covariance
    LKzz = jnp.linalg.cholesky(Kzz)
    eps = jax.random.normal(k_eps, (mc_samples, M), jnp.float32)
    us = var_mean[None, :] + prior_cov_factor * eps                          # variational rsample
    phiz = jnp.cos(jnp.einsum('md,bdn->bmn', Z, thets) + betas[:, None, :])  # (mc, M, n)
    x = us - jnp.einsum('bmn,bn->bm', phiz, ws)                              # (mc, M)
    qs = jax.scipy.linalg.cho_solve((LKzz, True), x.T).T                     # (mc, M)

    # ----- forward input t (2-D case: (T, d_in), broadcast over MC samples) -----
    t = jax.random.uniform(k_t, (T, d_in), jnp.float32, -2.0, 2.0)

    # ----- run Pallas kernel -----
    out = filtergp_forward(t, Z, lengthscale, thets, betas, ws, qs)
    out = jax.block_until_ready(out)

    # ----- check against pure-JAX reference of the torch forward -----
    ref = reference_forward(t, Z, lengthscale, thets, betas, ws, qs)
    assert out.shape == (mc_samples, T), out.shape
    assert jnp.allclose(out, ref, atol=1e-3, rtol=1e-3), float(jnp.max(jnp.abs(out - ref)))

    print("KERNEL_OK")
</pallas_src>

<mosaic_0001>
module attributes {stable_mosaic.version = 11 : i64} {
  func.func @_filtergp_kernel(%arg0: i32, %arg1: memref<2xf32, #tpu.memory_space<smem>>, %arg2: memref<3x128xf32, #tpu.memory_space<vmem>>, %arg3: memref<8x2xf32, #tpu.memory_space<vmem>>, %arg4: memref<128x3xf32, #tpu.memory_space<vmem>>, %arg5: memref<4x128xf32, #tpu.memory_space<vmem>>, %arg6: memref<4x8xf32, #tpu.memory_space<vmem>>, %arg7: memref<4x128xf32, #tpu.memory_space<vmem>>) attributes {dimension_semantics = [#tpu.dimension_semantics<parallel>], iteration_bounds = array<i64: 3>, scalar_prefetch = 0 : i64, scratch_operands = 0 : i64, tpu.core_type = #tpu.core_type<tc>, window_params = [{transform_indices = @transform_0, window_bounds = array<i64: 2>}, {transform_indices = @transform_1, window_bounds = array<i64: 3, 128>}, {pipeline_mode = #tpu.pipeline_mode<synchronous>, transform_indices = @transform_2, window_bounds = array<i64: 8, 2>}, {pipeline_mode = #tpu.pipeline_mode<synchronous>, transform_indices = @transform_3, window_bounds = array<i64: 128, 3>}, {pipeline_mode = #tpu.pipeline_mode<synchronous>, transform_indices = @transform_4, window_bounds = array<i64: 4, 128>}, {pipeline_mode = #tpu.pipeline_mode<synchronous>, transform_indices = @transform_5, window_bounds = array<i64: 4, 8>}, {transform_indices = @transform_6, window_bounds = array<i64: 4, 128>}]} {
    %c0 = arith.constant 0 : index
    %c0_0 = arith.constant 0 : index
    %0 = vector.load %arg2[%c0, %c0_0] : memref<3x128xf32, #tpu.memory_space<vmem>>, vector<3x128xf32>
    %c0_1 = arith.constant 0 : index
    %c0_2 = arith.constant 0 : index
    %1 = vector.load %arg4[%c0_1, %c0_2] : memref<128x3xf32, #tpu.memory_space<vmem>>, vector<128x3xf32>
    %cst = arith.constant dense<0.000000e+00> : vector<128x128xf32>
    %2 = tpu.matmul %1, %0, %cst {dimension_numbers = #tpu.dot_dimension_numbers<[1], [0], [0], [1], [0, 0, 1, 1], [], []>} : vector<128x3xf32>, vector<3x128xf32>, vector<128x128xf32> -> vector<128x128xf32>
    %3 = math.cos %2 : vector<128x128xf32>
    %c0_3 = arith.constant 0 : index
    %c0_4 = arith.constant 0 : index
    %4 = vector.load %arg3[%c0_3, %c0_4] : memref<8x2xf32, #tpu.memory_space<vmem>>, vector<8x2xf32>
    %5 = vector.extract_strided_slice %4 {offsets = [0, 0], sizes = [8, 1], strides = [1, 1]} : vector<8x2xf32> to vector<8x1xf32>
    %c0_5 = arith.constant 0 : index
    %6 = memref.load %arg1[%c0_5] : memref<2xf32, #tpu.memory_space<smem>>
    %7 = vector.extract_strided_slice %0 {offsets = [0, 0], sizes = [1, 128], strides = [1, 1]} : vector<3x128xf32> to vector<1x128xf32>
    %8 = vector.broadcast %6 : f32 to vector<1x128xf32>
    %9 = arith.mulf %8, %7 : vector<1x128xf32>
    %10 = vector.broadcast %5 : vector<8x1xf32> to vector<8x128xf32>
    %11 = vector.broadcast %9 : vector<1x128xf32> to vector<8x128xf32>
    %12 = arith.subf %10, %11 : vector<8x128xf32>
    %13 = arith.mulf %12, %12 : vector<8x128xf32>
    %14 = vector.extract_strided_slice %4 {offsets = [0, 1], sizes = [8, 1], strides = [1, 1]} : vector<8x2xf32> to vector<8x1xf32>
    %c1 = arith.constant 1 : index
    %15 = memref.load %arg1[%c1] : memref<2xf32, #tpu.memory_space<smem>>
    %16 = vector.extract_strided_slice %0 {offsets = [1, 0], sizes = [1, 128], strides = [1, 1]} : vector<3x128xf32> to vector<1x128xf32>
    %17 = vector.broadcast %15 : f32 to vector<1x128xf32>
    %18 = arith.mulf %17, %16 : vector<1x128xf32>
    %19 = vector.broadcast %14 : vector<8x1xf32> to vector<8x128xf32>
    %20 = vector.broadcast %18 : vector<1x128xf32> to vector<8x128xf32>
    %21 = arith.subf %19, %20 : vector<8x128xf32>
    %22 = arith.mulf %21, %21 : vector<8x128xf32>
    %23 = arith.addf %13, %22 : vector<8x128xf32>
    %cst_6 = arith.constant -5.000000e-01 : f32
    %24 = vector.broadcast %cst_6 : f32 to vector<8x128xf32>
    %25 = arith.mulf %24, %23 : vector<8x128xf32>
    %26 = math.exp %25 : vector<8x128xf32>
    %c0_7 = arith.constant 0 : index
    %c0_8 = arith.constant 0 : index
    %27 = vector.load %arg5[%c0_7, %c0_8] : memref<4x128xf32, #tpu.memory_space<vmem>>, vector<4x128xf32>
    %cst_9 = arith.constant dense<0.000000e+00> : vector<4x128xf32>
    %28 = tpu.matmul %27, %3, %cst_9 {dimension_numbers = #tpu.dot_dimension_numbers<[1], [0], [0], [1], [0, 0, 1, 1], [], []>} : vector<4x128xf32>, vector<128x128xf32>, vector<4x128xf32> -> vector<4x128xf32>
    %c0_10 = arith.constant 0 : index
    %c0_11 = arith.constant 0 : index
    %29 = vector.load %arg6[%c0_10, %c0_11] : memref<4x8xf32, #tpu.memory_space<vmem>>, vector<4x8xf32>
    %cst_12 = arith.constant dense<0.000000e+00> : vector<4x128xf32>
    %30 = tpu.matmul %29, %26, %cst_12 {dimension_numbers = #tpu.dot_dimension_numbers<[1], [0], [0], [1], [0, 0, 1, 1], [], []>} : vector<4x8xf32>, vector<8x128xf32>, vector<4x128xf32> -> vector<4x128xf32>
    %31 = arith.addf %28, %30 : vector<4x128xf32>
    %c0_13 = arith.constant 0 : index
    %c0_14 = arith.constant 0 : index
    %32 = vector.load %arg7[%c0_13, %c0_14] : memref<4x128xf32, #tpu.memory_space<vmem>>, vector<4x128xf32>
    tpu.vector_store %arg7[%c0_13, %c0_14], %31 {strides = array<i32>} : memref<4x128xf32, #tpu.memory_space<vmem>>, vector<4x128xf32>,
    return
  }
  func.func @transform_0(%arg0: i32) -> i32 {
    %c0_i32 = arith.constant 0 : i32
    %c0_i32_0 = arith.constant 0 : i32
    return %c0_i32 : i32
  }
  func.func @transform_1(%arg0: i32) -> (i32, i32) {
    %c0_i32 = arith.constant 0 : i32
    %c0_i32_0 = arith.constant 0 : i32
    return %c0_i32, %arg0 : i32, i32
  }
  func.func @transform_2(%arg0: i32) -> (i32, i32) {
    %c0_i32 = arith.constant 0 : i32
    %c0_i32_0 = arith.constant 0 : i32
    %c0_i32_1 = arith.constant 0 : i32
    return %c0_i32, %c0_i32_0 : i32, i32
  }
  func.func @transform_3(%arg0: i32) -> (i32, i32) {
    %c0_i32 = arith.constant 0 : i32
    %c0_i32_0 = arith.constant 0 : i32
    %c0_i32_1 = arith.constant 0 : i32
    return %c0_i32, %c0_i32_0 : i32, i32
  }
  func.func @transform_4(%arg0: i32) -> (i32, i32) {
    %c0_i32 = arith.constant 0 : i32
    %c0_i32_0 = arith.constant 0 : i32
    %c0_i32_1 = arith.constant 0 : i32
    return %c0_i32, %c0_i32_0 : i32, i32
  }
  func.func @transform_5(%arg0: i32) -> (i32, i32) {
    %c0_i32 = arith.constant 0 : i32
    %c0_i32_0 = arith.constant 0 : i32
    %c0_i32_1 = arith.constant 0 : i32
    return %c0_i32, %c0_i32_0 : i32, i32
  }
  func.func @transform_6(%arg0: i32) -> (i32, i32) {
    %c0_i32 = arith.constant 0 : i32
    %c0_i32_0 = arith.constant 0 : i32
    return %c0_i32, %arg0 : i32, i32
  }
}

</mosaic_0001>

<bundles_post_ra>
// kernel: tpu_custom_call.1
= control target key start
LH: loop header
LB: loop body
LE: loop exit
PB: predicated region body
PF: predicated region fallthrough
CT: control target
= control target key end

     0   :  { %11 = vsyncpa [#allocation4], 0  ;;  %s5698_s0 = inlined_call_operand.vmem [shape: f32[2], index: 0, kind: input, shape index: {}]   ;;  %s5699_s1 = inlined_call_operand.vmem [shape: f32[3,384], index: 1, kind: input, shape index: {}]   ;;  %s5700_s2 = inlined_call_operand.vmem [shape: f32[8,2], index: 2, kind: input, shape index: {}]   ;;  %s5701_s3 = inlined_call_operand.vmem [shape: f32[128,3], index: 3, kind: input, shape index: {}]   ;;  %s5702_s4 = inlined_call_operand.vmem [shape: f32[4,128], index: 4, kind: input, shape index: {}]   ;;  %s5703_s5 = inlined_call_operand.vmem [shape: f32[4,8], index: 5, kind: input, shape index: {}]   ;;  %s5704_s6 = inlined_call_operand.hbm [shape: f32[4,384], index: 6, kind: output, shape index: {}]  }
   0x1   :  { %12 = vsyncpa [#allocation3], 0 }
   0x2   :  { %14 = vsyncpa [#allocation3 + $0x1], 0  ;;  %s3291_s21 = smov 0   ;;  %s3293_s22 = smov 0  }
   0x3   :  { %s3295_s23 = smov 0   ;;  %s3297_s24 = smov 0  }
   0x4 LB: > { %s3312_s25 = sadd.s32 4294967295, %s3245_s24   ;;  %s3020_s26 = sadd.s32 4294967294, %s3245_s24   ;;  %s3245_s24 = sphi %s3297_s24, %s6002_s24   ;;  %s3241_s23 = sphi %s3295_s23, %s6001_s23   ;;  %s3237_s22 = sphi %s3293_s22, %s6000_s22   ;;  %s3233_s21 = sphi %s3291_s21, %s5999_s21  }
   0x5   : > { %s3316_s27 = sadd.s32 1, %s3245_s24   ;;  %s158_s28 = sadd.s32 1, %s3241_s23 }
   0x6   : > { %s155_s29 = ssub.s32 %s3245_s24, %s3316_s27  ;;  %p168_p0 = scmp.ne.s32.totalorder %s3241_s23, %s3237_s22 }
   0x7   : > { %p156_p1 = scmp.eq.s32.totalorder %s155_s29, 0  ;;  %p169_p2 = scmp.eq.s32.totalorder %s3312_s25, 2 }
   0x8   : > { %p174_p3 = scmp.ne.s32.totalorder %s3237_s22, %s3233_s21  ;;  %p175_p4 = scmp.eq.s32.totalorder %s3020_s26, 2 }
   0x9   : > { %s3327_s30 = scalar_select %p156_p1, %s3241_s23, %s158_s28  }
   0xa   : > { %p3329_p5 = por %p169_p2, %p168_p0  ;;  %p3333_p6 = por %p175_p4, %p174_p3 }
   0xb   : > { %p3021_p7 = scmp.ge.s32.totalorder %s3245_s24, 1  ;;  %p182_p8 = scmp.lt.s32.totalorder %s3245_s24, 4 }
   0xc   : > { %p3115_p9 = scmp.eq.s32.totalorder %s3312_s25, 0  ;;  %s194_s11 = sshll.u32 %s5698_s0, 4  ;;  %s195_s11 = int_to_ptr.vmem [resolvable:$true] %s194_s11 }
   0xd   : > { %p183_p10 = pnand %p3021_p7, %p182_p8  ;;  %s3247_s12 = smov [#allocation2]  }
   0xf   : > { %p3107_p11 = pneg %p183_p10  ;;  %226 = sbr.rel (%p183_p10) target bundleno = 914 (0x392), region = 44 }
  0x11   : > { %p3108_p12 = pnand %p3115_p9, %p3107_p11 }
  0x13   : > { %3110 = dma.vmem_to_smem (!%p3108_p12), %s195_s11, 16, %s3247_s12, [#allocation4]  }
  0x14   : > { %3224 = dma.done.wait (%p3115_p9), [#allocation4], 16  }
  0x15   : > { %3226 = vsyncadd (%p3115_p9), [#allocation4], 4294967280 }
  0x16   : > { %233 = sfence }
  0x17   : > { %p257_p13 = scmp.lt.s32.totalorder %s3312_s25, 2  ;;  %vm327_vm0 = vcmask 1042432   ;;  %v262_v0 = vld [vmem:[%s5701_s3] sm:$0xff]  ;;  %vm278_vm1 = vcmask 23552   ;;  %v268_v2 = vld [vmem:[%s5701_s3 + $0x30] sm:$0xff]  ;;  %v263_v4 = vld [vmem:[%s5701_s3 + $0x8] sm:$0xff] }
  0x18   : > { %v272_v3 = vld [vmem:[%s5701_s3 + $0x50] sm:$0xff]  ;;  %v269_v5 = vld [vmem:[%s5701_s3 + $0x38] sm:$0xff]  ;;  %v3378_v7 = vld [vmem:[%s5700_s2] sm:$0xff]  ;;  %v5721_v8 = vmov 0   ;;  %v5723_v40 = vmov 683565275  }
  0x19   : > { %s258_s13 = scalar_select %p257_p13, %s3312_s25, 2  ;;  %v273_v6 = vld [vmem:[%s5701_s3 + $0x58] sm:$0xff]  ;;  %3159 = vset.pattern.permute.xlu0 %v5721_v8  ;;  %v264_v9 = vld [vmem:[%s5701_s3 + $0x10] sm:$0xff]  ;;  %v270_v10 = vld [vmem:[%s5701_s3 + $0x40] sm:$0xff]  ;;  %v5718_v42 = vmov 2475754826  }
  0x1a   : > { %2866 = vperm.xlu0 %3159, %v3378_v7   ;;  %v274_v11 = vld [vmem:[%s5701_s3 + $0x60] sm:$0xff]  ;;  %v265_v12 = vld [vmem:[%s5701_s3 + $0x18] sm:$0xff]  ;;  %v271_v13 = vld [vmem:[%s5701_s3 + $0x48] sm:$0xff]  ;;  %v5716_v44 = vmov 2131351028   ;;  %s5319_s9 = sld [smem:[#allocation2]] }
  0x1b   : > { %s3027_s14 = sshll.u32 %s258_s13, 2  ;;  %v275_v14 = vld [vmem:[%s5701_s3 + $0x68] sm:$0xff]  ;;  %v266_v15 = vld [vmem:[%s5701_s3 + $0x20] sm:$0xff]  ;;  %v276_v16 = vld [vmem:[%s5701_s3 + $0x70] sm:$0xff]  ;;  %v5714_v46 = vmov 2102212464  }
  0x1c   : > { %s3348_s17 = scalar_lea.vmem %s5699_s1, %s3027_s14  ;;  %v267_v17 = vld [vmem:[%s5701_s3 + $0x28] sm:$0xff]  ;;  %v277_v18 = vld [vmem:[%s5701_s3 + $0x78] sm:$0xff]  ;;  %v5712_v48 = vmov 920167782   ;;  %v5710_v56 = vmov 1326507024  }
  0x1d   : > { %v261_v1 = vld [vmem:[%s3348_s17] sm:$0x7]  ;;  %s5341_s10 = sld [smem:[#allocation2 + $0x1]]  ;;  %s254_s14 = sand.u32 1, %s3237_s22  }
  0x1e   : > { %3028 = vmatpush.msk.msra.mxu0 %vm327_vm0, %v261_v1  ;;  %3099 = vmatpush.msk.msra.mxu1 %vm327_vm0, %v261_v1  ;;  %s3026_s15 = sshll.u32 %s254_s14, 2  ;;  %s3096_s16 = sshll.u32 %s3312_s25, 2 }
  0x1f   : > { %3100 = vmatpush.msk.msra.mxu3 %vm327_vm0, %v261_v1  ;;  %3029 = vmatmul.msk.f32.vlgmr.msra.gmra.mxu0 %vm278_vm1, %v262_v0  ;;  %s2944_s20 = scalar_lea.hbm %s5704_s6, %s3096_s16  ;;  %s256_s26 = scalar_lea.vmem [#allocation5], %s3026_s15 }
  0x20   : > { %3035 = vmatmul.msk.f32.vlgmr.msra.gmra.mxu1 %vm278_vm1, %v268_v2  ;;  %3039 = vmatmul.msk.f32.vlgmr.msra.gmra.mxu3 %vm278_vm1, %v272_v3  ;;  %s2946_s28 = sshll.u32 %s256_s26, 4  ;;  %s2948_s29 = sshll.u32 %s2944_s20, 4  ;;  %s2947_s28 = int_to_ptr.vmem [resolvable:$true] %s2946_s28  ;;  %s2949_s29 = int_to_ptr.hbm [resolvable:$true] %s2948_s29 }
  0x21   : > { %s3199_s12 = scalar_lea.hbm %s5704_s6, 12 }
  0x27   : > { %3030 = vmatmul.msk.f32.gmra.mxu0 %vm278_vm1, %v263_v4 }
  0x28   : > { %3036 = vmatmul.msk.f32.gmra.mxu1 %vm278_vm1, %v269_v5  ;;  %3040 = vmatmul.msk.f32.gmra.mxu3 %vm278_vm1, %v273_v6 }
  0x2f   : > { %3031 = vmatmul.msk.f32.gmra.mxu0 %vm278_vm1, %v264_v9 }
  0x30   : > { %3037 = vmatmul.msk.f32.gmra.mxu1 %vm278_vm1, %v270_v10  ;;  %3041 = vmatmul.msk.f32.gmra.mxu3 %vm278_vm1, %v274_v11 }
  0x37   : > { %3032 = vmatmul.msk.f32.gmra.mxu0 %vm278_vm1, %v265_v12 }
  0x38   : > { %3038 = vmatmul.msk.f32.gmra.mxu1 %vm278_vm1, %v271_v13  ;;  %3042 = vmatmul.msk.f32.gmra.mxu3 %vm278_vm1, %v275_v14 }
  0x3f   : > { %3033 = vmatmul.msk.f32.gmra.mxu0 %vm278_vm1, %v266_v15 }
  0x40   : > { %3043 = vmatmul.msk.f32.gmra.mxu3 %vm278_vm1, %v276_v16 }
  0x47   : > { %3034 = vmatmul.msk.f32.gmra.mxu0 %vm278_vm1, %v267_v17 }
  0x48   : > { %3044 = vmatmul.msk.f32.gmra.mxu3 %vm278_vm1, %v277_v18 }
  0x9c   : > { %v3422_v19 = vpop.f32.mrf.mxu0 }
  0x9d   : > { %5814 = vst [vmem:[#allocation8_spill] sm:$0xff] %v3422_v19  ;;  %v399_v20 = vand.u32 2139095040, %v3422_v19  ;;  %v3425_v21 = vpop.f32.mrf.mxu1  ;;  %v396_v23 = vand.u32 2147483647, %v3422_v19 }
  0x9e   : > { %5815 = vst [vmem:[#allocation9_spill] sm:$0xff] %v3425_v21  ;;  %v1323_v22 = vand.u32 2139095040, %v3425_v21  ;;  %v1320_v27 = vand.u32 2147483647, %v3425_v21 }
  0x9f   : > { %v400_v24 = vshrl.u32 %v399_v20, 23  ;;  %v403_v29 = vand.u32 8388607, %v396_v23 }
  0xa0   : > { %v1324_v25 = vshrl.u32 %v1323_v22, 23  ;;  %v1327_v33 = vand.u32 8388607, %v1320_v27 }
  0xa1   : > { %v3045_v26 = vadd.s32 4294967169, %v400_v24  ;;  %v404_v34 = vor.u32 8388608, %v403_v29 }
  0xa2   : > { %v3063_v28 = vadd.s32 4294967169, %v1324_v25  ;;  %v1328_v50 = vor.u32 8388608, %v1327_v33 }
  0xa3   : > { %v406_v30 = vadd.s32 1, %v3045_v26  ;;  %v3446_v54 = vshll.u32 %v404_v34, 8 }
  0xa4   : > { %v1330_v31 = vadd.s32 1, %v3063_v28  ;;  %v3462_v0 = vshll.u32 %v1328_v50, 8 }
  0xa5   : > { %vm407_vm2 = vcmp.gt.s32.totalorder %v406_v30, 0  ;;  %v445_v3 = vand.u32 65535, %v3446_v54  ;;  %v446_v12 = vshrl.u32 %v3446_v54, 16 }
  0xa6   : > { %v408_v32 = vsel %vm407_vm2, %v406_v30, 0  ;;  %vm1331_vm3 = vcmp.gt.s32.totalorder %v1330_v31, 0  ;;  %v3497_v17 = vshrl.u32 %v3462_v0, 16 }
  0xa7   : > { %v410_v35 = vand.u32 31, %v408_v32  ;;  %v1332_v36 = vsel %vm1331_vm3, %v1330_v31, 0  ;;  %v3434_v37 = vshrl.u32 %v408_v32, 5 }
  0xa8   : > { %v3436_v38 = vand.u32 31, %v1332_v36  ;;  %v3500_v26 = vshrl.u32 %v1332_v36, 5 }
  0xa9   : > { %v411_v39 = vsub.s32 32, %v410_v35  ;;  %v413_v41 = vshll.u32 %v5723_v40, %v410_v35  ;;  %v416_v43 = vshll.u32 %v5718_v42, %v410_v35  ;;  %v419_v45 = vshll.u32 %v5716_v44, %v410_v35 }
  0xaa   : > { %v422_v47 = vshll.u32 %v5714_v46, %v410_v35  ;;  %v425_v49 = vshll.u32 %v5712_v48, %v410_v35  ;;  %vm428_vm4 = vcmp.lt.s32.totalorder %v3434_v37, 1  ;;  %vm431_vm5 = vcmp.lt.s32.totalorder %v3434_v37, 4 }
  0xab   : > { %v414_v51 = vshrl.u32 %v5718_v42, %v411_v39  ;;  %v417_v52 = vshrl.u32 %v5716_v44, %v411_v39  ;;  %v420_v53 = vshrl.u32 %v5714_v46, %v411_v39  ;;  %v423_v55 = vshrl.u32 %v5712_v48, %v411_v39 }
  0xac   : > { %v426_v57 = vshrl.u32 %v5710_v56, %v411_v39  ;;  %v3459_v61 = vsub.s32 32, %v3436_v38  ;;  %vm430_vm6 = vcmp.lt.s32.totalorder %v3434_v37, 3  ;;  %vm429_vm7 = vcmp.lt.s32.totalorder %v3434_v37, 2 }
  0xad   : > { %v3452_v58 = vor.u32 %v414_v51, %v413_v41  ;;  %v3454_v59 = vor.u32 %v417_v52, %v416_v43  ;;  %v3456_v60 = vor.u32 %v420_v53, %v419_v45  ;;  %v424_v62 = vor.u32 %v423_v55, %v422_v47 }
  0xae   : > { %v427_v63 = vor.u32 %v426_v57, %v425_v49  ;;  %v1337_v6 = vshll.u32 %v5723_v40, %v3436_v38  ;;  %v1340_v9 = vshll.u32 %v5718_v42, %v3436_v38  ;;  %v1338_v13 = vshrl.u32 %v5718_v42, %v3459_v61 }
  0xaf   : > { %v436_v1 = vsel %vm428_vm4, %v3452_v58, %v3454_v59  ;;  %v440_v2 = vsel %vm428_vm4, %v3454_v59, %v3456_v60  ;;  %v437_v4 = vsel %vm431_vm5, %v424_v62, 920167782  ;;  %v1341_v16 = vshrl.u32 %v5716_v44, %v3459_v61 }
  0xb0   : > { %v441_v5 = vsel %vm431_vm5, %v427_v63, 1326507024  ;;  %v438_v10 = vsel %vm430_vm6, %v3456_v60, %v437_v4  ;;  %v412_v25 = vshrl.u32 %v5723_v40, %v411_v39  ;;  %v3502_v28 = vor.u32 %v1338_v13, %v1337_v6 }
  0xb1   : > { %v442_v11 = vsel %vm430_vm6, %v424_v62, %v441_v5  ;;  %v439_v14 = vsel %vm429_vm7, %v436_v1, %v438_v10  ;;  %v3504_v29 = vor.u32 %v1341_v16, %v1340_v9  ;;  %v1343_v33 = vshll.u32 %v5716_v44, %v3436_v38 }
  0xb2   : > { %v443_v15 = vsel %vm429_vm7, %v440_v2, %v442_v11  ;;  %v469_v22 = vand.u32 65535, %v439_v14  ;;  %v470_v24 = vshrl.u32 %v439_v14, 16  ;;  %v1344_v43 = vshrl.u32 %v5714_v46, %v3459_v61 }
  0xb3   : > { %v447_v18 = vand.u32 65535, %v443_v15  ;;  %v448_v20 = vshrl.u32 %v443_v15, 16  ;;  %v1346_v57 = vshll.u32 %v5714_v46, %v3436_v38  ;;  %v1347_v1 = vshrl.u32 %v5712_v48, %v3459_v61 }
  0xb4   : > { %v471_v34 = vmul.u32 %v469_v22, %v445_v3  ;;  %v472_v35 = vmul.u32 %v470_v24, %v445_v3  ;;  %v473_v41 = vmul.u32 %v469_v22, %v446_v12  ;;  %v474_v47 = vmul.u32 %v470_v24, %v446_v12 }
  0xb5   : > { %v449_v30 = vmul.u32 %v447_v18, %v445_v3  ;;  %v450_v31 = vmul.u32 %v448_v20, %v445_v3  ;;  %v451_v32 = vmul.u32 %v447_v18, %v446_v12  ;;  %v452_v45 = vmul.u32 %v448_v20, %v446_v12 }
  0xb6   : > { %v475_v51 = vshll.u32 %v472_v35, 16  ;;  %v477_v52 = vshll.u32 %v473_v41, 16  ;;  %v476_v55 = vshrl.u32 %v472_v35, 16  ;;  %v1349_v4 = vshll.u32 %v5712_v48, %v3436_v38 }
  0xb7   : > { %v453_v39 = vshll.u32 %v450_v31, 16  ;;  %v455_v36 = vshll.u32 %v451_v32, 16  ;;  %v454_v49 = vshrl.u32 %v450_v31, 16  ;;  %v456_v50 = vshrl.u32 %v451_v32, 16 }
  0xb8   : > { %vm479_vm9 = vc.u32 %v471_v34, %v475_v51  ;;  %v481_v63 = vadd.s32 %v475_v51, %v471_v34  ;;  %v3519_v9 = vor.u32 %v1344_v43, %v1343_v33  ;;  %v1348_v12 = vor.u32 %v1347_v1, %v1346_v57  ;;  %v3548_v33 = vpop.f32.mrf.mxu3 }
  0xb9   : > { %vm457_vm8 = vc.u32 %v449_v30, %v453_v39  ;;  %v459_v53 = vadd.s32 %v453_v39, %v449_v30  ;;  %v480_v3 = vsel %vm479_vm9, 1, %v5721_v8  ;;  %v1350_v13 = vshrl.u32 %v5710_v56, %v3459_v61  ;;  %5816 = vst [vmem:[#allocation10_spill] sm:$0xff] %v3548_v33 }
  0xba   : > { %v458_v62 = vsel %vm457_vm8, 1, %v5721_v8  ;;  %v482_v6 = vadd.s32 %v480_v3, %v474_v47  ;;  %vm483_vm11 = vc.u32 %v481_v63, %v477_v52  ;;  %v478_v14 = vshrl.u32 %v473_v41, 16 }
  0xbb   : > { %v460_v2 = vadd.s32 %v458_v62, %v452_v45  ;;  %vm461_vm10 = vc.u32 %v459_v53, %v455_v36  ;;  %v484_v11 = vsel %vm483_vm11, 1, %v5721_v8  ;;  %vm1352_vm12 = vcmp.lt.s32.totalorder %v3500_v26, 1 }
  0xbc   : > { %v462_v5 = vsel %vm461_vm10, 1, %v5721_v8  ;;  %v486_v15 = vadd.s32 %v484_v11, %v482_v6  ;;  %vm1354_vm13 = vcmp.lt.s32.totalorder %v3500_v26, 3  ;;  %v1351_v16 = vor.u32 %v1350_v13, %v1349_v4 }
  0xbd   : > { %v464_v10 = vadd.s32 %v462_v5, %v460_v2  ;;  %vm1353_vm14 = vcmp.lt.s32.totalorder %v3500_v26, 2  ;;  %vm1355_vm15 = vcmp.lt.s32.totalorder %v3500_v26, 4  ;;  %v433_v18 = vsel %vm431_vm5, %v3456_v60, 2102212464 }
  0xbe   : > { %v487_v20 = vadd.s32 %v486_v15, %v476_v55  ;;  %v1360_v22 = vsel %vm1352_vm12, %v3502_v28, %v3504_v29  ;;  %v1361_v24 = vsel %vm1355_vm15, %v1348_v12, 920167782  ;;  %v3539_v31 = vadd.s32 %v481_v63, %v477_v52 }
  0xbf   : > { %v465_v38 = vadd.s32 %v464_v10, %v454_v49  ;;  %v1362_v32 = vsel %vm1354_vm13, %v3519_v9, %v1361_v24  ;;  %v1364_v60 = vsel %vm1352_vm12, %v3504_v29, %v3519_v9  ;;  %v1365_v41 = vsel %vm1355_vm15, %v1351_v16, 1326507024 }
  0xc0   : > { %v488_v34 = vadd.s32 %v487_v20, %v478_v14  ;;  %v1363_v35 = vsel %vm1353_vm14, %v1360_v22, %v1362_v32  ;;  %v1369_v43 = vand.u32 65535, %v3462_v0  ;;  %v432_v45 = vsel %vm428_vm4, %v412_v25, %v3452_v58 }
  0xc1   : > { %v3537_v30 = vadd.s32 %v465_v38, %v456_v50  ;;  %v434_v39 = vsel %vm430_vm6, %v3454_v59, %v433_v18  ;;  %v1366_v36 = vsel %vm1354_vm13, %v1348_v12, %v1365_v41  ;;  %v1393_v47 = vand.u32 65535, %v1363_v35 }
  0xc2   : > { %v492_v49 = vadd.s32 1, %v488_v34  ;;  %v1367_v50 = vsel %vm1353_vm14, %v1364_v60, %v1366_v36  ;;  %v1394_v51 = vshrl.u32 %v1363_v35, 16  ;;  %v1939_v52 = vand.u32 2139095040, %v3548_v33 }
  0xc3   : > { %vm491_vm0 = vc.u32 %v3537_v30, %v3539_v31  ;;  %v1371_v53 = vand.u32 65535, %v1367_v50  ;;  %v1372_v58 = vshrl.u32 %v1367_v50, 16  ;;  %v1397_v25 = vmul.u32 %v1393_v47, %v3497_v17 }
  0xc4   : > { %v435_v59 = vsel %vm429_vm7, %v432_v45, %v434_v39  ;;  %v1395_v55 = vmul.u32 %v1393_v47, %v1369_v43  ;;  %v1396_v57 = vmul.u32 %v1394_v51, %v1369_v43  ;;  %v3255_v2 = vmov 1  }
  0xc5   : > { %v1373_v62 = vmul.u32 %v1371_v53, %v1369_v43  ;;  %v1374_v63 = vmul.u32 %v1372_v58, %v1369_v43  ;;  %v1375_v1 = vmul.u32 %v1371_v53, %v3497_v17  ;;  %3160 = vset.pattern.permute.xlu0 %v3255_v2  ;;  %v493_v3 = vsel %vm491_vm0, %v492_v49, %v488_v34 }
  0xc6   : > { %v1398_v4 = vmul.u32 %v1394_v51, %v3497_v17  ;;  %v1399_v5 = vshll.u32 %v1396_v57, 16  ;;  %v1401_v6 = vshll.u32 %v1397_v25, 16  ;;  %2876 = vperm.xlu0 %3160, %v3378_v7   ;;  %v489_v10 = vmul.u32 %v3446_v54, %v435_v59 }
  0xc7   : > { %v1376_v37 = vmul.u32 %v1372_v58, %v3497_v17  ;;  %v1377_v11 = vshll.u32 %v1374_v63, 16  ;;  %v1379_v12 = vshll.u32 %v1375_v1, 16  ;;  %v1336_v13 = vshrl.u32 %v5723_v40, %v3459_v61 }
  0xc8   : > { %vm1403_vm1 = vc.u32 %v1395_v55, %v1399_v5  ;;  %v1405_v14 = vadd.s32 %v1399_v5, %v1395_v55  ;;  %v1940_v15 = vshrl.u32 %v1939_v52, 23  ;;  %v3578_v38 = vadd.s32 %v493_v3, %v489_v10 }
  0xc9   : > { %vm1381_vm2 = vc.u32 %v1373_v62, %v1377_v11  ;;  %v1383_v16 = vadd.s32 %v1377_v11, %v1373_v62  ;;  %v1404_v18 = vsel %vm1403_vm1, 1, %v5721_v8  ;;  %v1400_v20 = vshrl.u32 %v1396_v57, 16 }
  0xca   : > { %v1382_v7 = vsel %vm1381_vm2, 1, %v5721_v8  ;;  %v1406_v54 = vadd.s32 %v1404_v18, %v1398_v4  ;;  %vm1407_vm3 = vc.u32 %v1405_v14, %v1401_v6  ;;  %v1378_v17 = vshrl.u32 %v1374_v63, 16 }
  0xcb   : > { %v1384_v22 = vadd.s32 %v1382_v7, %v1376_v37  ;;  %vm1385_vm4 = vc.u32 %v1383_v16, %v1379_v12  ;;  %v1408_v24 = vsel %vm1407_vm3, 1, %v5721_v8  ;;  %v1402_v32 = vshrl.u32 %v1397_v25, 16 }
  0xcc   : > { %v1386_v61 = vsel %vm1385_vm4, 1, %v5721_v8  ;;  %v1410_v60 = vadd.s32 %v1408_v24, %v1406_v54  ;;  %v3075_v34 = vadd.s32 4294967169, %v1940_v15  ;;  %v1357_v35 = vsel %vm1355_vm15, %v3519_v9, 2102212464 }
  0xcd   : > { %v1380_v41 = vshrl.u32 %v1375_v1, 16  ;;  %v1388_v43 = vadd.s32 %v1386_v61, %v1384_v22  ;;  %v1356_v36 = vsel %vm1352_vm12, %v1336_v13, %v3502_v28  ;;  %v3590_v49 = vadd.s32 %v1405_v14, %v1401_v6  ;;  %v3640_v22 = vpop.f32.mrf.mxu0 }
  0xce   : > { %v1411_v45 = vadd.s32 %v1410_v60, %v1400_v20  ;;  %v1946_v39 = vadd.s32 1, %v3075_v34  ;;  %v495_v50 = vadd.s32 536870912, %v3578_v38  ;;  %v1358_v51 = vsel %vm1354_vm13, %v3504_v29, %v1357_v35  ;;  %5818 = vst [vmem:[#allocation12_spill] sm:$0xff] %v3640_v22 }
  0xcf   : > { %v1389_v47 = vadd.s32 %v1388_v43, %v1378_v17  ;;  %v5708_v53 = vand.u32 2147483647, %v3548_v33  ;;  %v1359_v28 = vsel %vm1353_vm14, %v1356_v36, %v1358_v51 }
  0xd0   : > { %v1412_v52 = vadd.s32 %v1411_v45, %v1402_v32  ;;  %vm1947_vm5 = vcmp.gt.s32.totalorder %v1946_v39, 0  ;;  %v3603_v55 = vshrl.u32 %v495_v50, 30  ;;  %v1413_v62 = vmul.u32 %v3462_v0, %v1359_v28 }
  0xd1   : > { %v3596_v9 = vadd.s32 %v1389_v47, %v1380_v41  ;;  %v1948_v58 = vsel %vm1947_vm5, %v1946_v39, 0  ;;  %v1943_v29 = vand.u32 8388607, %v5708_v53  ;;  %v553_v41 = vand.u32 2139095040, %v3640_v22 }
  0xd2   : > { %v1416_v25 = vadd.s32 1, %v1412_v52  ;;  %v1950_v59 = vand.u32 31, %v1948_v58  ;;  %5817 = vst [vmem:[#allocation11_spill] sm:$0xff] %v3603_v55  ;;  %v497_v6 = vshll.u32 %v3603_v55, 30  ;;  %v3621_v0 = vshrl.u32 %v1948_v58, 5 }
  0xd3   : > { %vm1415_vm6 = vc.u32 %v3596_v9, %v3590_v49  ;;  %v1944_v37 = vor.u32 8388608, %v1943_v29  ;;  %v554_v28 = vshrl.u32 %v553_v41, 23  ;;  %v5848_v55 = vand.u32 2147483647, %v3640_v22 }
  0xd4   : > { %v3605_v57 = vsub.s32 32, %v1950_v59  ;;  %v1417_v63 = vsel %vm1415_vm6, %v1416_v25, %v1412_v52  ;;  %v1953_v2 = vshll.u32 %v5723_v40, %v1950_v59  ;;  %v1956_v3 = vshll.u32 %v5718_v42, %v1950_v59 }
  0xd5   : > { %v1962_v10 = vshll.u32 %v5714_v46, %v1950_v59  ;;  %v1959_v13 = vshll.u32 %v5716_v44, %v1950_v59  ;;  %v1418_v14 = vadd.s32 %v1417_v63, %v1413_v62  ;;  %v1965_v16 = vshll.u32 %v5712_v48, %v1950_v59 }
  0xd6   : > { %v1954_v1 = vshrl.u32 %v5718_v42, %v3605_v57  ;;  %v1957_v26 = vshrl.u32 %v5716_v44, %v3605_v57  ;;  %v1960_v4 = vshrl.u32 %v5714_v46, %v3605_v57  ;;  %v1963_v5 = vshrl.u32 %v5712_v48, %v3605_v57 }
  0xd7   : > { %v1966_v18 = vshrl.u32 %v5710_v56, %v3605_v57  ;;  %vm1968_vm7 = vcmp.lt.s32.totalorder %v3621_v0, 1  ;;  %vm1971_vm8 = vcmp.lt.s32.totalorder %v3621_v0, 4  ;;  %v3638_v17 = vshll.u32 %v1944_v37, 8 }
  0xd8   : > { %v3624_v11 = vor.u32 %v1954_v1, %v1953_v2  ;;  %v3626_v12 = vor.u32 %v1957_v26, %v1956_v3  ;;  %v1964_v15 = vor.u32 %v1963_v5, %v1962_v10  ;;  %v1961_v7 = vor.u32 %v1960_v4, %v1959_v13 }
  0xd9   : > { %v1967_v20 = vor.u32 %v1966_v18, %v1965_v16  ;;  %v3643_v24 = vsub.s32 %v3578_v38, %v497_v6  ;;  %v1419_v61 = vadd.s32 536870912, %v1418_v14  ;;  %vm1970_vm9 = vcmp.lt.s32.totalorder %v3621_v0, 3 }
  0xda   : > { %v1976_v54 = vsel %vm1968_vm7, %v3624_v11, %v3626_v12  ;;  %v1977_v32 = vsel %vm1971_vm8, %v1964_v15, 920167782  ;;  %vm1969_vm10 = vcmp.lt.s32.totalorder %v3621_v0, 2  ;;  %v1980_v35 = vsel %vm1968_vm7, %v3626_v12, %v1961_v7 }
  0xdb   : > { %v1978_v60 = vsel %vm1970_vm9, %v1961_v7, %v1977_v32  ;;  %v1981_v38 = vsel %vm1971_vm8, %v1967_v20, 1326507024  ;;  %v1985_v45 = vand.u32 65535, %v3638_v17  ;;  %v500_v36 = vsub.s32 0, %v3643_v24 }
  0xdc   : > { %v1979_v34 = vsel %vm1969_vm10, %v1976_v54, %v1978_v60  ;;  %v1982_v43 = vsel %vm1970_vm9, %v1964_v15, %v1981_v38  ;;  %v3663_v47 = vshrl.u32 %v1419_v61, 30  ;;  %v1986_v51 = vshrl.u32 %v3638_v17, 16 }
  0xdd   : > { %v2010_v39 = vshrl.u32 %v1979_v34, 16  ;;  %v1983_v50 = vsel %vm1969_vm10, %v1980_v35, %v1982_v43  ;;  %vm499_vm11 = vcmp.lt.s32.totalorder %v3643_v24, 0  ;;  %v2009_v59 = vand.u32 65535, %v1979_v34 }
  0xde   : > { %5819 = vst [vmem:[#allocation13_spill] sm:$0xff] %v3663_v47  ;;  %v1987_v52 = vand.u32 65535, %v1983_v50  ;;  %v1988_v58 = vshrl.u32 %v1983_v50, 16  ;;  %v1421_v63 = vshll.u32 %v3663_v47, 30  ;;  %v501_v1 = vsel %vm499_vm11, %v500_v36, %v3643_v24 }
  0xdf   : > { %v2012_v25 = vmul.u32 %v2010_v39, %v1985_v45  ;;  %v2011_v4 = vmul.u32 %v2009_v59, %v1985_v45  ;;  %v2013_v5 = vmul.u32 %v2009_v59, %v1986_v51  ;;  %v5707_v6 = vand.u32 2147483647, %v3640_v22 }
  0xe0   : > { %v1990_v29 = vmul.u32 %v1988_v58, %v1985_v45  ;;  %v1991_v62 = vmul.u32 %v1987_v52, %v1986_v51  ;;  %v1989_v26 = vmul.u32 %v1987_v52, %v1985_v45  ;;  %v3048_v10 = vadd.s32 4294967169, %v554_v28 }
  0xe1   : > { %v2015_v3 = vshll.u32 %v2012_v25, 16  ;;  %v1992_v37 = vmul.u32 %v1988_v58, %v1986_v51  ;;  %v502_v16 = vclz %v501_v1  ;;  %v3672_v18 = vsub.s32 %v1418_v14, %v1421_v63 }
  0xe2   : > { %v1993_v2 = vshll.u32 %v1990_v29, 16  ;;  %v1995_v13 = vshll.u32 %v1991_v62, 16  ;;  %v1952_v20 = vshrl.u32 %v5723_v40, %v3605_v57  ;;  %v2014_v32 = vmul.u32 %v2010_v39, %v1986_v51 }
  0xe3   : > { %vm2019_vm14 = vc.u32 %v2011_v4, %v2015_v3  ;;  %v1973_v60 = vsel %vm1971_vm8, %v1961_v7, 2102212464  ;;  %v1994_v34 = vshrl.u32 %v1990_v29, 16  ;;  %v2017_v14 = vshll.u32 %v2013_v5, 16 }
  0xe4   : > { %vm1997_vm12 = vc.u32 %v1989_v26, %v1993_v2  ;;  %v1999_v15 = vadd.s32 %v1993_v2, %v1989_v26  ;;  %v2020_v38 = vsel %vm2019_vm14, 1, %v5721_v8  ;;  %v2021_v43 = vadd.s32 %v2015_v3, %v2011_v4 }
  0xe5   : > { %v1998_v54 = vsel %vm1997_vm12, 1, %v5721_v8  ;;  %v2022_v45 = vadd.s32 %v2020_v38, %v2014_v32  ;;  %v3046_v36 = vadd.s32 4294967294, %v502_v16  ;;  %v1424_v57 = vsub.s32 0, %v3672_v18 }
  0xe6   : > { %v2000_v61 = vadd.s32 %v1998_v54, %v1992_v37  ;;  %vm2001_vm13 = vc.u32 %v1999_v15, %v1995_v13  ;;  %v1972_v39 = vsel %vm1968_vm7, %v1952_v20, %v3624_v11  ;;  %v560_v50 = vadd.s32 1, %v3048_v10 }
  0xe7   : > { %v2002_v35 = vsel %vm2001_vm13, 1, %v5721_v8  ;;  %vm1423_vm15 = vcmp.lt.s32.totalorder %v3672_v18, 0  ;;  %v1974_v7 = vsel %vm1970_vm9, %v3626_v12, %v1973_v60  ;;  %vm2023_vm0 = vc.u32 %v2021_v43, %v2017_v14 }
  0xe8   : > { %v2004_v41 = vadd.s32 %v2002_v35, %v2000_v61  ;;  %v2024_v52 = vsel %vm2023_vm0, 1, %v5721_v8  ;;  %v557_v58 = vand.u32 8388607, %v5707_v6  ;;  %vm561_vm1 = vcmp.gt.s32.totalorder %v560_v50, 0 }
  0xe9   : > { %v1996_v59 = vshrl.u32 %v1991_v62, 16  ;;  %v2016_v28 = vshrl.u32 %v2012_v25, 16  ;;  %v2026_v29 = vadd.s32 %v2024_v52, %v2022_v45  ;;  %v562_v63 = vsel %vm561_vm1, %v560_v50, 0 }
  0xea   : > { %v2005_v51 = vadd.s32 %v2004_v41, %v1994_v34  ;;  %vm3047_vm2 = vcmp.lt.s32.totalorder %v3046_v36, 0  ;;  %v1425_v11 = vsel %vm1423_vm15, %v1424_v57, %v3672_v18  ;;  %v1975_v1 = vsel %vm1969_vm10, %v1972_v39, %v1974_v7 }
  0xeb   : > { %v564_v26 = vand.u32 31, %v562_v63  ;;  %v2018_v2 = vshrl.u32 %v2013_v5, 16  ;;  %v3697_v3 = vadd.s32 %v2021_v43, %v2017_v14  ;;  %v2027_v4 = vadd.s32 %v2026_v29, %v2016_v28 }
  0xec   : > { %v3695_v12 = vadd.s32 %v2005_v51, %v1996_v59  ;;  %v558_v10 = vor.u32 8388608, %v557_v58  ;;  %v3703_v15 = vshrl.u32 %v562_v63, 5  ;;  %v1426_v20 = vclz %v1425_v11  ;;  %v3751_v11 = vpop.f32.mrf.mxu1 }
  0xed   : > { %v3699_v37 = vsub.s32 32, %v564_v26  ;;  %v567_v25 = vshll.u32 %v5723_v40, %v564_v26  ;;  %v570_v62 = vshll.u32 %v5718_v42, %v564_v26  ;;  %v2028_v13 = vadd.s32 %v2027_v4, %v2018_v2  ;;  %5820 = vst [vmem:[#allocation14_spill] sm:$0xff] %v3751_v11 }
  0xee   : > { %v573_v0 = vshll.u32 %v5716_v44, %v564_v26  ;;  %v576_v16 = vshll.u32 %v5714_v46, %v564_v26  ;;  %v579_v61 = vshll.u32 %v5712_v48, %v564_v26  ;;  %vm2031_vm3 = vc.u32 %v3695_v12, %v3697_v3 }
  0xef   : > { %v568_v5 = vshrl.u32 %v5718_v42, %v3699_v37  ;;  %v571_v54 = vshrl.u32 %v5716_v44, %v3699_v37  ;;  %v2032_v32 = vadd.s32 1, %v2028_v13  ;;  %v574_v60 = vshrl.u32 %v5714_v46, %v3699_v37 }
  0xf0   : > { %v577_v34 = vshrl.u32 %v5712_v48, %v3699_v37  ;;  %v580_v41 = vshrl.u32 %v5710_v56, %v3699_v37  ;;  %v3724_v14 = vshll.u32 %v558_v10, 8  ;;  %vm582_vm4 = vcmp.lt.s32.totalorder %v3703_v15, 1 }
  0xf1   : > { %v3718_v35 = vor.u32 %v568_v5, %v567_v25  ;;  %v3720_v38 = vor.u32 %v571_v54, %v570_v62  ;;  %v575_v43 = vor.u32 %v574_v60, %v573_v0  ;;  %v3728_v57 = vsel %vm3047_vm2, 0, %v3046_v36 }
  0xf2   : > { %v578_v45 = vor.u32 %v577_v34, %v576_v16  ;;  %v2033_v39 = vsel %vm2031_vm3, %v2032_v32, %v2028_v13  ;;  %v581_v50 = vor.u32 %v580_v41, %v579_v61  ;;  %vm584_vm5 = vcmp.lt.s32.totalorder %v3703_v15, 3 }
  0xf3   : > { %v2029_v7 = vmul.u32 %v3638_v17, %v1975_v1  ;;  %vm583_vm6 = vcmp.lt.s32.totalorder %v3703_v15, 2  ;;  %vm585_vm7 = vcmp.lt.s32.totalorder %v3703_v15, 4  ;;  %v590_v51 = vsel %vm582_vm4, %v3718_v35, %v3720_v38 }
  0xf4   : > { %v3064_v52 = vadd.s32 4294967294, %v1426_v20  ;;  %v591_v36 = vsel %vm585_vm7, %v578_v45, 920167782  ;;  %v594_v58 = vsel %vm582_vm4, %v3720_v38, %v575_v43  ;;  %v599_v59 = vand.u32 65535, %v3724_v14 }
  0xf5   : > { %v3744_v17 = vadd.s32 %v2033_v39, %v2029_v7  ;;  %v592_v28 = vsel %vm584_vm5, %v575_v43, %v591_v36  ;;  %v595_v29 = vsel %vm585_vm7, %v581_v50, 1326507024  ;;  %v600_v63 = vshrl.u32 %v3724_v14, 16 }
  0xf6   : > { %v490_v1 = vadd.s32 %v3539_v31, %v3537_v30  ;;  %v506_v26 = vsub.s32 32, %v3728_v57  ;;  %v593_v2 = vsel %vm583_vm6, %v590_v51, %v592_v28  ;;  %v596_v4 = vsel %vm584_vm5, %v578_v45, %v595_v29 }
  0xf7   : > { %v510_v10 = vsub.s32 4294967266, %v3728_v57  ;;  %v597_v25 = vsel %vm583_vm6, %v594_v58, %v596_v4  ;;  %v623_v62 = vand.u32 65535, %v593_v2  ;;  %v624_v13 = vshrl.u32 %v593_v2, 16 }
  0xf8   : > { %vm3065_vm8 = vcmp.lt.s32.totalorder %v3064_v52, 0  ;;  %v601_v0 = vand.u32 65535, %v597_v25  ;;  %v602_v16 = vshrl.u32 %v597_v25, 16  ;;  %v1477_v30 = vand.u32 2139095040, %v3751_v11 }
  0xf9   : > { %v2035_v31 = vadd.s32 536870912, %v3744_v17  ;;  %v625_v20 = vmul.u32 %v623_v62, %v599_v59  ;;  %v626_v5 = vmul.u32 %v624_v13, %v599_v59  ;;  %v627_v54 = vmul.u32 %v623_v62, %v600_v63 }
  0xfa   : > { %v508_v61 = vshrl.u32 %v490_v1, %v506_v26  ;;  %v603_v32 = vmul.u32 %v601_v0, %v599_v59  ;;  %v604_v60 = vmul.u32 %v602_v16, %v599_v59  ;;  %v605_v34 = vmul.u32 %v601_v0, %v600_v63 }
  0xfb   : > { %v511_v41 = vadd.s32 127, %v510_v10  ;;  %v3765_v45 = vsel %vm3065_vm8, 0, %v3064_v52  ;;  %v628_v39 = vmul.u32 %v624_v13, %v600_v63  ;;  %v629_v50 = vshll.u32 %v626_v5, 16 }
  0xfc   : > { %v606_v7 = vmul.u32 %v602_v16, %v600_v63  ;;  %v607_v51 = vshll.u32 %v604_v60, 16  ;;  %v5706_v36 = vand.u32 2147483647, %v3751_v11  ;;  %v1478_v58 = vshrl.u32 %v1477_v30, 23 }
  0xfd   : > { %v3768_v28 = vshrl.u32 %v2035_v31, 30  ;;  %v609_v29 = vshll.u32 %v605_v34, 16  ;;  %v631_v2 = vshll.u32 %v627_v54, 16  ;;  %vm633_vm9 = vc.u32 %v625_v20, %v629_v50 }
  0xfe   : > { %v566_v1 = vshrl.u32 %v5723_v40, %v3699_v37  ;;  %vm611_vm10 = vc.u32 %v603_v32, %v607_v51  ;;  %v613_v59 = vadd.s32 %v607_v51, %v603_v32  ;;  %v634_v52 = vsel %vm633_vm9, 1, %v5721_v8 }
  0xff   : > { %5821 = vst [vmem:[#allocation15_spill] sm:$0xff] %v3768_v28  ;;  %v587_v26 = vsel %vm585_vm7, %v575_v43, 2102212464  ;;  %v612_v63 = vsel %vm611_vm10, 1, %v5721_v8  ;;  %v635_v4 = vadd.s32 %v629_v50, %v625_v20  ;;  %v636_v10 = vadd.s32 %v634_v52, %v628_v39 }
 0x100   : > { %v608_v25 = vshrl.u32 %v604_v60, 16  ;;  %v614_v62 = vadd.s32 %v612_v63, %v606_v7  ;;  %vm615_vm11 = vc.u32 %v613_v59, %v609_v29  ;;  %v3066_v13 = vadd.s32 4294967169, %v1478_v58 }
 0x101   : > { %v2037_v0 = vshll.u32 %v3768_v28, 30  ;;  %v616_v16 = vsel %vm615_vm11, 1, %v5721_v8  ;;  %v630_v37 = vshrl.u32 %v626_v5, 16  ;;  %vm637_vm12 = vc.u32 %v635_v4, %v631_v2 }
 0x102   : > { %v610_v30 = vshrl.u32 %v605_v34, 16  ;;  %v618_v31 = vadd.s32 %v616_v16, %v614_v62  ;;  %v638_v32 = vsel %vm637_vm12, 1, %v5721_v8  ;;  %v1484_v51 = vadd.s32 1, %v3066_v13 }
 0x103   : > { %v586_v43 = vsel %vm582_vm4, %v566_v1, %v3718_v35  ;;  %v588_v20 = vsel %vm584_vm5, %v3720_v38, %v587_v26  ;;  %v632_v60 = vshrl.u32 %v627_v54, 16  ;;  %v640_v39 = vadd.s32 %v638_v32, %v636_v10 }
 0x104   : > { %v512_v50 = vshll.u32 %v511_v41, 23  ;;  %v619_v7 = vadd.s32 %v618_v31, %v608_v25  ;;  %v3785_v58 = vadd.s32 %v635_v4, %v631_v2  ;;  %vm1485_vm13 = vcmp.gt.s32.totalorder %v1484_v51, 0 }
 0x105   : > { %v507_v5 = vshll.u32 %v3643_v24, %v3728_v57  ;;  %v1434_v34 = vsub.s32 4294967266, %v3765_v45  ;;  %v641_v29 = vadd.s32 %v640_v39, %v630_v37  ;;  %v3791_v59 = vsub.s32 %v3744_v17, %v2037_v0 }
 0x106   : > { %v589_v35 = vsel %vm583_vm6, %v586_v43, %v588_v20  ;;  %v3795_v38 = vadd.s32 %v619_v7, %v610_v30  ;;  %v1486_v54 = vsel %vm1485_vm13, %v1484_v51, 0  ;;  %v1414_v2 = vadd.s32 %v3590_v49, %v3596_v9 }
 0x107   : > { %v3797_v41 = vor.u32 %v508_v61, %v507_v5  ;;  %v642_v1 = vadd.s32 %v641_v29, %v632_v60  ;;  %v1481_v24 = vand.u32 8388607, %v5706_v36  ;;  %v3803_v57 = vor.u32 4788187, %v512_v50 }
 0x108   : > { %v1430_v17 = vsub.s32 32, %v3765_v45  ;;  %vm645_vm14 = vc.u32 %v3795_v38, %v3785_v58  ;;  %v1488_v15 = vand.u32 31, %v1486_v54  ;;  %v1435_v52 = vadd.s32 127, %v1434_v34 }
 0x109   : > { %v643_v26 = vmul.u32 %v3724_v14, %v589_v35  ;;  %v646_v61 = vadd.s32 1, %v642_v1  ;;  %v3809_v63 = vshrl.u32 %v1486_v54, 5  ;;  %v2040_v49 = vsub.s32 0, %v3791_v59 }
 0x10a   : > { %v3812_v9 = vsub.s32 32, %v1488_v15  ;;  %v1491_v4 = vshll.u32 %v5723_v40, %v1488_v15  ;;  %v1494_v10 = vshll.u32 %v5718_v42, %v1488_v15  ;;  %v1482_v62 = vor.u32 8388608, %v1481_v24 }
 0x10b   : > { %v647_v25 = vsel %vm645_vm14, %v646_v61, %v642_v1  ;;  %v1497_v13 = vshll.u32 %v5716_v44, %v1488_v15  ;;  %v1500_v0 = vshll.u32 %v5714_v46, %v1488_v15  ;;  %vm2039_vm15 = vcmp.lt.s32.totalorder %v3791_v59, 0 }
 0x10c   : > { %v648_v14 = vadd.s32 %v647_v25, %v643_v26  ;;  %v1492_v16 = vshrl.u32 %v5718_v42, %v3812_v9  ;;  %v1495_v37 = vshrl.u32 %v5716_v44, %v3812_v9  ;;  %v1498_v30 = vshrl.u32 %v5714_v46, %v3812_v9 }
 0x10d   : > { %v1501_v31 = vshrl.u32 %v5712_v48, %v3812_v9  ;;  %v1503_v32 = vshll.u32 %v5712_v48, %v1488_v15  ;;  %vm1506_vm0 = vcmp.lt.s32.totalorder %v3809_v63, 1  ;;  %v1504_v60 = vshrl.u32 %v5710_v56, %v3812_v9 }
 0x10e   : > { %v649_v51 = vadd.s32 536870912, %v648_v14  ;;  %v3829_v43 = vor.u32 %v1492_v16, %v1491_v4  ;;  %v3831_v20 = vor.u32 %v1495_v37, %v1494_v10  ;;  %v2041_v39 = vsel %vm2039_vm15, %v2040_v49, %v3791_v59 }
 0x10f   : > { %v3836_v50 = vor.u32 %v1498_v30, %v1497_v13  ;;  %v1502_v7 = vor.u32 %v1501_v31, %v1500_v0  ;;  %v3838_v5 = vshll.u32 %v1482_v62, 8  ;;  %v516_v34 = vcvt.s32.f32 %v3797_v41 }
 0x110   : > { %v1505_v29 = vor.u32 %v1504_v60, %v1503_v32  ;;  %vm1508_vm1 = vcmp.lt.s32.totalorder %v3809_v63, 3  ;;  %vm1509_vm2 = vcmp.lt.s32.totalorder %v3809_v63, 4  ;;  %v1432_v35 = vshrl.u32 %v1414_v2, %v1430_v17 }
 0x111   : > { %v3843_v54 = vshrl.u32 %v649_v51, 30  ;;  %vm1507_vm3 = vcmp.lt.s32.totalorder %v3809_v63, 2  ;;  %v1514_v1 = vsel %vm1506_vm0, %v3829_v43, %v3831_v20  ;;  %v1436_v24 = vshll.u32 %v1435_v52, 23 }
 0x112   : > { %v2042_v15 = vclz %v2041_v39  ;;  %v1515_v41 = vsel %vm1509_vm2, %v1502_v7, 920167782  ;;  %v1518_v26 = vsel %vm1506_vm0, %v3831_v20, %v3836_v50  ;;  %v1519_v17 = vsel %vm1509_vm2, %v1505_v29, 1326507024 }
 0x113   : > { %5822 = vst [vmem:[#allocation16_spill] sm:$0xff] %v3843_v54  ;;  %v1516_v2 = vsel %vm1508_vm1, %v3836_v50, %v1515_v41  ;;  %v1523_v61 = vand.u32 65535, %v3838_v5  ;;  %v1524_v52 = vshrl.u32 %v3838_v5, 16  ;;  %v514_v49 = vand.u32 2147483647, %v3803_v57 }
 0x114   : > { %v1431_v4 = vshll.u32 %v3672_v18, %v3765_v45  ;;  %v1517_v10 = vsel %vm1507_vm3, %v1514_v1, %v1516_v2  ;;  %v1520_v25 = vsel %vm1508_vm1, %v1502_v7, %v1519_v17  ;;  %v651_v62 = vshll.u32 %v3843_v54, 30 }
 0x115   : > { %v1521_v13 = vsel %vm1507_vm3, %v1518_v26, %v1520_v25  ;;  %v1547_v0 = vand.u32 65535, %v1517_v10  ;;  %v1548_v16 = vshrl.u32 %v1517_v10, 16  ;;  %v1437_v30 = vor.u32 4788187, %v1436_v24 }
 0x116   : > { %v1433_v37 = vor.u32 %v1432_v35, %v1431_v4  ;;  %v1525_v31 = vand.u32 65535, %v1521_v13  ;;  %v1526_v57 = vshrl.u32 %v1521_v13, 16  ;;  %v3076_v32 = vadd.s32 4294967294, %v2042_v15 }
 0x117   : > { %v1549_v51 = vmul.u32 %v1547_v0, %v1523_v61  ;;  %v1550_v18 = vmul.u32 %v1548_v16, %v1523_v61  ;;  %v1551_v45 = vmul.u32 %v1547_v0, %v1524_v52  ;;  %v517_v1 = vmul.f32 %v516_v34, %v514_v49 }
 0x118   : > { %v1527_v60 = vmul.u32 %v1525_v31, %v1523_v61  ;;  %v1528_v39 = vmul.u32 %v1526_v57, %v1523_v61  ;;  %v1529_v29 = vmul.u32 %v1525_v31, %v1524_v52  ;;  %v3873_v7 = vsub.s32 %v648_v14, %v651_v62 }
 0x119   : > { %v1552_v41 = vmul.u32 %v1548_v16, %v1524_v52  ;;  %v1553_v2 = vshll.u32 %v1550_v18, 16  ;;  %v1440_v17 = vcvt.s32.f32 %v1433_v37  ;;  %v1530_v26 = vmul.u32 %v1526_v57, %v1524_v52  ;;  %v3880_v52 = vpop.f32.mrf.mxu3 }
 0x11a   : > { %v1531_v25 = vshll.u32 %v1528_v39, 16  ;;  %v1533_v10 = vshll.u32 %v1529_v29, 16  ;;  %v1438_v35 = vand.u32 2147483647, %v1437_v30  ;;  %vm3077_vm4 = vcmp.lt.s32.totalorder %v3076_v32, 0 }
 0x11b   : > { %v1555_v24 = vshll.u32 %v1551_v45, 16  ;;  %vm1557_vm5 = vc.u32 %v1549_v51, %v1553_v2  ;;  %v1559_v13 = vadd.s32 %v1553_v2, %v1549_v51  ;;  %v654_v61 = vsub.s32 0, %v3873_v7 }
 0x11c   : > { %vm1535_vm6 = vc.u32 %v1527_v60, %v1531_v25  ;;  %v1537_v15 = vadd.s32 %v1531_v25, %v1527_v60  ;;  %v1558_v4 = vsel %vm1557_vm5, 1, %v5721_v8  ;;  %v1490_v14 = vshrl.u32 %v5723_v40, %v3812_v9 }
 0x11d   : > { %v1536_v34 = vsel %vm1535_vm6, 1, %v5721_v8  ;;  %v1560_v49 = vadd.s32 %v1558_v4, %v1552_v41  ;;  %v1532_v62 = vshrl.u32 %v1528_v39, 16  ;;  %vm1561_vm8 = vc.u32 %v1559_v13, %v1555_v24 }
 0x11e   : > { %v1538_v0 = vadd.s32 %v1536_v34, %v1530_v26  ;;  %vm1539_vm7 = vc.u32 %v1537_v15, %v1533_v10  ;;  %vm653_vm9 = vcmp.lt.s32.totalorder %v3873_v7, 0  ;;  %v1511_v16 = vsel %vm1509_vm2, %v3836_v50, 2102212464 }
 0x11f   : > { %v1540_v37 = vsel %vm1539_vm7, 1, %v5721_v8  ;;  %v1554_v30 = vshrl.u32 %v1550_v18, 16  ;;  %v1534_v31 = vshrl.u32 %v1529_v29, 16  ;;  %v1562_v57 = vsel %vm1561_vm8, 1, %v5721_v8 }
 0x120   : > { %v1542_v9 = vadd.s32 %v1540_v37, %v1538_v0  ;;  %v2093_v51 = vand.u32 2139095040, %v3880_v52  ;;  %v518_v60 = vxor.u32 2147483648, %v517_v1  ;;  %v2045_v39 = vsel %vm3077_vm4, 0, %v3076_v32 }
 0x121   : > { %v1556_v41 = vshrl.u32 %v1551_v45, 16  ;;  %v1564_v2 = vadd.s32 %v1562_v57, %v1560_v49  ;;  %v1441_v26 = vmul.f32 %v1440_v17, %v1438_v35  ;;  %v655_v25 = vsel %vm653_vm9, %v654_v61, %v3873_v7 }
 0x122   : > { %v1543_v10 = vadd.s32 %v1542_v9, %v1532_v62  ;;  %v2094_v15 = vshrl.u32 %v2093_v51, 23  ;;  %v1510_v50 = vsel %vm1506_vm0, %v1490_v14, %v3829_v43  ;;  %v1512_v18 = vsel %vm1508_vm1, %v3831_v20, %v1511_v16 }
 0x123   : > { %v3897_v29 = vadd.s32 %v1559_v13, %v1555_v24  ;;  %v1565_v4 = vadd.s32 %v1564_v2, %v1554_v30  ;;  %v2046_v34 = vsub.s32 32, %v2045_v39  ;;  %v2050_v32 = vsub.s32 4294967266, %v2045_v39  ;;  %v3920_v30 = vpop.f32.mrf.mxu0 }
 0x124   : > { %v3899_v45 = vadd.s32 %v1543_v10, %v1534_v31  ;;  %v3078_v17 = vadd.s32 4294967169, %v2094_v15  ;;  %v656_v35 = vclz %v655_v25  ;;  %v5705_v49 = vand.u32 2147483647, %v3880_v52  ;;  %5826 = vst [vmem:[#allocation18_spill] sm:$0xff] %v3920_v30 }
 0x125   : > { %v1566_v61 = vadd.s32 %v1565_v4, %v1556_v41  ;;  %vm5741_vm10 = vcmp.lt.s32.totalorder %v3422_v19, 0  ;;  %v2030_v43 = vadd.s32 %v3697_v3, %v3695_v12  ;;  %v1513_v20 = vsel %vm1507_vm3, %v1510_v50, %v1512_v18 }
 0x126   : > { %v2100_v24 = vadd.s32 1, %v3078_v17  ;;  %vm3909_vm11 = vcmp.le.f32.partialorder %v396_v23, 0.7853982  ;;  %v5823_v13 = vmov 0  ;;  %v1442_v14 = vxor.u32 2147483648, %v1441_v26 }
 0x127   : > { %v5824_v13 = vsel %vm3909_vm11, 4294967295, %v5823_v13  ;;  %vm1569_vm12 = vc.u32 %v3899_v45, %v3897_v29  ;;  %v1570_v62 = vadd.s32 1, %v1566_v61  ;;  %v519_v0 = vsel %vm5741_vm10, %v518_v60, %v517_v1 }
 0x128   : > { %5825 = vst [vmem:[#allocation17_spill] sm:$0xff] %v5824_v13  ;;  %v2048_v16 = vshrl.u32 %v2030_v43, %v2046_v34  ;;  %v2051_v12 = vadd.s32 127, %v2050_v32  ;;  %vm2101_vm13 = vcmp.gt.s32.totalorder %v2100_v24, 0  ;;  %v3049_v3 = vadd.s32 4294967294, %v656_v35 }
 0x129   : > { %v1567_v63 = vmul.u32 %v3838_v5, %v1513_v20  ;;  %v2097_v23 = vand.u32 8388607, %v5705_v49  ;;  %v2102_v37 = vsel %vm2101_vm13, %v2100_v24, 0  ;;  %vm5753_vm14 = vcmp.lt.s32.totalorder %v3425_v21, 0 }
 0x12a   : > { %v2047_v31 = vshll.u32 %v3791_v59, %v2045_v39  ;;  %v1571_v9 = vsel %vm1569_vm12, %v1570_v62, %v1566_v61  ;;  %v2104_v57 = vand.u32 31, %v2102_v37  ;;  %v3927_v1 = vsel %vm3909_vm11, %v3422_v19, %v519_v0 }
 0x12b   : > { %5827 = vst [vmem:[#allocation19_spill] sm:$0xff] %v3927_v1  ;;  %v1443_v5 = vsel %vm5753_vm14, %v1442_v14, %v1441_v26  ;;  %v2052_v60 = vshll.u32 %v2051_v12, 23  ;;  %v707_v2 = vand.u32 2139095040, %v3920_v30  ;;  %vm3050_vm15 = vcmp.lt.s32.totalorder %v3049_v3, 0 }
 0x12c   : > { %v3931_v51 = vor.u32 %v2048_v16, %v2047_v31  ;;  %v2105_v41 = vsub.s32 32, %v2104_v57  ;;  %v3934_v25 = vadd.s32 %v1571_v9, %v1567_v63  ;;  %v2098_v59 = vor.u32 8388608, %v2097_v23 }
 0x12d   : > { %v3936_v39 = vshrl.u32 %v2102_v37, 5  ;;  %v2107_v10 = vshll.u32 %v5723_v40, %v2104_v57  ;;  %v2110_v50 = vshll.u32 %v5718_v42, %v2104_v57  ;;  %v2113_v26 = vshll.u32 %v5716_v44, %v2104_v57 }
 0x12e   : > { %v2108_v15 = vshrl.u32 %v5718_v42, %v2105_v41  ;;  %v2111_v18 = vshrl.u32 %v5716_v44, %v2105_v41  ;;  %v2114_v4 = vshrl.u32 %v5714_v46, %v2105_v41  ;;  %v2116_v34 = vshll.u32 %v5714_v46, %v2104_v57 }
 0x12f   : > { %v2117_v32 = vshrl.u32 %v5712_v48, %v2105_v41  ;;  %vm3948_vm0 = vcmp.le.f32.partialorder %v1320_v27, 0.7853982  ;;  %v5828_v17 = vmov 0  ;;  %v2119_v61 = vshll.u32 %v5712_v48, %v2104_v57 }
 0x130   : > { %v5829_v17 = vsel %vm3948_vm0, 4294967295, %v5828_v17  ;;  %v3952_v35 = vor.u32 %v2108_v15, %v2107_v10  ;;  %v2120_v43 = vshrl.u32 %v5710_v56, %v2105_v41  ;;  %v708_v20 = vshrl.u32 %v707_v2, 23 }
 0x131   : > { %5830 = vst [vmem:[#allocation20_spill] sm:$0xff] %v5829_v17  ;;  %v1573_v24 = vadd.s32 536870912, %v3934_v25  ;;  %v3957_v14 = vor.u32 %v2111_v18, %v2110_v50  ;;  %v2115_v62 = vor.u32 %v2114_v4, %v2113_v26  ;;  %v2118_v0 = vor.u32 %v2117_v32, %v2116_v34 }
 0x132   : > { %v2121_v16 = vor.u32 %v2120_v43, %v2119_v61  ;;  %vm2122_vm1 = vcmp.lt.s32.totalorder %v3936_v39, 1  ;;  %vm2125_vm2 = vcmp.lt.s32.totalorder %v3936_v39, 4  ;;  %v3961_v27 = vshll.u32 %v2098_v59, 8 }
 0x133   : > { %v3964_v12 = vsel %vm3050_vm15, 0, %v3049_v3  ;;  %vm2124_vm3 = vcmp.lt.s32.totalorder %v3936_v39, 3  ;;  %v2130_v63 = vsel %vm2122_vm1, %v3952_v35, %v3957_v14  ;;  %v2131_v23 = vsel %vm2125_vm2, %v2118_v0, 920167782 }
 0x134   : > { %v3973_v37 = vor.u32 4788187, %v2052_v60  ;;  %vm2123_vm4 = vcmp.lt.s32.totalorder %v3936_v39, 2  ;;  %v2132_v31 = vsel %vm2124_vm3, %v2115_v62, %v2131_v23  ;;  %v3051_v9 = vadd.s32 4294967169, %v708_v20 }
 0x135   : > { %v3978_v3 = vshrl.u32 %v1573_v24, 30  ;;  %v2133_v57 = vsel %vm2123_vm4, %v2130_v63, %v2132_v31  ;;  %v2134_v2 = vsel %vm2122_vm1, %v3957_v14, %v2115_v62  ;;  %v2135_v59 = vsel %vm2125_vm2, %v2121_v16, 1326507024 }
 0x136   : > { %v664_v60 = vsub.s32 4294967266, %v3964_v12  ;;  %v2136_v10 = vsel %vm2124_vm3, %v2118_v0, %v2135_v59  ;;  %v2139_v15 = vand.u32 65535, %v3961_v27  ;;  %v2164_v50 = vshrl.u32 %v2133_v57, 16 }
 0x137   : > { %5831 = vst [vmem:[#allocation21_spill] sm:$0xff] %v3978_v3  ;;  %v2137_v26 = vsel %vm2123_vm4, %v2134_v2, %v2136_v10  ;;  %v2140_v18 = vshrl.u32 %v3961_v27, 16  ;;  %v2163_v4 = vand.u32 65535, %v2133_v57  ;;  %v5709_v34 = vand.u32 2147483647, %v3920_v30 }
 0x138   : > { %v2141_v32 = vand.u32 65535, %v2137_v26  ;;  %v2142_v61 = vshrl.u32 %v2137_v26, 16  ;;  %v2166_v43 = vmul.u32 %v2164_v50, %v2139_v15  ;;  %v714_v20 = vadd.s32 1, %v3051_v9 }
 0x139   : > { %v3998_v24 = vsel %vm3948_vm0, %v3425_v21, %v1443_v5  ;;  %v4003_v16 = vadd.s32 %v3785_v58, %v3795_v38  ;;  %v1575_v63 = vshll.u32 %v3978_v3, 30  ;;  %v4007_v31 = vadd.s32 127, %v664_v60 }
 0x13a   : > { %5832 = vst [vmem:[#allocation22_spill] sm:$0xff] %v3998_v24  ;;  %v2144_v57 = vmul.u32 %v2142_v61, %v2139_v15  ;;  %v2145_v2 = vmul.u32 %v2141_v32, %v2140_v18  ;;  %v2106_v9 = vshrl.u32 %v5723_v40, %v2105_v41  ;;  %v2167_v59 = vmul.u32 %v2163_v4, %v2140_v18 }
 0x13b   : > { %v2169_v10 = vshll.u32 %v2166_v43, 16  ;;  %v4012_v5 = vand.u32 8388607, %v5709_v34  ;;  %v2143_v26 = vmul.u32 %v2141_v32, %v2139_v15  ;;  %v2165_v58 = vmul.u32 %v2163_v4, %v2139_v15 }
 0x13c   : > { %v2147_v49 = vshll.u32 %v2144_v57, 16  ;;  %vm715_vm5 = vcmp.gt.s32.totalorder %v714_v20, 0  ;;  %v4015_v38 = vsub.s32 %v3934_v25, %v1575_v63  ;;  %v2127_v60 = vsel %vm2125_vm2, %v2115_v62, 2102212464 }
 0x13d   : > { %v2146_v36 = vmul.u32 %v2142_v61, %v2140_v18  ;;  %v2168_v6 = vmul.u32 %v2164_v50, %v2140_v18  ;;  %v2149_v53 = vshll.u32 %v2145_v2, 16  ;;  %vm2173_vm7 = vc.u32 %v2165_v58, %v2169_v10 }
 0x13e   : > { %vm2151_vm6 = vc.u32 %v2143_v26, %v2147_v49  ;;  %v2153_v41 = vadd.s32 %v2147_v49, %v2143_v26  ;;  %v2171_v34 = vshll.u32 %v2167_v59, 16  ;;  %v2174_v32 = vsel %vm2173_vm7, 1, %v5721_v8 }
 0x13f   : > { %v2152_v0 = vsel %vm2151_vm6, 1, %v5721_v8  ;;  %v716_v23 = vsel %vm715_vm5, %v714_v20, 0  ;;  %v2175_v4 = vadd.s32 %v2169_v10, %v2165_v58  ;;  %v2176_v25 = vadd.s32 %v2174_v32, %v2168_v6 }
 0x140   : > { %v2154_v15 = vadd.s32 %v2152_v0, %v2146_v36  ;;  %vm2155_vm8 = vc.u32 %v2153_v41, %v2149_v53  ;;  %vm1577_vm9 = vcmp.lt.s32.totalorder %v4015_v38, 0  ;;  %v1578_v62 = vsub.s32 0, %v4015_v38 }
 0x141   : > { %v2126_v50 = vsel %vm2122_vm1, %v2106_v9, %v3952_v35  ;;  %v2156_v49 = vsel %vm2155_vm8, 1, %v5721_v8  ;;  %v2148_v18 = vshrl.u32 %v2144_v57, 16  ;;  %vm2177_vm12 = vc.u32 %v2175_v4, %v2171_v34 }
 0x142   : > { %v2158_v61 = vadd.s32 %v2156_v49, %v2154_v15  ;;  %v718_v63 = vand.u32 31, %v716_v23  ;;  %v2128_v53 = vsel %vm2124_vm3, %v3957_v14, %v2127_v60  ;;  %v2150_v36 = vshrl.u32 %v2145_v2, 16 }
 0x143   : > { %v2170_v6 = vshrl.u32 %v2166_v43, 16  ;;  %v2178_v20 = vsel %vm2177_vm12, 1, %v5721_v8  ;;  %v4031_v26 = vshrl.u32 %v716_v23, 5  ;;  %v2172_v35 = vshrl.u32 %v2167_v59, 16 }
 0x144   : > { %v2159_v0 = vadd.s32 %v2158_v61, %v2148_v18  ;;  %v2180_v10 = vadd.s32 %v2178_v20, %v2176_v25  ;;  %v719_v58 = vsub.s32 32, %v718_v63  ;;  %v721_v9 = vshll.u32 %v5723_v40, %v718_v63 }
 0x145   : > { %v724_v57 = vshll.u32 %v5718_v42, %v718_v63  ;;  %v727_v41 = vshll.u32 %v5716_v44, %v718_v63  ;;  %v730_v43 = vshll.u32 %v5714_v46, %v718_v63  ;;  %v4040_v2 = vadd.s32 %v2175_v4, %v2171_v34 }
 0x146   : > { %v4036_v32 = vadd.s32 %v2159_v0, %v2150_v36  ;;  %v2181_v15 = vadd.s32 %v2180_v10, %v2170_v6  ;;  %v722_v14 = vshrl.u32 %v5718_v42, %v719_v58  ;;  %v725_v23 = vshrl.u32 %v5716_v44, %v719_v58 }
 0x147   : > { %v728_v60 = vshrl.u32 %v5714_v46, %v719_v58  ;;  %v731_v59 = vshrl.u32 %v5712_v48, %v719_v58  ;;  %v1579_v25 = vsel %vm1577_vm9, %v1578_v62, %v4015_v38  ;;  %v2129_v49 = vsel %vm2123_vm4, %v2126_v50, %v2128_v53  ;;  %v4060_v53 = vpop.f32.mrf.mxu1 }
 0x148   : > { %v2182_v18 = vadd.s32 %v2181_v15, %v2172_v35  ;;  %vm736_vm13 = vcmp.lt.s32.totalorder %v4031_v26, 1  ;;  %vm2185_vm15 = vc.u32 %v4036_v32, %v4040_v2  ;;  %v723_v34 = vor.u32 %v722_v14, %v721_v9  ;;  %5833 = vst [vmem:[#allocation23_spill] sm:$0xff] %v4060_v53 }
 0x149   : > { %v4053_v4 = vor.u32 %v725_v23, %v724_v57  ;;  %v729_v61 = vor.u32 %v728_v60, %v727_v41  ;;  %v732_v6 = vor.u32 %v731_v59, %v730_v43  ;;  %v733_v20 = vshll.u32 %v5712_v48, %v718_v63 }
 0x14a   : > { %v2186_v36 = vadd.s32 1, %v2182_v18  ;;  %v734_v0 = vshrl.u32 %v5710_v56, %v719_v58  ;;  %v1580_v62 = vclz %v1579_v25  ;;  %v2183_v39 = vmul.u32 %v3961_v27, %v2129_v49 }
 0x14b   : > { %v712_v50 = vor.u32 8388608, %v4012_v5  ;;  %vm739_vm1 = vcmp.lt.s32.totalorder %v4031_v26, 4  ;;  %v660_v10 = vsub.s32 32, %v3964_v12  ;;  %vm738_vm2 = vcmp.lt.s32.totalorder %v4031_v26, 3 }
 0x14c   : > { %v2187_v35 = vsel %vm2185_vm15, %v2186_v36, %v2182_v18  ;;  %v735_v9 = vor.u32 %v734_v0, %v733_v20  ;;  %v666_v57 = vshll.u32 %v4007_v31, 23  ;;  %vm737_vm3 = vcmp.lt.s32.totalorder %v4031_v26, 2 }
 0x14d   : > { %v4065_v63 = vadd.s32 %v2187_v35, %v2183_v39  ;;  %v744_v27 = vsel %vm736_vm13, %v723_v34, %v4053_v4  ;;  %v745_v5 = vsel %vm739_vm1, %v732_v6, 920167782  ;;  %v748_v41 = vsel %vm736_vm13, %v4053_v4, %v729_v61 }
 0x14e   : > { %v749_v15 = vsel %vm739_vm1, %v735_v9, 1326507024  ;;  %v1631_v31 = vand.u32 2139095040, %v4060_v53  ;;  %v3067_v14 = vadd.s32 4294967294, %v1580_v62  ;;  %v746_v43 = vsel %vm738_vm2, %v729_v61, %v745_v5 }
 0x14f   : > { %v750_v23 = vsel %vm738_vm2, %v732_v6, %v749_v15  ;;  %v4083_v60 = vshll.u32 %v712_v50, 8  ;;  %v5834_v59 = vand.u32 2147483647, %v3973_v37  ;;  %v5835_v25 = vcvt.s32.f32 %v3931_v51 }
 0x150   : > { %v662_v18 = vshrl.u32 %v4003_v16, %v660_v10  ;;  %v747_v36 = vsel %vm737_vm3, %v744_v27, %v746_v43  ;;  %v751_v20 = vsel %vm737_vm3, %v748_v41, %v750_v23  ;;  %v2189_v0 = vadd.s32 536870912, %v4065_v63 }
 0x151   : > { %v4089_v49 = vmul.f32 %v5835_v25, %v5834_v59  ;;  %v753_v6 = vand.u32 65535, %v4083_v60  ;;  %v754_v62 = vshrl.u32 %v4083_v60, 16  ;;  %v755_v39 = vand.u32 65535, %v751_v20 }
 0x152   : > { %v4099_v37 = vor.u32 4788187, %v666_v57  ;;  %v756_v51 = vshrl.u32 %v751_v20, 16  ;;  %v777_v50 = vand.u32 65535, %v747_v36  ;;  %v778_v35 = vshrl.u32 %v747_v36, 16 }
 0x153   : > { %vm3068_vm4 = vcmp.lt.s32.totalorder %v3067_v14, 0  ;;  %v720_v16 = vshrl.u32 %v5723_v40, %v719_v58  ;;  %v759_v10 = vmul.u32 %v755_v39, %v754_v62  ;;  %v1632_v9 = vshrl.u32 %v1631_v31, 23 }
 0x154   : > { %v757_v27 = vmul.u32 %v755_v39, %v753_v6  ;;  %v758_v5 = vmul.u32 %v756_v51, %v753_v6  ;;  %v779_v41 = vmul.u32 %v777_v50, %v753_v6  ;;  %v780_v15 = vmul.u32 %v778_v35, %v753_v6 }
 0x155   : > { %v4102_v43 = vshrl.u32 %v2189_v0, 30  ;;  %v760_v23 = vmul.u32 %v756_v51, %v754_v62  ;;  %v781_v59 = vmul.u32 %v777_v50, %v754_v62  ;;  %v5720_v25 = vand.u32 2147483647, %v4060_v53 }
 0x156   : > { %v761_v57 = vshll.u32 %v758_v5, 16  ;;  %v763_v56 = vshll.u32 %v759_v10, 16  ;;  %v782_v20 = vmul.u32 %v778_v35, %v754_v62  ;;  %v783_v48 = vshll.u32 %v780_v15, 16 }
 0x157   : > { %v4106_v36 = vsel %vm3068_vm4, 0, %v3067_v14  ;;  %v740_v58 = vsel %vm736_vm13, %v720_v16, %v723_v34  ;;  %v741_v31 = vsel %vm739_vm1, %v729_v61, 2102212464  ;;  %v785_v6 = vshll.u32 %v781_v59, 16 }
 0x158   : > { %vm765_vm5 = vc.u32 %v757_v27, %v761_v57  ;;  %v767_v0 = vadd.s32 %v761_v57, %v757_v27  ;;  %vm787_vm6 = vc.u32 %v779_v41, %v783_v48  ;;  %v3069_v39 = vadd.s32 4294967169, %v1632_v9 }
 0x159   : > { %v2191_v51 = vshll.u32 %v4102_v43, 30  ;;  %v766_v50 = vsel %vm765_vm5, 1, %v5721_v8  ;;  %v788_v62 = vsel %vm787_vm6, 1, %v5721_v8  ;;  %v789_v35 = vadd.s32 %v783_v48, %v779_v41 }
 0x15a   : > { %v762_v14 = vshrl.u32 %v758_v5, 16  ;;  %v768_v46 = vadd.s32 %v766_v50, %v760_v23  ;;  %vm769_vm7 = vc.u32 %v767_v0, %v763_v56  ;;  %v790_v44 = vadd.s32 %v788_v62, %v782_v20 }
 0x15b   : > { %v742_v34 = vsel %vm738_vm2, %v4053_v4, %v741_v31  ;;  %v770_v61 = vsel %vm769_vm7, 1, %v5721_v8  ;;  %v784_v16 = vshrl.u32 %v780_v15, 16  ;;  %vm791_vm8 = vc.u32 %v789_v35, %v785_v6 }
 0x15c   : > { %v764_v9 = vshrl.u32 %v759_v10, 16  ;;  %v772_v27 = vadd.s32 %v770_v61, %v768_v46  ;;  %v792_v57 = vsel %vm791_vm8, 1, %v5721_v8  ;;  %v1638_v42 = vadd.s32 1, %v3069_v39 }
 0x15d   : > { %v661_v48 = vshll.u32 %v3873_v7, %v3964_v12  ;;  %v1588_v5 = vsub.s32 4294967266, %v4106_v36  ;;  %v786_v56 = vshrl.u32 %v781_v59, 16  ;;  %v794_v41 = vadd.s32 %v792_v57, %v790_v44 }
 0x15e   : > { %v4124_v23 = vsub.s32 %v4065_v63, %v2191_v51  ;;  %v773_v4 = vadd.s32 %v772_v27, %v762_v14  ;;  %v4126_v20 = vadd.s32 %v789_v35, %v785_v6  ;;  %vm1639_vm9 = vcmp.gt.s32.totalorder %v1638_v42, 0 }
 0x15f   : > { %v663_v15 = vor.u32 %v662_v18, %v661_v48  ;;  %v743_v46 = vsel %vm737_vm3, %v740_v58, %v742_v34  ;;  %v795_v10 = vadd.s32 %v794_v41, %v784_v16  ;;  %v1640_v31 = vsel %vm1639_vm9, %v1638_v42, 0 }
 0x160   : > { %v668_v0 = vand.u32 2147483647, %v4099_v37  ;;  %v1568_v7 = vadd.s32 %v3897_v29, %v3899_v45  ;;  %v4133_v12 = vadd.s32 %v773_v4, %v764_v9  ;;  %v1635_v44 = vand.u32 8388607, %v5720_v25 }
 0x161   : > { %v1584_v63 = vsub.s32 32, %v4106_v36  ;;  %v1585_v18 = vshll.u32 %v4015_v38, %v4106_v36  ;;  %v796_v59 = vadd.s32 %v795_v10, %v786_v56  ;;  %v1642_v26 = vand.u32 31, %v1640_v31 }
 0x162   : > { %v1589_v58 = vadd.s32 127, %v1588_v5  ;;  %vm2193_vm12 = vcmp.lt.s32.totalorder %v4124_v23, 0  ;;  %v797_v42 = vmul.u32 %v4083_v60, %v743_v46  ;;  %vm799_vm13 = vc.u32 %v4133_v12, %v4126_v20 }
 0x163   : > { %v800_v29 = vadd.s32 1, %v796_v59  ;;  %v4144_v45 = vsub.s32 32, %v1642_v26  ;;  %v1645_v37 = vshll.u32 %v5723_v40, %v1642_v26  ;;  %v5836_v6 = vmov 2475754826  }
 0x164   : > { %v1648_v39 = vshll.u32 %v5836_v6, %v1642_v26  ;;  %v2194_v51 = vsub.s32 0, %v4124_v23  ;;  %v1636_v38 = vor.u32 8388608, %v1635_v44  ;;  %v4149_v36 = vshrl.u32 %v1640_v31, 5 }
 0x165   : > { %v5837_v50 = vmov 2131351028   ;;  %v801_v35 = vsel %vm799_vm13, %v800_v29, %v796_v59  ;;  %v1646_v60 = vshrl.u32 %v5836_v6, %v4144_v45  ;;  %v5838_v34 = vmov 2102212464  }
 0x166   : > { %v1651_v62 = vshll.u32 %v5837_v50, %v1642_v26  ;;  %v1649_v14 = vshrl.u32 %v5837_v50, %v4144_v45  ;;  %v1654_v61 = vshll.u32 %v5838_v34, %v1642_v26  ;;  %v1586_v16 = vshrl.u32 %v1568_v7, %v1584_v63 }
 0x167   : > { %v1590_v9 = vshll.u32 %v1589_v58, 23  ;;  %v802_v27 = vadd.s32 %v801_v35, %v797_v42  ;;  %v1652_v57 = vshrl.u32 %v5838_v34, %v4144_v45  ;;  %vm5761_vm15 = vcmp.lt.s32.totalorder %v3548_v33, 0 }
 0x168   : > { %v4160_v48 = vor.u32 %v1646_v60, %v1645_v37  ;;  %v4162_v5 = vor.u32 %v1649_v14, %v1648_v39  ;;  %v5839_v56 = vmov 920167782   ;;  %v2195_v46 = vsel %vm2193_vm12, %v2194_v51, %v4124_v23 }
 0x169   : > { %v1655_v41 = vshrl.u32 %v5839_v56, %v4144_v45  ;;  %v1657_v4 = vshll.u32 %v5839_v56, %v1642_v26  ;;  %v803_v10 = vadd.s32 536870912, %v802_v27  ;;  %v1653_v31 = vor.u32 %v1652_v57, %v1651_v62 }
 0x16a   : > { %v5840_v7 = vmov 1326507024   ;;  %vm1660_vm1 = vcmp.lt.s32.totalorder %v4149_v36, 1  ;;  %vm1662_vm2 = vcmp.lt.s32.totalorder %v4149_v36, 3  ;;  %v4174_v59 = vshll.u32 %v1636_v38, 8 }
 0x16b   : > { %v1658_v44 = vshrl.u32 %v5840_v7, %v4144_v45  ;;  %v1656_v63 = vor.u32 %v1655_v41, %v1654_v61  ;;  %v1591_v58 = vor.u32 4788187, %v1590_v9  ;;  %vm1661_vm3 = vcmp.lt.s32.totalorder %v4149_v36, 2 }
 0x16c   : > { %vm1663_vm4 = vcmp.lt.s32.totalorder %v4149_v36, 4  ;;  %v2058_v26 = vxor.u32 2147483648, %v4089_v49  ;;  %v670_v29 = vcvt.s32.f32 %v663_v15  ;;  %v1668_v37 = vsel %vm1660_vm1, %v4160_v48, %v4162_v5 }
 0x16d   : > { %v1659_v42 = vor.u32 %v1658_v44, %v1657_v4  ;;  %v1669_v39 = vsel %vm1663_vm4, %v1656_v63, 920167782  ;;  %v1587_v51 = vor.u32 %v1586_v16, %v1585_v18  ;;  %v2196_v38 = vclz %v2195_v46 }
 0x16e   : > { %v4185_v62 = vshrl.u32 %v803_v10, 30  ;;  %v1670_v35 = vsel %vm1662_vm2, %v1653_v31, %v1669_v39  ;;  %v1672_v15 = vsel %vm1660_vm1, %v4162_v5, %v1653_v31  ;;  %v1677_v61 = vand.u32 65535, %v4174_v59 }
 0x16f   : > { %v1671_v60 = vsel %vm1661_vm3, %v1668_v37, %v1670_v35  ;;  %v1673_v14 = vsel %vm1663_vm4, %v1659_v42, 1326507024  ;;  %v4197_v9 = vmul.f32 %v670_v29, %v668_v0  ;;  %v1592_v18 = vand.u32 2147483647, %v1591_v58  ;;  %v4214_v35 = vpop.f32.mrf.mxu3 }
 0x170   : > { %5841 = vst [vmem:[#allocation24_spill] sm:$0xff] %v4185_v62  ;;  %v1674_v16 = vsel %vm1662_vm2, %v1656_v63, %v1673_v14  ;;  %v1678_v57 = vshrl.u32 %v4174_v59, 16  ;;  %v4204_v41 = vmul.f32 %v3998_v24, %v3998_v24  ;;  %v1701_v46 = vand.u32 65535, %v1671_v60 }
 0x171   : > { %v1675_v4 = vsel %vm1661_vm3, %v1672_v15, %v1674_v16  ;;  %v1702_v10 = vshrl.u32 %v1671_v60, 16  ;;  %v2059_v0 = vsel %vm5761_vm15, %v2058_v26, %v4089_v49  ;;  %v1594_v44 = vcvt.s32.f32 %v1587_v51 }
 0x172   : > { %5842 = vst [vmem:[#allocation25_spill] sm:$0xff] %v4204_v41  ;;  %v805_v58 = vshll.u32 %v4185_v62, 30  ;;  %v1679_v42 = vand.u32 65535, %v1675_v4  ;;  %v3079_v63 = vadd.s32 4294967294, %v2196_v38  ;;  %v1680_v29 = vshrl.u32 %v1675_v4, 16 }
 0x173   : > { %v1704_v37 = vmul.u32 %v1702_v10, %v1677_v61  ;;  %v4212_v39 = vmul.u32 %v1701_v46, %v1678_v57  ;;  %v672_v14 = vxor.u32 2147483648, %v4197_v9  ;;  %v4217_v15 = vmul.f32 %v1594_v44, %v1592_v18 }
 0x174   : > { %v1683_v60 = vmul.u32 %v1679_v42, %v1678_v57  ;;  %v1703_v16 = vmul.u32 %v1701_v46, %v1677_v61  ;;  %v1644_v49 = vshrl.u32 %v5723_v40, %v4144_v45  ;;  %v1681_v26 = vmul.u32 %v1679_v42, %v1677_v61 }
 0x175   : > { %v1682_v51 = vmul.u32 %v1680_v29, %v1677_v61  ;;  %v1707_v25 = vshll.u32 %v1704_v37, 16  ;;  %v5843_v38 = vand.u32 2147483647, %v3548_v33  ;;  %v5844_v4 = vmov 0 }
 0x176   : > { %vm5748_vm6 = vcmp.lt.s32.totalorder %v3640_v22, 0  ;;  %v4228_v8 = vsub.s32 %v802_v27, %v805_v58  ;;  %v1706_v18 = vmul.u32 %v1702_v10, %v1678_v57  ;;  %v1709_v44 = vshll.u32 %v4212_v39, 16 }
 0x177   : > { %vm4223_vm5 = vcmp.le.f32.partialorder %v5843_v38, 0.7853982  ;;  %vm3080_vm7 = vcmp.lt.s32.totalorder %v3079_v63, 0  ;;  %v1684_v45 = vmul.u32 %v1680_v29, %v1678_v57  ;;  %v1685_v42 = vshll.u32 %v1682_v51, 16 }
 0x178   : > { %v5845_v4 = vsel %vm4223_vm5, 4294967295, %v5844_v4  ;;  %v2247_v61 = vand.u32 2139095040, %v4214_v35  ;;  %v1665_v38 = vsel %vm1663_vm4, %v1653_v31, 2102212464  ;;  %v1687_v40 = vshll.u32 %v1683_v60, 16 }
 0x179   : > { %5846 = vst [vmem:[#allocation26_spill] sm:$0xff] %v5845_v4  ;;  %vm1711_vm8 = vc.u32 %v1703_v16, %v1707_v25  ;;  %v1713_v13 = vadd.s32 %v1707_v25, %v1703_v16  ;;  %v1664_v27 = vsel %vm1660_vm1, %v1644_v49, %v4160_v48  ;;  %vm1689_vm9 = vc.u32 %v1681_v26, %v1685_v42 }
 0x17a   : > { %v1691_v10 = vadd.s32 %v1685_v42, %v1681_v26  ;;  %v5847_v58 = vmov 0   ;;  %v808_v46 = vsub.s32 0, %v4228_v8  ;;  %vm4243_vm13 = vcmp.le.f32.partialorder %v5848_v55, 0.7853982 }
 0x17b   : > { %v1712_v19 = vsel %vm1711_vm8, 1, %v5847_v58  ;;  %v1690_v57 = vsel %vm1689_vm9, 1, %v5847_v58  ;;  %vm1715_vm12 = vc.u32 %v1713_v13, %v1709_v44  ;;  %v5849_v31 = vmov 0 }
 0x17c   : > { %v1714_v29 = vadd.s32 %v1712_v19, %v1706_v18  ;;  %v5850_v31 = vsel %vm4243_vm13, 4294967295, %v5849_v31  ;;  %vm5760_vm4 = vcmp.lt.s32.totalorder %v3751_v11, 0  ;;  %vm807_vm1 = vcmp.lt.s32.totalorder %v4228_v8, 0 }
 0x17d   : > { %5851 = vst [vmem:[#allocation27_spill] sm:$0xff] %v5850_v31  ;;  %v1666_v25 = vsel %vm1662_vm2, %v4162_v5, %v1665_v38  ;;  %v1692_v48 = vadd.s32 %v1690_v57, %v1684_v45  ;;  %v1708_v16 = vshrl.u32 %v1704_v37, 16  ;;  %v1686_v49 = vshrl.u32 %v1682_v51, 16 }
 0x17e   : > { %vm1693_vm8 = vc.u32 %v1691_v10, %v1687_v40  ;;  %v1716_v19 = vsel %vm1715_vm12, 1, %v5847_v58  ;;  %v2248_v26 = vshrl.u32 %v2247_v61, 23  ;;  %v2199_v55 = vsel %vm3080_vm7, 0, %v3079_v63 }
 0x17f   : > { %v1694_v18 = vsel %vm1693_vm8, 1, %v5847_v58  ;;  %v1710_v42 = vshrl.u32 %v4212_v39, 16  ;;  %v1718_v54 = vadd.s32 %v1716_v19, %v1714_v29  ;;  %v809_v1 = vsel %vm807_vm1, %v808_v46, %v4228_v8 }
 0x180   : > { %v1688_v62 = vshrl.u32 %v1683_v60, 16  ;;  %v1696_v24 = vadd.s32 %v1694_v18, %v1692_v48  ;;  %v3081_v17 = vadd.s32 4294967169, %v2248_v26  ;;  %v4260_v5 = vsel %vm4223_vm5, %v3548_v33, %v2059_v0 }
 0x181   : > { %5852 = vst [vmem:[#allocation28_spill] sm:$0xff] %v4260_v5  ;;  %v673_v40 = vsel %vm5748_vm6, %v672_v14, %v4197_v9  ;;  %v1667_v63 = vsel %vm1661_vm3, %v1664_v27, %v1666_v25  ;;  %v1719_v37 = vadd.s32 %v1718_v54, %v1708_v16  ;;  %v1596_v39 = vxor.u32 2147483648, %v4217_v15 }
 0x182   : > { %v1697_v51 = vadd.s32 %v1696_v24, %v1686_v49  ;;  %v4268_v46 = vadd.s32 %v1713_v13, %v1709_v44  ;;  %v2254_v60 = vadd.s32 1, %v3081_v17  ;;  %v5853_v45 = vand.u32 2147483647, %v3751_v11 }
 0x183   : > { %v5854_v61 = vmov 0  ;;  %v2200_v0 = vsub.s32 32, %v2199_v55  ;;  %v2204_v38 = vsub.s32 4294967266, %v2199_v55  ;;  %v810_v10 = vclz %v809_v1 }
 0x184   : > { %vm4272_vm2 = vcmp.le.f32.partialorder %v5853_v45, 0.7853982  ;;  %v1720_v9 = vadd.s32 %v1719_v37, %v1710_v42  ;;  %v4276_v14 = vadd.s32 %v1697_v51, %v1688_v62  ;;  %v1721_v54 = vmul.u32 %v4174_v59, %v1667_v63 }
 0x185   : > { %v5855_v61 = vsel %vm4272_vm2, 4294967295, %v5854_v61  ;;  %v5857_v36 = vand.u32 2147483647, %v4214_v35  ;;  %vm2255_vm3 = vcmp.gt.s32.totalorder %v2254_v60, 0  ;;  %v4283_v13 = vmul.f32 %v4260_v5, %v4260_v5 }
 0x186   : > { %5856 = vst [vmem:[#allocation29_spill] sm:$0xff] %v5855_v61  ;;  %v2184_v17 = vadd.s32 %v4040_v2, %v4036_v32  ;;  %v1724_v44 = vadd.s32 1, %v1720_v9  ;;  %v2256_v27 = vsel %vm2255_vm3, %v2254_v60, 0  ;;  %v4290_v1 = vsel %vm4243_vm13, %v3640_v22, %v673_v40 }
 0x187   : > { %v2251_v24 = vand.u32 8388607, %v5857_v36  ;;  %5858 = vst [vmem:[#allocation30_spill] sm:$0xff] %v4283_v13  ;;  %v1597_v59 = vsel %vm5760_vm4, %v1596_v39, %v4217_v15  ;;  %vm1723_vm7 = vc.u32 %v4276_v14, %v4268_v46  ;;  %v2258_v62 = vand.u32 31, %v2256_v27 }
 0x188   : > { %5859 = vst [vmem:[#allocation31_spill] sm:$0xff] %v4290_v1  ;;  %v2201_v57 = vshll.u32 %v4124_v23, %v2199_v55  ;;  %v2202_v29 = vshrl.u32 %v2184_v17, %v2200_v0  ;;  %v2205_v25 = vadd.s32 127, %v2204_v38  ;;  %v1725_v32 = vsel %vm1723_vm7, %v1724_v44, %v1720_v9 }
 0x189   : > { %v3052_v2 = vadd.s32 4294967294, %v810_v10  ;;  %v1726_v48 = vadd.s32 %v1725_v32, %v1721_v54  ;;  %v2252_v16 = vor.u32 8388608, %v2251_v24  ;;  %v4298_v49 = vsub.s32 32, %v2258_v62 }
 0x18a   : > { %v4300_v19 = vshrl.u32 %v2256_v27, 5  ;;  %v5860_v26 = vmov 683565275   ;;  %v2264_v15 = vshll.u32 %v5836_v6, %v2258_v62  ;;  %v2267_v42 = vshll.u32 %v5837_v50, %v2258_v62  ;;  %v4332_v27 = vpop.f32.mrf.mxu0 }
 0x18b   : > { %v2261_v18 = vshll.u32 %v5860_v26, %v2258_v62  ;;  %v1727_v40 = vadd.s32 536870912, %v1726_v48  ;;  %v2262_v23 = vshrl.u32 %v5836_v6, %v4298_v49  ;;  %v2265_v55 = vshrl.u32 %v5837_v50, %v4298_v49  ;;  %5863 = vst [vmem:[#allocation34_spill] sm:$0xff] %v4332_v27 }
 0x18c   : > { %v2270_v63 = vshll.u32 %v5838_v34, %v2258_v62  ;;  %v2268_v37 = vshrl.u32 %v5838_v34, %v4298_v49  ;;  %v2271_v39 = vshrl.u32 %v5839_v56, %v4298_v49  ;;  %v2273_v51 = vshll.u32 %v5839_v56, %v2258_v62 }
 0x18d   : > { %v2274_v60 = vshrl.u32 %v5840_v7, %v4298_v49  ;;  %v4320_v45 = vsel %vm4272_vm2, %v3751_v11, %v1597_v59  ;;  %v4322_v0 = vshrl.u32 %v1727_v40, 30  ;;  %v4324_v38 = vor.u32 %v2262_v23, %v2261_v18 }
 0x18e   : > { %5861 = vst [vmem:[#allocation32_spill] sm:$0xff] %v4320_v45  ;;  %v4326_v10 = vor.u32 %v2265_v55, %v2264_v15  ;;  %v4328_v9 = vor.u32 %v2202_v29, %v2201_v57  ;;  %v2269_v54 = vor.u32 %v2268_v37, %v2267_v42  ;;  %v2272_v36 = vor.u32 %v2271_v39, %v2270_v63 }
 0x18f   : > { %5862 = vst [vmem:[#allocation33_spill] sm:$0xff] %v4322_v0  ;;  %v2275_v24 = vor.u32 %v2274_v60, %v2273_v51  ;;  %v2206_v17 = vshll.u32 %v2205_v25, 23  ;;  %vm3053_vm9 = vcmp.lt.s32.totalorder %v3052_v2, 0  ;;  %v1729_v44 = vshll.u32 %v4322_v0, 30 }
 0x190   : > { %vm2276_vm12 = vcmp.lt.s32.totalorder %v4300_v19, 1  ;;  %vm2278_vm1 = vcmp.lt.s32.totalorder %v4300_v19, 3  ;;  %vm2279_vm8 = vcmp.lt.s32.totalorder %v4300_v19, 4  ;;  %v4340_v62 = vshll.u32 %v2252_v16, 8 }
 0x191   : > { %v2284_v59 = vsel %vm2276_vm12, %v4324_v38, %v4326_v10  ;;  %v4342_v57 = vsub.s32 %v1726_v48, %v1729_v44  ;;  %v2285_v29 = vsel %vm2279_vm8, %v2272_v36, 920167782  ;;  %v2288_v25 = vsel %vm2276_vm12, %v4326_v10, %v2269_v54 }
 0x192   : > { %v2289_v32 = vsel %vm2279_vm8, %v2275_v24, 1326507024  ;;  %vm2277_vm3 = vcmp.lt.s32.totalorder %v4300_v19, 2  ;;  %v2286_v18 = vsel %vm2278_vm1, %v2269_v54, %v2285_v29  ;;  %v861_v48 = vand.u32 2139095040, %v4332_v27 }
 0x193   : > { %v2290_v16 = vsel %vm2278_vm1, %v2272_v36, %v2289_v32  ;;  %v4357_v15 = vor.u32 4788187, %v2206_v17  ;;  %v4361_v42 = vadd.s32 %v4126_v20, %v4133_v12  ;;  %v4364_v40 = vsel %vm3053_vm9, 0, %v3052_v2 }
 0x194   : > { %v2287_v23 = vsel %vm2277_vm3, %v2284_v59, %v2286_v18  ;;  %v2291_v55 = vsel %vm2277_vm3, %v2288_v25, %v2290_v16  ;;  %v2293_v63 = vand.u32 65535, %v4340_v62  ;;  %v1732_v51 = vsub.s32 0, %v4342_v57 }
 0x195   : > { %v2317_v37 = vand.u32 65535, %v2287_v23  ;;  %v2318_v39 = vshrl.u32 %v2287_v23, 16  ;;  %v2294_v60 = vshrl.u32 %v4340_v62, 16  ;;  %v2295_v36 = vand.u32 65535, %v2291_v55 }
 0x196   : > { %v2296_v20 = vshrl.u32 %v2291_v55, 16  ;;  %vm1731_vm7 = vcmp.lt.s32.totalorder %v4342_v57, 0  ;;  %v862_v24 = vshrl.u32 %v861_v48, 23  ;;  %v818_v44 = vsub.s32 4294967266, %v4364_v40 }
 0x197   : > { %v2320_v2 = vmul.u32 %v2318_v39, %v2293_v63  ;;  %v2299_v29 = vmul.u32 %v2295_v36, %v2294_v60  ;;  %v2319_v25 = vmul.u32 %v2317_v37, %v2293_v63  ;;  %v2321_v32 = vmul.u32 %v2317_v37, %v2294_v60 }
 0x198   : > { %v2298_v59 = vmul.u32 %v2296_v20, %v2293_v63  ;;  %v1733_v23 = vsel %vm1731_vm7, %v1732_v51, %v4342_v57  ;;  %v2260_v55 = vshrl.u32 %v5860_v26, %v4298_v49  ;;  %v2297_v12 = vmul.u32 %v2295_v36, %v2293_v63 }
 0x199   : > { %v2323_v18 = vshll.u32 %v2320_v2, 16  ;;  %v2300_v22 = vmul.u32 %v2296_v20, %v2294_v60  ;;  %v2322_v48 = vmul.u32 %v2318_v39, %v2294_v60  ;;  %v3054_v17 = vadd.s32 4294967169, %v862_v24 }
 0x19a   : > { %v2301_v31 = vshll.u32 %v2298_v59, 16  ;;  %v2303_v1 = vshll.u32 %v2299_v29, 16  ;;  %v1734_v37 = vclz %v1733_v23  ;;  %v2281_v16 = vsel %vm2279_vm8, %v2269_v54, 2102212464 }
 0x19b   : > { %vm2327_vm9 = vc.u32 %v2319_v25, %v2323_v18  ;;  %v2325_v47 = vshll.u32 %v2321_v32, 16  ;;  %v2329_v49 = vadd.s32 %v2323_v18, %v2319_v25  ;;  %v2280_v39 = vsel %vm2276_vm12, %v2260_v55, %v4324_v38 }
 0x19c   : > { %vm2305_vm10 = vc.u32 %v2297_v12, %v2301_v31  ;;  %v2307_v21 = vadd.s32 %v2301_v31, %v2297_v12  ;;  %v2328_v41 = vsel %vm2327_vm9, 1, %v5847_v58  ;;  %v5864_v31 = vand.u32 2147483647, %v4332_v27 }
 0x19d   : > { %v2306_v51 = vsel %vm2305_vm10, 1, %v5847_v58  ;;  %v2330_v63 = vadd.s32 %v2328_v41, %v2322_v48  ;;  %v868_v20 = vadd.s32 1, %v3054_v17  ;;  %v2282_v54 = vsel %vm2278_vm1, %v4326_v10, %v2281_v16 }
 0x19e   : > { %v2308_v61 = vadd.s32 %v2306_v51, %v2300_v22  ;;  %vm2309_vm7 = vc.u32 %v2307_v21, %v2303_v1  ;;  %v865_v36 = vand.u32 8388607, %v5864_v31  ;;  %v2302_v12 = vshrl.u32 %v2298_v59, 16 }
 0x19f   : > { %v2310_v60 = vsel %vm2309_vm7, 1, %v5847_v58  ;;  %vm2331_vm10 = vc.u32 %v2329_v49, %v2325_v47  ;;  %v3070_v21 = vadd.s32 4294967294, %v1734_v37  ;;  %v2324_v22 = vshrl.u32 %v2320_v2, 16 }
 0x1a0   : > { %v2312_v24 = vadd.s32 %v2310_v60, %v2308_v61  ;;  %v2332_v41 = vsel %vm2331_vm10, 1, %v5847_v58  ;;  %vm869_vm8 = vcmp.gt.s32.totalorder %v868_v20, 0  ;;  %v2304_v1 = vshrl.u32 %v2299_v29, 16 }
 0x1a1   : > { %v2334_v25 = vadd.s32 %v2332_v41, %v2330_v63  ;;  %v870_v18 = vsel %vm869_vm8, %v868_v20, 0  ;;  %v814_v23 = vsub.s32 32, %v4364_v40  ;;  %v4396_v55 = vadd.s32 127, %v818_v44 }
 0x1a2   : > { %v2313_v38 = vadd.s32 %v2312_v24, %v2302_v12  ;;  %v2283_v17 = vsel %vm2277_vm3, %v2280_v39, %v2282_v54  ;;  %v872_v10 = vand.u32 31, %v870_v18  ;;  %v2326_v61 = vshrl.u32 %v2321_v32, 16 }
 0x1a3   : > { %v2335_v16 = vadd.s32 %v2334_v25, %v2324_v22  ;;  %v866_v2 = vor.u32 8388608, %v865_v36  ;;  %v4402_v48 = vadd.s32 %v2329_v49, %v2325_v47  ;;  %vm3071_vm12 = vcmp.lt.s32.totalorder %v3070_v21, 0 }
 0x1a4   : > { %v4400_v59 = vadd.s32 %v2313_v38, %v2304_v1  ;;  %v4404_v37 = vsub.s32 32, %v872_v10  ;;  %v875_v29 = vshll.u32 %v5860_v26, %v872_v10  ;;  %v878_v51 = vshll.u32 %v5836_v6, %v872_v10 }
 0x1a5   : > { %v2336_v44 = vadd.s32 %v2335_v16, %v2326_v61  ;;  %v2337_v63 = vmul.u32 %v4340_v62, %v2283_v17  ;;  %v881_v19 = vshll.u32 %v5837_v50, %v872_v10  ;;  %v4412_v32 = vshrl.u32 %v870_v18, 5 }
 0x1a6   : > { %vm2339_vm1 = vc.u32 %v4400_v59, %v4402_v48  ;;  %v876_v47 = vshrl.u32 %v5836_v6, %v4404_v37  ;;  %v879_v49 = vshrl.u32 %v5837_v50, %v4404_v37  ;;  %v882_v60 = vshrl.u32 %v5838_v34, %v4404_v37 }
 0x1a7   : > { %v2340_v39 = vadd.s32 1, %v2336_v44  ;;  %v884_v31 = vshll.u32 %v5838_v34, %v872_v10  ;;  %v885_v62 = vshrl.u32 %v5839_v56, %v4404_v37  ;;  %v887_v54 = vshll.u32 %v5839_v56, %v872_v10 }
 0x1a8   : > { %v4423_v36 = vor.u32 %v876_v47, %v875_v29  ;;  %v4425_v20 = vor.u32 %v879_v49, %v878_v51  ;;  %v4428_v12 = vshll.u32 %v866_v2, 8  ;;  %v883_v22 = vor.u32 %v882_v60, %v881_v19 }
 0x1a9   : > { %v2341_v24 = vsel %vm2339_vm1, %v2340_v39, %v2336_v44  ;;  %v886_v41 = vor.u32 %v885_v62, %v884_v31  ;;  %v888_v1 = vshrl.u32 %v5840_v7, %v4404_v37  ;;  %v4434_v38 = vmul.f32 %v4320_v45, %v4320_v45 }
 0x1aa   : > { %v5866_v25 = vand.u32 2147483647, %v4357_v15  ;;  %v5867_v18 = vcvt.s32.f32 %v4328_v9  ;;  %v2342_v61 = vadd.s32 %v2341_v24, %v2337_v63  ;;  %vm890_vm3 = vcmp.lt.s32.totalorder %v4412_v32, 1 }
 0x1ab   : > { %5865 = vst [vmem:[#allocation35_spill] sm:$0xff] %v4434_v38  ;;  %v816_v10 = vshrl.u32 %v4361_v42, %v814_v23  ;;  %v889_v16 = vor.u32 %v888_v1, %v887_v54  ;;  %vm892_vm9 = vcmp.lt.s32.totalorder %v4412_v32, 3  ;;  %vm893_vm7 = vcmp.lt.s32.totalorder %v4412_v32, 4 }
 0x1ac   : > { %v4440_v17 = vmul.f32 %v5867_v18, %v5866_v25  ;;  %v820_v2 = vshll.u32 %v4396_v55, 23  ;;  %v4448_v29 = vsel %vm3071_vm12, 0, %v3070_v21  ;;  %v2343_v15 = vadd.s32 536870912, %v2342_v61  ;;  %v4481_v25 = vpop.f32.mrf.mxu1 }
 0x1ad   : > { %vm891_vm10 = vcmp.lt.s32.totalorder %v4412_v32, 2  ;;  %v898_v9 = vsel %vm890_vm3, %v4423_v36, %v4425_v20  ;;  %v899_v42 = vsel %vm893_vm7, %v886_v41, 920167782  ;;  %v902_v23 = vsel %vm890_vm3, %v4425_v20, %v883_v22 }
 0x1ae   : > { %v907_v55 = vand.u32 65535, %v4428_v12  ;;  %v4461_v51 = vshrl.u32 %v2343_v15, 30  ;;  %v900_v21 = vsel %vm892_vm9, %v883_v22, %v899_v42  ;;  %v903_v44 = vsel %vm893_vm7, %v889_v16, 1326507024 }
 0x1af   : > { %v908_v63 = vshrl.u32 %v4428_v12, 16  ;;  %v815_v19 = vshll.u32 %v4228_v8, %v4364_v40  ;;  %v1742_v47 = vsub.s32 4294967266, %v4448_v29  ;;  %v901_v49 = vsel %vm891_vm10, %v898_v9, %v900_v21 }
 0x1b0   : > { %v904_v39 = vsel %vm892_vm9, %v886_v41, %v903_v44  ;;  %v2345_v60 = vshll.u32 %v4461_v51, 30  ;;  %v931_v62 = vand.u32 65535, %v901_v49  ;;  %v932_v54 = vshrl.u32 %v901_v49, 16 }
 0x1b1   : > { %v905_v31 = vsel %vm891_vm10, %v902_v23, %v904_v39  ;;  %v2212_v24 = vxor.u32 2147483648, %v4440_v17  ;;  %v4479_v1 = vor.u32 %v816_v10, %v815_v19  ;;  %v4483_v18 = vor.u32 4788187, %v820_v2 }
 0x1b2   : > { %v909_v8 = vand.u32 65535, %v905_v31  ;;  %v910_v40 = vshrl.u32 %v905_v31, 16  ;;  %v4485_v16 = vsub.s32 %v2342_v61, %v2345_v60  ;;  %v934_v41 = vmul.u32 %v932_v54, %v907_v55 }
 0x1b3   : > { %v935_v15 = vmul.u32 %v931_v62, %v908_v63  ;;  %v933_v23 = vmul.u32 %v931_v62, %v907_v55  ;;  %v1738_v44 = vsub.s32 32, %v4448_v29  ;;  %v4488_v49 = vadd.s32 127, %v1742_v47 }
 0x1b4   : > { %v911_v9 = vmul.u32 %v909_v8, %v907_v55  ;;  %v912_v42 = vmul.u32 %v910_v40, %v907_v55  ;;  %v913_v21 = vmul.u32 %v909_v8, %v908_v63  ;;  %v937_v10 = vshll.u32 %v934_v41, 16 }
 0x1b5   : > { %v1785_v19 = vand.u32 2139095040, %v4481_v25  ;;  %vm5781_vm8 = vcmp.lt.s32.totalorder %v3880_v52, 0  ;;  %v914_v39 = vmul.u32 %v910_v40, %v908_v63  ;;  %v936_v61 = vmul.u32 %v932_v54, %v908_v63 }
 0x1b6   : > { %v915_v2 = vshll.u32 %v912_v42, 16  ;;  %v917_v31 = vshll.u32 %v913_v21, 16  ;;  %vm2347_vm12 = vcmp.lt.s32.totalorder %v4485_v16, 0  ;;  %v874_v60 = vshrl.u32 %v5860_v26, %v4404_v37 }
 0x1b7   : > { %v895_v55 = vsel %vm893_vm7, %v883_v22, 2102212464  ;;  %v939_v62 = vshll.u32 %v935_v15, 16  ;;  %v2348_v47 = vsub.s32 0, %v4485_v16  ;;  %vm941_vm6 = vc.u32 %v933_v23, %v937_v10 }
 0x1b8   : > { %vm919_vm1 = vc.u32 %v911_v9, %v915_v2  ;;  %v921_v8 = vadd.s32 %v915_v2, %v911_v9  ;;  %v942_v40 = vsel %vm941_vm6, 1, %v5847_v58  ;;  %v943_v11 = vadd.s32 %v937_v10, %v933_v23 }
 0x1b9   : > { %v920_v45 = vsel %vm919_vm1, 1, %v5847_v58  ;;  %v1786_v63 = vshrl.u32 %v1785_v19, 23  ;;  %v916_v54 = vshrl.u32 %v912_v42, 16  ;;  %v944_v3 = vadd.s32 %v942_v40, %v936_v61 }
 0x1ba   : > { %v922_v38 = vadd.s32 %v920_v45, %v914_v39  ;;  %vm923_vm14 = vc.u32 %v921_v8, %v917_v31  ;;  %v938_v5 = vshrl.u32 %v934_v41, 16  ;;  %vm945_vm7 = vc.u32 %v943_v11, %v939_v62 }
 0x1bb   : > { %v924_v37 = vsel %vm923_vm14, 1, %v5847_v58  ;;  %v3072_v22 = vadd.s32 4294967169, %v1786_v63  ;;  %v918_v0 = vshrl.u32 %v913_v21, 16  ;;  %v946_v9 = vsel %vm945_vm7, 1, %v5847_v58 }
 0x1bc   : > { %v926_v4 = vadd.s32 %v924_v37, %v922_v38  ;;  %v5764_v2 = vand.u32 2147483647, %v4481_v25  ;;  %v2349_v23 = vsel %vm2347_vm12, %v2348_v47, %v4485_v16  ;;  %v940_v10 = vshrl.u32 %v935_v15, 16 }
 0x1bd   : > { %v948_v42 = vadd.s32 %v946_v9, %v944_v3  ;;  %v1792_v45 = vadd.s32 1, %v3072_v22  ;;  %v894_v19 = vsel %vm890_vm3, %v874_v60, %v4423_v36  ;;  %v896_v41 = vsel %vm892_vm9, %v4425_v20, %v895_v55 }
 0x1be   : > { %v927_v38 = vadd.s32 %v926_v4, %v916_v54  ;;  %v4512_v21 = vadd.s32 %v943_v11, %v939_v62  ;;  %v4517_v39 = vsel %vm5781_vm8, %v2212_v24, %v4440_v17  ;;  %v824_v15 = vcvt.s32.f32 %v4479_v1 }
 0x1bf   : > { %v949_v3 = vadd.s32 %v948_v42, %v938_v5  ;;  %vm1793_vm14 = vcmp.gt.s32.totalorder %v1792_v45, 0  ;;  %v1722_v31 = vadd.s32 %v4268_v46, %v4276_v14  ;;  %v2350_v36 = vclz %v2349_v23 }
 0x1c0   : > { %v4522_v61 = vadd.s32 %v927_v38, %v918_v0  ;;  %v1794_v60 = vsel %vm1793_vm14, %v1792_v45, 0  ;;  %v822_v4 = vand.u32 2147483647, %v4483_v18  ;;  %v897_v11 = vsel %vm891_vm10, %v894_v19, %v896_v41 }
 0x1c1   : > { %v950_v20 = vadd.s32 %v949_v3, %v940_v10  ;;  %v1796_v55 = vand.u32 31, %v1794_v60  ;;  %v1740_v17 = vshrl.u32 %v1722_v31, %v1738_v44  ;;  %v1744_v24 = vshll.u32 %v4488_v49, 23 }
 0x1c2   : > { %vm953_vm6 = vc.u32 %v4522_v61, %v4512_v21  ;;  %v1789_v5 = vand.u32 8388607, %v5764_v2  ;;  %v3082_v32 = vadd.s32 4294967294, %v2350_v36  ;;  %v951_v18 = vmul.u32 %v4428_v12, %v897_v11 }
 0x1c3   : > { %v954_v46 = vadd.s32 1, %v950_v20  ;;  %v4532_v14 = vsub.s32 32, %v1796_v55  ;;  %v1799_v0 = vshll.u32 %v5860_v26, %v1796_v55  ;;  %v1802_v1 = vshll.u32 %v5836_v6, %v1796_v55 }
 0x1c4   : > { %v1805_v44 = vshll.u32 %v5837_v50, %v1796_v55  ;;  %v1808_v49 = vshll.u32 %v5838_v34, %v1796_v55  ;;  %v4539_v47 = vshrl.u32 %v1794_v60, 5  ;;  %v1790_v54 = vor.u32 8388608, %v1789_v5 }
 0x1c5   : > { %v955_v62 = vsel %vm953_vm6, %v954_v46, %v950_v20  ;;  %v1800_v8 = vshrl.u32 %v5836_v6, %v4532_v14  ;;  %v1803_v40 = vshrl.u32 %v5837_v50, %v4532_v14  ;;  %v1806_v37 = vshrl.u32 %v5838_v34, %v4532_v14 }
 0x1c6   : > { %v956_v63 = vadd.s32 %v955_v62, %v951_v18  ;;  %v1809_v12 = vshrl.u32 %v5839_v56, %v4532_v14  ;;  %v1811_v23 = vshll.u32 %v5839_v56, %v1796_v55  ;;  %v1812_v10 = vshrl.u32 %v5840_v7, %v4532_v14 }
 0x1c7   : > { %v4549_v22 = vor.u32 %v1800_v8, %v1799_v0  ;;  %v4551_v9 = vor.u32 %v1803_v40, %v1802_v1  ;;  %vm3083_vm3 = vcmp.lt.s32.totalorder %v3082_v32, 0  ;;  %v1807_v45 = vor.u32 %v1806_v37, %v1805_v44 }
 0x1c8   : > { %v957_v42 = vadd.s32 536870912, %v956_v63  ;;  %v1810_v19 = vor.u32 %v1809_v12, %v1808_v49  ;;  %v4556_v41 = vor.u32 4788187, %v1744_v24  ;;  %v1813_v38 = vor.u32 %v1812_v10, %v1811_v23 }
 0x1c9   : > { %vm1814_vm9 = vcmp.lt.s32.totalorder %v4539_v47, 1  ;;  %vm1816_vm10 = vcmp.lt.s32.totalorder %v4539_v47, 3  ;;  %vm1815_vm12 = vcmp.lt.s32.totalorder %v4539_v47, 2  ;;  %vm1817_vm1 = vcmp.lt.s32.totalorder %v4539_v47, 4 }
 0x1ca   : > { %v4560_v3 = vshrl.u32 %v957_v42, 30  ;;  %v4564_v31 = vshll.u32 %v1790_v54, 8  ;;  %v1739_v36 = vshll.u32 %v4342_v57, %v4448_v29  ;;  %v4568_v60 = vsel %vm3083_vm3, 0, %v3082_v32 }
 0x1cb   : > { %v1822_v11 = vsel %vm1814_vm9, %v4549_v22, %v4551_v9  ;;  %v1823_v20 = vsel %vm1817_vm1, %v1810_v19, 920167782  ;;  %v4576_v55 = vmul.f32 %v824_v15, %v822_v4  ;;  %v1826_v57 = vsel %vm1814_vm9, %v4551_v9, %v1807_v45 }
 0x1cc   : > { %5868 = vst [vmem:[#allocation36_spill] sm:$0xff] %v4560_v3  ;;  %v959_v24 = vshll.u32 %v4560_v3, 30  ;;  %v1824_v5 = vsel %vm1816_vm10, %v1807_v45, %v1823_v20  ;;  %v4584_v29 = vor.u32 %v1740_v17, %v1739_v36  ;;  %v1746_v46 = vand.u32 2147483647, %v4556_v41 }
 0x1cd   : > { %v1825_v0 = vsel %vm1815_vm12, %v1822_v11, %v1824_v5  ;;  %v1827_v15 = vsel %vm1817_vm1, %v1813_v38, 1326507024  ;;  %v2358_v4 = vsub.s32 4294967266, %v4568_v60  ;;  %v1831_v18 = vand.u32 65535, %v4564_v31 }
 0x1ce   : > { %v4592_v1 = vsub.s32 %v956_v63, %v959_v24  ;;  %v1828_v32 = vsel %vm1816_vm10, %v1810_v19, %v1827_v15  ;;  %v1832_v44 = vshrl.u32 %v4564_v31, 16  ;;  %v1855_v49 = vand.u32 65535, %v1825_v0 }
 0x1cf   : > { %v1829_v17 = vsel %vm1815_vm12, %v1826_v57, %v1828_v32  ;;  %v1856_v62 = vshrl.u32 %v1825_v0, 16  ;;  %v2338_v63 = vadd.s32 %v4402_v48, %v4400_v59  ;;  %v2359_v36 = vadd.s32 127, %v2358_v4 }
 0x1d0   : > { %vm961_vm7 = vcmp.lt.s32.totalorder %v4592_v1, 0  ;;  %v962_v8 = vsub.s32 0, %v4592_v1  ;;  %v1833_v40 = vand.u32 65535, %v1829_v17  ;;  %v1834_v54 = vshrl.u32 %v1829_v17, 16 }
 0x1d1   : > { %v1857_v37 = vmul.u32 %v1855_v49, %v1831_v18  ;;  %v1858_v12 = vmul.u32 %v1856_v62, %v1831_v18  ;;  %v1859_v23 = vmul.u32 %v1855_v49, %v1832_v44  ;;  %v1860_v20 = vmul.u32 %v1856_v62, %v1832_v44 }
 0x1d2   : > { %v963_v10 = vsel %vm961_vm7, %v962_v8, %v4592_v1  ;;  %v1835_v42 = vmul.u32 %v1833_v40, %v1831_v18  ;;  %v1836_v19 = vmul.u32 %v1834_v54, %v1831_v18  ;;  %v1837_v38 = vmul.u32 %v1833_v40, %v1832_v44 }
 0x1d3   : > { %v964_v11 = vclz %v963_v10  ;;  %v1861_v24 = vshll.u32 %v1858_v12, 16  ;;  %v2354_v5 = vsub.s32 32, %v4568_v60  ;;  %v1838_v57 = vmul.u32 %v1834_v54, %v1832_v44 }
 0x1d4   : > { %v1839_v0 = vshll.u32 %v1836_v19, 16  ;;  %v1841_v15 = vshll.u32 %v1837_v38, 16  ;;  %v1798_v59 = vshrl.u32 %v5860_v26, %v4532_v14  ;;  %v1863_v48 = vshll.u32 %v1859_v23, 16 }
 0x1d5   : > { %v3055_v32 = vadd.s32 4294967294, %v964_v11  ;;  %vm1865_vm14 = vc.u32 %v1857_v37, %v1861_v24  ;;  %v1867_v49 = vadd.s32 %v1861_v24, %v1857_v37  ;;  %v2360_v4 = vshll.u32 %v2359_v36, 23 }
 0x1d6   : > { %vm1843_vm6 = vc.u32 %v1835_v42, %v1839_v0  ;;  %v1845_v17 = vadd.s32 %v1839_v0, %v1835_v42  ;;  %v1866_v18 = vsel %vm1865_vm14, 1, %v5847_v58  ;;  %v1819_v62 = vsel %vm1817_vm1, %v1807_v45, 2102212464  ;;  %v4618_v42 = vpop.f32.mrf.mxu3 }
 0x1d7   : > { %v1844_v8 = vsel %vm1843_vm6, 1, %v5847_v58  ;;  %v1868_v44 = vadd.s32 %v1866_v18, %v1860_v20  ;;  %v5869_v40 = vand.u32 2147483647, %v3880_v52  ;;  %v1840_v14 = vshrl.u32 %v1836_v19, 16 }
 0x1d8   : > { %v1846_v10 = vadd.s32 %v1844_v8, %v1838_v57  ;;  %vm1847_vm7 = vc.u32 %v1845_v17, %v1841_v15  ;;  %vm1869_vm4 = vc.u32 %v1867_v49, %v1863_v48  ;;  %vm5762_vm14 = vcmp.lt.s32.totalorder %v3920_v30, 0 }
 0x1d9   : > { %vm4614_vm3 = vcmp.le.f32.partialorder %v5869_v40, 0.7853982  ;;  %vm3056_vm15 = vcmp.lt.s32.totalorder %v3055_v32, 0  ;;  %v1818_v45 = vsel %vm1814_vm9, %v1798_v59, %v4549_v22  ;;  %v1848_v37 = vsel %vm1847_vm7, 1, %v5847_v58 }
 0x1da   : > { %v1862_v36 = vshrl.u32 %v1858_v12, 16  ;;  %v1820_v11 = vsel %vm1816_vm10, %v4551_v9, %v1819_v62  ;;  %v1842_v19 = vshrl.u32 %v1837_v38, 16  ;;  %v1850_v20 = vadd.s32 %v1848_v37, %v1846_v10 }
 0x1db   : > { %v1870_v24 = vsel %vm1869_vm4, 1, %v5847_v58  ;;  %v1748_v57 = vcvt.s32.f32 %v4584_v29  ;;  %v1864_v0 = vshrl.u32 %v1859_v23, 16  ;;  %v2401_v17 = vand.u32 2139095040, %v4618_v42 }
 0x1dc   : > { %v1872_v15 = vadd.s32 %v1870_v24, %v1868_v44  ;;  %v5872_v18 = vand.u32 2147483647, %v3920_v30  ;;  %v5873_v22 = vmov 0  ;;  %vm5774_vm1 = vcmp.lt.s32.totalorder %v4060_v53, 0  ;;  %v4646_v44 = vpop.f32.mrf.mxu0 }
 0x1dd   : > { %v2356_v12 = vshrl.u32 %v2338_v63, %v2354_v5  ;;  %v4638_v9 = vsel %vm3056_vm15, 0, %v3055_v32  ;;  %v1851_v38 = vadd.s32 %v1850_v20, %v1840_v14  ;;  %v4640_v59 = vadd.s32 %v1867_v49, %v1863_v48 }
 0x1de   : > { %vm4633_vm9 = vcmp.le.f32.partialorder %v5872_v18, 0.7853982  ;;  %v1749_v29 = vmul.f32 %v1748_v57, %v1746_v46  ;;  %v1821_v23 = vsel %vm1815_vm12, %v1818_v45, %v1820_v11  ;;  %v1873_v62 = vadd.s32 %v1872_v15, %v1862_v36 }
 0x1df   : > { %v5874_v22 = vsel %vm4633_vm9, 4294967295, %v5873_v22  ;;  %v2402_v8 = vshrl.u32 %v2401_v17, 23  ;;  %v826_v40 = vxor.u32 2147483648, %v4576_v55  ;;  %v2355_v63 = vshll.u32 %v4485_v16, %v4568_v60 }
 0x1e0   : > { %5875 = vst [vmem:[#allocation37_spill] sm:$0xff] %v5874_v22  ;;  %v2361_v5 = vor.u32 4788187, %v2360_v4  ;;  %v4651_v32 = vadd.s32 %v1851_v38, %v1842_v19  ;;  %v972_v48 = vsub.s32 4294967266, %v4638_v9  ;;  %v1874_v49 = vadd.s32 %v1873_v62, %v1864_v0 }
 0x1e1   : > { %v5765_v41 = vand.u32 2147483647, %v4618_v42  ;;  %v3084_v46 = vadd.s32 4294967169, %v2402_v8  ;;  %v2357_v47 = vor.u32 %v2356_v12, %v2355_v63  ;;  %v1875_v14 = vmul.u32 %v4564_v31, %v1821_v23 }
 0x1e2   : > { %vm1877_vm15 = vc.u32 %v4651_v32, %v4640_v59  ;;  %v1015_v10 = vand.u32 2139095040, %v4646_v44  ;;  %v4663_v16 = vsel %vm4614_vm3, %v3880_v52, %v4517_v39  ;;  %v1750_v60 = vxor.u32 2147483648, %v1749_v29 }
 0x1e3   : > { %5876 = vst [vmem:[#allocation38_spill] sm:$0xff] %v4663_v16  ;;  %v1878_v4 = vadd.s32 1, %v1874_v49  ;;  %v2408_v45 = vadd.s32 1, %v3084_v46  ;;  %v827_v37 = vsel %vm5762_vm14, %v826_v40, %v4576_v55  ;;  %v2362_v36 = vand.u32 2147483647, %v2361_v5 }
 0x1e4   : > { %v952_v31 = vadd.s32 %v4512_v21, %v4522_v61  ;;  %v968_v11 = vsub.s32 32, %v4638_v9  ;;  %v973_v19 = vadd.s32 127, %v972_v48  ;;  %v2405_v24 = vand.u32 8388607, %v5765_v41 }
 0x1e5   : > { %v1879_v20 = vsel %vm1877_vm15, %v1878_v4, %v1874_v49  ;;  %vm2409_vm4 = vcmp.gt.s32.totalorder %v2408_v45, 0  ;;  %v2364_v39 = vcvt.s32.f32 %v2357_v47  ;;  %v1016_v15 = vshrl.u32 %v1015_v10, 23 }
 0x1e6   : > { %v1880_v57 = vadd.s32 %v1879_v20, %v1875_v14  ;;  %v2410_v0 = vsel %vm2409_vm4, %v2408_v45, 0  ;;  %v4675_v17 = vmul.f32 %v4663_v16, %v4663_v16  ;;  %v4680_v21 = vsel %vm4633_vm9, %v3920_v30, %v827_v37 }
 0x1e7   : > { %5878 = vst [vmem:[#allocation40_spill] sm:$0xff] %v4680_v21  ;;  %v1751_v61 = vsel %vm5774_vm1, %v1750_v60, %v1749_v29  ;;  %v2412_v55 = vand.u32 31, %v2410_v0  ;;  %v4684_v18 = vmul.f32 %v2364_v39, %v2362_v36  ;;  %v969_v12 = vshll.u32 %v4592_v1, %v4638_v9 }
 0x1e8   : > { %5877 = vst [vmem:[#allocation39_spill] sm:$0xff] %v4675_v17  ;;  %v970_v38 = vshrl.u32 %v952_v31, %v968_v11  ;;  %v1881_v23 = vadd.s32 536870912, %v1880_v57  ;;  %v974_v62 = vshll.u32 %v973_v19, 23  ;;  %v2406_v8 = vor.u32 8388608, %v2405_v24 }
 0x1e9   : > { %v4688_v40 = vsub.s32 32, %v2412_v55  ;;  %v5763_v63 = vand.u32 2147483647, %v4646_v44  ;;  %v4693_v48 = vshrl.u32 %v2410_v0, 5  ;;  %v2415_v29 = vshll.u32 %v5860_v26, %v2412_v55 }
 0x1ea   : > { %v4691_v5 = vshrl.u32 %v1881_v23, 30  ;;  %v3057_v49 = vadd.s32 4294967169, %v1016_v15  ;;  %v2418_v1 = vshll.u32 %v5836_v6, %v2412_v55  ;;  %v2421_v47 = vshll.u32 %v5837_v50, %v2412_v55 }
 0x1eb   : > { %v2416_v46 = vshrl.u32 %v5836_v6, %v4688_v40  ;;  %v2419_v9 = vshrl.u32 %v5837_v50, %v4688_v40  ;;  %v5880_v14 = vand.u32 2147483647, %v4060_v53  ;;  %v5881_v10 = vmov 0 }
 0x1ec   : > { %5879 = vst [vmem:[#allocation41_spill] sm:$0xff] %v4691_v5  ;;  %v1883_v60 = vshll.u32 %v4691_v5, 30  ;;  %v2422_v4 = vshrl.u32 %v5838_v34, %v4688_v40  ;;  %v2424_v45 = vshll.u32 %v5838_v34, %v2412_v55  ;;  %v2425_v37 = vshrl.u32 %v5839_v56, %v4688_v40 }
 0x1ed   : > { %vm4704_vm10 = vcmp.le.f32.partialorder %v5880_v14, 0.7853982  ;;  %v4714_v36 = vor.u32 %v2416_v46, %v2415_v29  ;;  %v4716_v31 = vor.u32 %v2419_v9, %v2418_v1  ;;  %v2427_v11 = vshll.u32 %v5839_v56, %v2412_v55 }
 0x1ee   : > { %v5882_v10 = vsel %vm4704_vm10, 4294967295, %v5881_v10  ;;  %v2428_v19 = vshrl.u32 %v5840_v7, %v4688_v40  ;;  %v4721_v20 = vor.u32 %v970_v38, %v969_v12  ;;  %v4723_v24 = vsub.s32 %v1880_v57, %v1883_v60 }
 0x1ef   : > { %5883 = vst [vmem:[#allocation42_spill] sm:$0xff] %v5882_v10  ;;  %v2423_v39 = vor.u32 %v2422_v4, %v2421_v47  ;;  %v2426_v0 = vor.u32 %v2425_v37, %v2424_v45  ;;  %vm2430_vm12 = vcmp.lt.s32.totalorder %v4693_v48, 1  ;;  %v4726_v23 = vshll.u32 %v2406_v8, 8 }
 0x1f0   : > { %v2429_v15 = vor.u32 %v2428_v19, %v2427_v11  ;;  %v1022_v29 = vadd.s32 1, %v3057_v49  ;;  %v4728_v46 = vor.u32 4788187, %v974_v62  ;;  %vm2432_vm6 = vcmp.lt.s32.totalorder %v4693_v48, 3 }
 0x1f1   : > { %vm2433_vm7 = vcmp.lt.s32.totalorder %v4693_v48, 4  ;;  %v2438_v57 = vsel %vm2430_vm12, %v4714_v36, %v4716_v31  ;;  %v1886_v55 = vsub.s32 0, %v4723_v24  ;;  %v2442_v38 = vsel %vm2430_vm12, %v4716_v31, %v2423_v39 }
 0x1f2   : > { %v2439_v12 = vsel %vm2433_vm7, %v2426_v0, 920167782  ;;  %v2443_v62 = vsel %vm2433_vm7, %v2429_v15, 1326507024  ;;  %vm1885_vm15 = vcmp.lt.s32.totalorder %v4723_v24, 0  ;;  %vm2431_vm4 = vcmp.lt.s32.totalorder %v4693_v48, 2  ;;  %v4766_v15 = vpop.f32.mrf.mxu3 }
 0x1f3   : > { %v2440_v8 = vsel %vm2432_vm6, %v2423_v39, %v2439_v12  ;;  %v2444_v49 = vsel %vm2432_vm6, %v2426_v0, %v2443_v62  ;;  %v2447_v47 = vand.u32 65535, %v4726_v23  ;;  %vm1023_vm14 = vcmp.gt.s32.totalorder %v1022_v29, 0 }
 0x1f4   : > { %v2441_v1 = vsel %vm2431_vm4, %v2438_v57, %v2440_v8  ;;  %v2445_v9 = vsel %vm2431_vm4, %v2442_v38, %v2444_v49  ;;  %v2448_v14 = vshrl.u32 %v4726_v23, 16  ;;  %v4759_v37 = vsel %vm4704_vm10, %v4060_v53, %v1751_v61 }
 0x1f5   : > { %v2449_v60 = vand.u32 65535, %v2445_v9  ;;  %v2450_v4 = vshrl.u32 %v2445_v9, 16  ;;  %v2472_v45 = vshrl.u32 %v2441_v1, 16  ;;  %5884 = vst [vmem:[#allocation43_spill] sm:$0xff] %v4759_v37  ;;  %v1887_v11 = vsel %vm1885_vm15, %v1886_v55, %v4723_v24 }
 0x1f6   : > { %v2471_v19 = vand.u32 65535, %v2441_v1  ;;  %v4764_v0 = vand.u32 8388607, %v5763_v63  ;;  %v1024_v62 = vsel %vm1023_vm14, %v1022_v29, 0  ;;  %v4773_v61 = vadd.s32 %v4640_v59, %v4651_v32 }
 0x1f7   : > { %v2452_v12 = vmul.u32 %v2450_v4, %v2447_v47  ;;  %v2453_v38 = vmul.u32 %v2449_v60, %v2448_v14  ;;  %v2474_v55 = vmul.u32 %v2472_v45, %v2447_v47  ;;  %v1888_v1 = vclz %v1887_v11 }
 0x1f8   : > { %v2451_v9 = vmul.u32 %v2449_v60, %v2447_v47  ;;  %v2454_v41 = vmul.u32 %v2450_v4, %v2448_v14  ;;  %v2475_v22 = vmul.u32 %v2471_v19, %v2448_v14  ;;  %v1020_v57 = vor.u32 8388608, %v4764_v0 }
 0x1f9   : > { %v2455_v63 = vshll.u32 %v2452_v12, 16  ;;  %v1026_v30 = vand.u32 31, %v1024_v62  ;;  %v2457_v29 = vshll.u32 %v2453_v38, 16  ;;  %v2477_v3 = vshll.u32 %v2474_v55, 16 }
 0x1fa   : > { %v2414_v49 = vshrl.u32 %v5860_v26, %v4688_v40  ;;  %v2435_v59 = vsel %vm2433_vm7, %v2423_v39, 2102212464  ;;  %v2473_v60 = vmul.u32 %v2471_v19, %v2447_v47  ;;  %v3073_v11 = vadd.s32 4294967294, %v1888_v1 }
 0x1fb   : > { %vm2459_vm14 = vc.u32 %v2451_v9, %v2455_v63  ;;  %v2461_v8 = vadd.s32 %v2455_v63, %v2451_v9  ;;  %v2456_v2 = vshrl.u32 %v2452_v12, 16  ;;  %v2476_v10 = vmul.u32 %v2472_v45, %v2448_v14 }
 0x1fc   : > { %v2460_v32 = vsel %vm2459_vm14, 1, %v5847_v58  ;;  %v2479_v53 = vshll.u32 %v2475_v22, 16  ;;  %vm2481_vm1 = vc.u32 %v2473_v60, %v2477_v3  ;;  %v2483_v5 = vadd.s32 %v2477_v3, %v2473_v60 }
 0x1fd   : > { %v2462_v4 = vadd.s32 %v2460_v32, %v2454_v41  ;;  %vm2463_vm15 = vc.u32 %v2461_v8, %v2457_v29  ;;  %v2482_v9 = vsel %vm2481_vm1, 1, %v5847_v58  ;;  %v1027_v40 = vsub.s32 32, %v1026_v30 }
 0x1fe   : > { %v2464_v0 = vsel %vm2463_vm15, 1, %v5847_v58  ;;  %v2434_v39 = vsel %vm2430_vm12, %v2414_v49, %v4714_v36  ;;  %v2436_v47 = vsel %vm2432_vm6, %v4716_v31, %v2435_v59  ;;  %v2484_v41 = vadd.s32 %v2482_v9, %v2476_v10 }
 0x1ff   : > { %v2466_v63 = vadd.s32 %v2464_v0, %v2462_v4  ;;  %v4790_v19 = vshrl.u32 %v1024_v62, 5  ;;  %vm3074_vm7 = vcmp.lt.s32.totalorder %v3073_v11, 0  ;;  %v2458_v14 = vshrl.u32 %v2453_v38, 16 }
 0x200   : > { %vm2485_vm14 = vc.u32 %v2483_v5, %v2479_v53  ;;  %v1029_v3 = vshll.u32 %v5860_v26, %v1026_v30  ;;  %v1030_v8 = vshrl.u32 %v5836_v6, %v1027_v40  ;;  %v1032_v1 = vshll.u32 %v5836_v6, %v1026_v30 }
 0x201   : > { %v2467_v45 = vadd.s32 %v2466_v63, %v2456_v2  ;;  %v2486_v12 = vsel %vm2485_vm14, 1, %v5847_v58  ;;  %v2478_v36 = vshrl.u32 %v2474_v55, 16  ;;  %v1033_v29 = vshrl.u32 %v5837_v50, %v1027_v40 }
 0x202   : > { %v2488_v49 = vadd.s32 %v2486_v12, %v2484_v41  ;;  %v1035_v10 = vshll.u32 %v5837_v50, %v1026_v30  ;;  %v2437_v31 = vsel %vm2431_vm4, %v2434_v39, %v2436_v47  ;;  %v1036_v2 = vshrl.u32 %v5838_v34, %v1027_v40 }
 0x203   : > { %v4800_v38 = vadd.s32 %v2467_v45, %v2458_v14  ;;  %v1038_v62 = vshll.u32 %v5838_v34, %v1026_v30  ;;  %v4805_v59 = vsel %vm3074_vm7, 0, %v3073_v11  ;;  %v2480_v32 = vshrl.u32 %v2475_v22, 16 }
 0x204   : > { %v4807_v60 = vadd.s32 %v2483_v5, %v2479_v53  ;;  %v2489_v55 = vadd.s32 %v2488_v49, %v2478_v36  ;;  %v4809_v4 = vor.u32 %v1030_v8, %v1029_v3  ;;  %v4811_v0 = vor.u32 %v1033_v29, %v1032_v1 }
 0x205   : > { %v1039_v48 = vshrl.u32 %v5839_v56, %v1027_v40  ;;  %v1041_v63 = vshll.u32 %v5839_v56, %v1026_v30  ;;  %v1037_v39 = vor.u32 %v1036_v2, %v1035_v10  ;;  %v1042_v47 = vshrl.u32 %v5840_v7, %v1027_v40 }
 0x206   : > { %v2490_v9 = vadd.s32 %v2489_v55, %v2480_v32  ;;  %vm1044_vm1 = vcmp.lt.s32.totalorder %v4790_v19, 1  ;;  %vm2493_vm12 = vc.u32 %v4800_v38, %v4807_v60  ;;  %vm5783_vm6 = vcmp.lt.s32.totalorder %v4790_v19, 3 }
 0x207   : > { %v1040_v53 = vor.u32 %v1039_v48, %v1038_v62  ;;  %vm1047_vm4 = vcmp.lt.s32.totalorder %v4790_v19, 4  ;;  %v1043_v5 = vor.u32 %v1042_v47, %v1041_v63  ;;  %vm5782_vm15 = vcmp.lt.s32.totalorder %v4790_v19, 2 }
 0x208   : > { %v2494_v22 = vadd.s32 1, %v2490_v9  ;;  %v4822_v11 = vshll.u32 %v1020_v57, 8  ;;  %v1896_v30 = vsub.s32 4294967266, %v4805_v59  ;;  %v2491_v41 = vmul.u32 %v4726_v23, %v2437_v31 }
 0x209   : > { %v1052_v14 = vsel %vm1044_vm1, %v4809_v4, %v4811_v0  ;;  %v1053_v45 = vsel %vm1047_vm4, %v1040_v53, 920167782  ;;  %v1056_v57 = vsel %vm1044_vm1, %v4811_v0, %v1037_v39  ;;  %v2555_v8 = vand.u32 2139095040, %v4766_v15 }
 0x20a   : > { %v2495_v12 = vsel %vm2493_vm12, %v2494_v22, %v2490_v9  ;;  %v1054_v3 = vsel %vm5783_vm6, %v1037_v39, %v1053_v45  ;;  %v1892_v23 = vsub.s32 32, %v4805_v59  ;;  %v1057_v49 = vsel %vm1047_vm4, %v1043_v5, 1326507024 }
 0x20b   : > { %v2496_v1 = vadd.s32 %v2495_v12, %v2491_v41  ;;  %v1055_v36 = vsel %vm5782_vm15, %v1052_v14, %v1054_v3  ;;  %v1058_v29 = vsel %vm5783_vm6, %v1040_v53, %v1057_v49  ;;  %v1061_v10 = vand.u32 65535, %v4822_v11 }
 0x20c   : > { %v1062_v31 = vshrl.u32 %v4822_v11, 16  ;;  %v1085_v2 = vand.u32 65535, %v1055_v36  ;;  %v4847_v62 = vadd.s32 127, %v1896_v30  ;;  %v1059_v55 = vsel %vm5782_vm15, %v1056_v57, %v1058_v29 }
 0x20d   : > { %v2497_v32 = vadd.s32 536870912, %v2496_v1  ;;  %v1086_v48 = vshrl.u32 %v1055_v36, 16  ;;  %v1028_v63 = vshrl.u32 %v5860_v26, %v1027_v40  ;;  %v1063_v9 = vand.u32 65535, %v1059_v55 }
 0x20e   : > { %v1064_v47 = vshrl.u32 %v1059_v55, 16  ;;  %v1089_v22 = vmul.u32 %v1085_v2, %v1062_v31  ;;  %v1049_v53 = vsel %vm1047_vm4, %v1037_v39, 2102212464  ;;  %v1087_v41 = vmul.u32 %v1085_v2, %v1061_v10 }
 0x20f   : > { %v4852_v5 = vshrl.u32 %v2497_v32, 30  ;;  %v1088_v14 = vmul.u32 %v1086_v48, %v1061_v10  ;;  %vm5789_vm7 = vcmp.lt.s32.totalorder %v4214_v35, 0  ;;  %v1065_v30 = vmul.u32 %v1063_v9, %v1061_v10 }
 0x210   : > { %v1066_v45 = vmul.u32 %v1064_v47, %v1061_v10  ;;  %v1067_v12 = vmul.u32 %v1063_v9, %v1062_v31  ;;  %v2556_v3 = vshrl.u32 %v2555_v8, 23  ;;  %v1068_v36 = vmul.u32 %v1064_v47, %v1062_v31 }
 0x211   : > { %v2499_v57 = vshll.u32 %v4852_v5, 30  ;;  %v1090_v40 = vmul.u32 %v1086_v48, %v1062_v31  ;;  %v1091_v49 = vshll.u32 %v1088_v14, 16  ;;  %v1092_v32 = vshrl.u32 %v1088_v14, 16 }
 0x212   : > { %v1069_v29 = vshll.u32 %v1066_v45, 16  ;;  %v1071_v55 = vshll.u32 %v1067_v12, 16  ;;  %v1093_v16 = vshll.u32 %v1089_v22, 16  ;;  %v1070_v39 = vshrl.u32 %v1066_v45, 16 }
 0x213   : > { %v4858_v33 = vsub.s32 %v2496_v1, %v2499_v57  ;;  %vm1095_vm14 = vc.u32 %v1087_v41, %v1091_v49  ;;  %v1097_v2 = vadd.s32 %v1091_v49, %v1087_v41  ;;  %v3087_v9 = vadd.s32 4294967169, %v2556_v3 }
 0x214   : > { %vm1073_vm12 = vc.u32 %v1065_v30, %v1069_v29  ;;  %v1075_v13 = vadd.s32 %v1069_v29, %v1065_v30  ;;  %v1096_v10 = vsel %vm1095_vm14, 1, %v5847_v58  ;;  %v5885_v8 = vand.u32 2147483647, %v4214_v35 }
 0x215   : > { %vm2501_vm8 = vcmp.lt.s32.totalorder %v4858_v33, 0  ;;  %v2502_v31 = vsub.s32 0, %v4858_v33  ;;  %v1074_v1 = vsel %vm1073_vm12, 1, %v5847_v58  ;;  %v1098_v48 = vadd.s32 %v1096_v10, %v1090_v40 }
 0x216   : > { %vm4863_vm4 = vcmp.le.f32.partialorder %v5885_v8, 0.7853982  ;;  %v1072_v14 = vshrl.u32 %v1067_v12, 16  ;;  %v1076_v41 = vadd.s32 %v1074_v1, %v1068_v36  ;;  %vm1077_vm15 = vc.u32 %v1075_v13, %v1071_v55 }
 0x217   : > { %vm1099_vm6 = vc.u32 %v1097_v2, %v1093_v16  ;;  %v2503_v30 = vsel %vm2501_vm8, %v2502_v31, %v4858_v33  ;;  %v1078_v45 = vsel %vm1077_vm15, 1, %v5847_v58  ;;  %v1094_v3 = vshrl.u32 %v1089_v22, 16 }
 0x218   : > { %v1100_v57 = vsel %vm1099_vm6, 1, %v5847_v58  ;;  %v2504_v49 = vclz %v2503_v30  ;;  %v1080_v29 = vadd.s32 %v1078_v45, %v1076_v41  ;;  %v2562_v28 = vadd.s32 1, %v3087_v9 }
 0x219   : > { %v1102_v8 = vadd.s32 %v1100_v57, %v1098_v48  ;;  %v5888_v17 = vxor.u32 2147483648, %v4684_v18  ;;  %v5889_v13 = vand.u32 2147483647, %v4728_v46  ;;  %v5890_v36 = vcvt.s32.f32 %v4721_v20 }
 0x21a   : > { %v1894_v55 = vshrl.u32 %v4773_v61, %v1892_v23  ;;  %v1048_v22 = vsel %vm1044_vm1, %v1028_v63, %v4809_v4  ;;  %vm5891_vm8 = vcmp.lt.s32.totalorder %v4790_v19, 3  ;;  %v1081_v9 = vadd.s32 %v1080_v29, %v1070_v39 }
 0x21b   : > { %v2367_v12 = vsel %vm5789_vm7, %v5888_v17, %v4684_v18  ;;  %v979_v40 = vmul.f32 %v5890_v36, %v5889_v13  ;;  %v1050_v10 = vsel %vm5891_vm8, %v4811_v0, %v1049_v53  ;;  %v1103_v31 = vadd.s32 %v1102_v8, %v1092_v32 }
 0x21c   : > { %vm2563_vm6 = vcmp.gt.s32.totalorder %v2562_v28, 0  ;;  %v1893_v17 = vshll.u32 %v4723_v24, %v4805_v59  ;;  %v1898_v18 = vshll.u32 %v4847_v62, 23  ;;  %v4892_v20 = vadd.s32 %v1097_v2, %v1093_v16 }
 0x21d   : > { %v2564_v46 = vsel %vm2563_vm6, %v2562_v28, 0  ;;  %v3085_v61 = vadd.s32 4294967294, %v2504_v49  ;;  %v4894_v23 = vadd.s32 %v1081_v9, %v1072_v14  ;;  %v1104_v1 = vadd.s32 %v1103_v31, %v1094_v3 }
 0x21e   : > { %v5892_v4 = vand.u32 2147483647, %v4766_v15  ;;  %v4900_v0 = vmul.f32 %v4680_v21, %v4680_v21  ;;  %vm5787_vm1 = vcmp.lt.s32.totalorder %v4332_v27, 0  ;;  %vm5894_vm15 = vcmp.lt.s32.totalorder %v4790_v19, 2 }
 0x21f   : > { %v1051_v24 = vsel %vm5894_vm15, %v1048_v22, %v1050_v10  ;;  %v2566_v59 = vand.u32 31, %v2564_v46  ;;  %v4907_v28 = vmul.f32 %v4759_v37, %v4759_v37  ;;  %v4912_v16 = vsel %vm4863_vm4, %v4214_v35, %v2367_v12 }
 0x220   : > { %v2559_v63 = vand.u32 8388607, %v5892_v4  ;;  %5893 = vst [vmem:[#allocation44_spill] sm:$0xff] %v4900_v0  ;;  %v980_v62 = vxor.u32 2147483648, %v979_v40  ;;  %v1895_v53 = vor.u32 %v1894_v55, %v1893_v17  ;;  %v1899_v32 = vor.u32 4788187, %v1898_v18 }
 0x221   : > { %5895 = vst [vmem:[#allocation45_spill] sm:$0xff] %v4907_v28  ;;  %vm1107_vm14 = vc.u32 %v4894_v23, %v4892_v20  ;;  %v1108_v39 = vadd.s32 1, %v1104_v1  ;;  %v4916_v2 = vsub.s32 32, %v2566_v59  ;;  %vm3086_vm12 = vcmp.lt.s32.totalorder %v3085_v61, 0 }
 0x222   : > { %5896 = vst [vmem:[#allocation46_spill] sm:$0xff] %v4912_v16  ;;  %v1105_v19 = vmul.u32 %v4822_v11, %v1051_v24  ;;  %v2560_v48 = vor.u32 8388608, %v2559_v63  ;;  %v2569_v14 = vshll.u32 %v5860_v26, %v2566_v59  ;;  %v2572_v45 = vshll.u32 %v5836_v6, %v2566_v59 }
 0x223   : > { %v1109_v41 = vsel %vm1107_vm14, %v1108_v39, %v1104_v1  ;;  %v2570_v30 = vshrl.u32 %v5836_v6, %v4916_v2  ;;  %v2573_v3 = vshrl.u32 %v5837_v50, %v4916_v2  ;;  %v4925_v49 = vshrl.u32 %v2564_v46, 5 }
 0x224   : > { %v1110_v57 = vadd.s32 %v1109_v41, %v1105_v19  ;;  %v2575_v29 = vshll.u32 %v5837_v50, %v2566_v59  ;;  %v2576_v11 = vshrl.u32 %v5838_v34, %v4916_v2  ;;  %v2578_v13 = vshll.u32 %v5838_v34, %v2566_v59 }
 0x225   : > { %v4930_v8 = vor.u32 %v2570_v30, %v2569_v14  ;;  %v4932_v12 = vor.u32 %v2573_v3, %v2572_v45  ;;  %v2579_v36 = vshrl.u32 %v5839_v56, %v4916_v2  ;;  %v4939_v55 = vmul.f32 %v4912_v16, %v4912_v16 }
 0x226   : > { %v4943_v22 = vsel %vm5787_vm1, %v980_v62, %v979_v40  ;;  %v4946_v10 = vsel %vm3086_vm12, 0, %v3085_v61  ;;  %v1111_v9 = vadd.s32 536870912, %v1110_v57  ;;  %v2577_v31 = vor.u32 %v2576_v11, %v2575_v29 }
 0x227   : > { %v2580_v17 = vor.u32 %v2579_v36, %v2578_v13  ;;  %v2581_v18 = vshll.u32 %v5839_v56, %v2566_v59  ;;  %v2582_v46 = vshrl.u32 %v5840_v7, %v4916_v2  ;;  %v1900_v1 = vand.u32 2147483647, %v1899_v32  ;;  %v4961_v59 = vpop.f32.mrf.mxu0 }
 0x228   : > { %v1902_v4 = vcvt.s32.f32 %v1895_v53  ;;  %v4951_v63 = vshrl.u32 %v1111_v9, 30  ;;  %vm2584_vm8 = vcmp.lt.s32.totalorder %v4925_v49, 1  ;;  %vm2587_vm6 = vcmp.lt.s32.totalorder %v4925_v49, 4 }
 0x229   : > { %v2583_v24 = vor.u32 %v2582_v46, %v2581_v18  ;;  %v2592_v40 = vsel %vm2584_vm8, %v4930_v8, %v4932_v12  ;;  %v4959_v61 = vshll.u32 %v2560_v48, 8  ;;  %v2512_v62 = vsub.s32 4294967266, %v4946_v10 }
 0x22a   : > { %5897 = vst [vmem:[#allocation47_spill] sm:$0xff] %v4951_v63  ;;  %v1113_v53 = vshll.u32 %v4951_v63, 30  ;;  %vm2586_vm15 = vcmp.lt.s32.totalorder %v4925_v49, 3  ;;  %v2593_v32 = vsel %vm2587_vm6, %v2580_v17, 920167782  ;;  %vm5790_vm14 = vcmp.lt.s32.totalorder %v4925_v49, 2 }
 0x22b   : > { %v2594_v39 = vsel %vm2586_vm15, %v2577_v31, %v2593_v32  ;;  %v2596_v19 = vsel %vm2584_vm8, %v4932_v12, %v2577_v31  ;;  %v2597_v48 = vsel %vm2587_vm6, %v2583_v24, 1326507024  ;;  %v4976_v14 = vmul.f32 %v1902_v4, %v1900_v1 }
 0x22c   : > { %v4978_v41 = vsub.s32 %v1110_v57, %v1113_v53  ;;  %v2595_v30 = vsel %vm5790_vm14, %v2592_v40, %v2594_v39  ;;  %v1169_v45 = vand.u32 2139095040, %v4961_v59  ;;  %v2492_v3 = vadd.s32 %v4807_v60, %v4800_v38 }
 0x22d   : > { %v2508_v29 = vsub.s32 32, %v4946_v10  ;;  %v2598_v11 = vsel %vm2586_vm15, %v2580_v17, %v2597_v48  ;;  %v2626_v13 = vshrl.u32 %v2595_v30, 16  ;;  %v2601_v57 = vand.u32 65535, %v4959_v61 }
 0x22e   : > { %v2599_v36 = vsel %vm5790_vm14, %v2596_v19, %v2598_v11  ;;  %v2625_v9 = vand.u32 65535, %v2595_v30  ;;  %v2513_v46 = vadd.s32 127, %v2512_v62  ;;  %v2602_v1 = vshrl.u32 %v4959_v61, 16 }
 0x22f   : > { %v2603_v4 = vand.u32 65535, %v2599_v36  ;;  %v2604_v24 = vshrl.u32 %v2599_v36, 16  ;;  %v2509_v38 = vshll.u32 %v4858_v33, %v4946_v10  ;;  %v1116_v60 = vsub.s32 0, %v4978_v41 }
 0x230   : > { %v2628_v17 = vmul.u32 %v2626_v13, %v2601_v57  ;;  %v1170_v40 = vshrl.u32 %v1169_v45, 23  ;;  %v2510_v53 = vshrl.u32 %v2492_v3, %v2508_v29  ;;  %vm1115_vm12 = vcmp.lt.s32.totalorder %v4978_v41, 0 }
 0x231   : > { %v2606_v32 = vmul.u32 %v2604_v24, %v2601_v57  ;;  %v2607_v39 = vmul.u32 %v2603_v4, %v2602_v1  ;;  %v2568_v19 = vshrl.u32 %v5860_v26, %v4916_v2  ;;  %v2627_v62 = vmul.u32 %v2625_v9, %v2601_v57 }
 0x232   : > { %v2629_v48 = vmul.u32 %v2625_v9, %v2602_v1  ;;  %v2631_v30 = vshll.u32 %v2628_v17, 16  ;;  %v2514_v11 = vshll.u32 %v2513_v46, 23  ;;  %v2589_v36 = vsel %vm2587_vm6, %v2577_v31, 2102212464 }
 0x233   : > { %v2605_v33 = vmul.u32 %v2603_v4, %v2601_v57  ;;  %v2609_v10 = vshll.u32 %v2606_v32, 16  ;;  %v5898_v18 = vand.u32 2147483647, %v4332_v27  ;;  %v5899_v45 = vmov 0 }
 0x234   : > { %v1117_v3 = vsel %vm1115_vm12, %v1116_v60, %v4978_v41  ;;  %v2608_v29 = vmul.u32 %v2604_v24, %v2602_v1  ;;  %v2630_v21 = vmul.u32 %v2626_v13, %v2602_v1  ;;  %vm2635_vm7 = vc.u32 %v2627_v62, %v2631_v30 }
 0x235   : > { %vm5003_vm1 = vcmp.le.f32.partialorder %v5898_v18, 0.7853982  ;;  %v2611_v2 = vshll.u32 %v2607_v39, 16  ;;  %vm2613_vm14 = vc.u32 %v2605_v33, %v2609_v10  ;;  %v2615_v9 = vadd.s32 %v2609_v10, %v2605_v33 }
 0x236   : > { %v5900_v45 = vsel %vm5003_vm1, 4294967295, %v5899_v45  ;;  %v2636_v46 = vsel %vm2635_vm7, 1, %v5847_v58  ;;  %v2614_v31 = vsel %vm2613_vm14, 1, %v5847_v58  ;;  %v2633_v57 = vshll.u32 %v2629_v48, 16 }
 0x237   : > { %5901 = vst [vmem:[#allocation48_spill] sm:$0xff] %v5900_v45  ;;  %v2637_v4 = vadd.s32 %v2631_v30, %v2627_v62  ;;  %v2638_v0 = vadd.s32 %v2636_v46, %v2630_v21  ;;  %v2515_v63 = vor.u32 4788187, %v2514_v11  ;;  %v1118_v18 = vclz %v1117_v3 }
 0x238   : > { %v2588_v37 = vsel %vm2584_vm8, %v2568_v19, %v4930_v8  ;;  %v2616_v60 = vadd.s32 %v2614_v31, %v2608_v29  ;;  %v2590_v13 = vsel %vm2586_vm15, %v4932_v12, %v2589_v36  ;;  %vm2617_vm6 = vc.u32 %v2615_v9, %v2611_v2 }
 0x239   : > { %vm2639_vm12 = vc.u32 %v2637_v4, %v2633_v57  ;;  %v3060_v1 = vadd.s32 4294967169, %v1170_v40  ;;  %v2511_v24 = vor.u32 %v2510_v53, %v2509_v38  ;;  %v2618_v33 = vsel %vm2617_vm6, 1, %v5847_v58 }
 0x23a   : > { %v2632_v10 = vshrl.u32 %v2628_v17, 16  ;;  %v2640_v21 = vsel %vm2639_vm12, 1, %v5847_v58  ;;  %v2610_v62 = vshrl.u32 %v2606_v32, 16  ;;  %v2620_v30 = vadd.s32 %v2618_v33, %v2616_v60 }
 0x23b   : > { %v2642_v11 = vadd.s32 %v2640_v21, %v2638_v0  ;;  %v1176_v3 = vadd.s32 1, %v3060_v1  ;;  %v2516_v46 = vand.u32 2147483647, %v2515_v63  ;;  %v3058_v8 = vadd.s32 4294967294, %v1118_v18 }
 0x23c   : > { %vm5902_vm7 = vcmp.lt.s32.totalorder %v4925_v49, 2  ;;  %v2612_v29 = vshrl.u32 %v2607_v39, 16  ;;  %v2621_v12 = vadd.s32 %v2620_v30, %v2610_v62  ;;  %v2634_v36 = vshrl.u32 %v2629_v48, 16 }
 0x23d   : > { %v2591_v19 = vsel %vm5902_vm7, %v2588_v37, %v2590_v13  ;;  %v2643_v2 = vadd.s32 %v2642_v11, %v2632_v10  ;;  %vm1177_vm8 = vcmp.gt.s32.totalorder %v1176_v3, 0  ;;  %v5024_v38 = vsel %vm5003_vm1, %v4332_v27, %v4943_v22 }
 0x23e   : > { %v2518_v17 = vcvt.s32.f32 %v2511_v24  ;;  %v5903_v0 = vand.u32 2147483647, %v4961_v59  ;;  %v1178_v63 = vsel %vm1177_vm8, %v1176_v3, 0  ;;  %v2622_v53 = vadd.s32 %v2621_v12, %v2612_v29 }
 0x23f   : > { %v2641_v32 = vadd.s32 %v2637_v4, %v2633_v57  ;;  %v2644_v49 = vadd.s32 %v2643_v2, %v2634_v36  ;;  %v1180_v37 = vand.u32 31, %v1178_v63  ;;  %v5033_v9 = vadd.s32 %v4892_v20, %v4894_v23  ;;  %v5051_v36 = vpop.f32.mrf.mxu3 }
 0x240   : > { %v1173_v40 = vand.u32 8388607, %v5903_v0  ;;  %v5029_v48 = vmul.f32 %v2518_v17, %v2516_v46  ;;  %v2645_v22 = vmul.u32 %v4959_v61, %v2591_v19  ;;  %vm3059_vm15 = vcmp.lt.s32.totalorder %v3058_v8, 0 }
 0x241   : > { %vm2647_vm14 = vc.u32 %v2622_v53, %v2641_v32  ;;  %v2648_v31 = vadd.s32 1, %v2644_v49  ;;  %v1181_v18 = vsub.s32 32, %v1180_v37  ;;  %v1183_v13 = vshll.u32 %v5860_v26, %v1180_v37 }
 0x242   : > { %v1174_v60 = vor.u32 8388608, %v1173_v40  ;;  %v1186_v57 = vshll.u32 %v5836_v6, %v1180_v37  ;;  %v1189_v4 = vshll.u32 %v5837_v50, %v1180_v37  ;;  %v5039_v24 = vshrl.u32 %v1178_v63, 5 }
 0x243   : > { %v2649_v1 = vsel %vm2647_vm14, %v2648_v31, %v2644_v49  ;;  %v1184_v33 = vshrl.u32 %v5836_v6, %v1181_v18  ;;  %v1187_v20 = vshrl.u32 %v5837_v50, %v1181_v18  ;;  %v5043_v23 = vsel %vm3059_vm15, 0, %v3058_v8 }
 0x244   : > { %v2650_v61 = vadd.s32 %v2649_v1, %v2645_v22  ;;  %v1190_v10 = vshrl.u32 %v5838_v34, %v1181_v18  ;;  %v1192_v21 = vshll.u32 %v5838_v34, %v1180_v37  ;;  %v1193_v11 = vshrl.u32 %v5839_v56, %v1181_v18 }
 0x245   : > { %v1185_v62 = vor.u32 %v1184_v33, %v1183_v13  ;;  %v1188_v30 = vor.u32 %v1187_v20, %v1186_v57  ;;  %v1195_v3 = vshll.u32 %v5839_v56, %v1180_v37  ;;  %v1196_v12 = vshrl.u32 %v5840_v7, %v1181_v18 }
 0x246   : > { %v2651_v19 = vadd.s32 536870912, %v2650_v61  ;;  %v1191_v29 = vor.u32 %v1190_v10, %v1189_v4  ;;  %v1194_v2 = vor.u32 %v1193_v11, %v1192_v21  ;;  %vm1198_vm6 = vcmp.lt.s32.totalorder %v5039_v24, 1 }
 0x247   : > { %v5055_v17 = vshll.u32 %v1174_v60, 8  ;;  %v1197_v63 = vor.u32 %v1196_v12, %v1195_v3  ;;  %vm1200_vm12 = vcmp.lt.s32.totalorder %v5039_v24, 3  ;;  %vm5796_vm7 = vcmp.lt.s32.totalorder %v5039_v24, 2 }
 0x248   : > { %v5058_v40 = vshrl.u32 %v2651_v19, 30  ;;  %vm1201_vm8 = vcmp.lt.s32.totalorder %v5039_v24, 4  ;;  %v1206_v49 = vsel %vm1198_vm6, %v1185_v62, %v1188_v30  ;;  %v1210_v60 = vsel %vm1198_vm6, %v1188_v30, %v1191_v29 }
 0x249   : > { %v1207_v31 = vsel %vm1201_vm8, %v1194_v2, 920167782  ;;  %v2709_v13 = vand.u32 2139095040, %v5051_v36  ;;  %v1211_v4 = vsel %vm1201_vm8, %v1197_v63, 1326507024  ;;  %v1215_v1 = vand.u32 65535, %v5055_v17 }
 0x24a   : > { %v2653_v22 = vshll.u32 %v5058_v40, 30  ;;  %v1208_v57 = vsel %vm1200_vm12, %v1191_v29, %v1207_v31  ;;  %v1216_v33 = vshrl.u32 %v5055_v17, 16  ;;  %v2646_v20 = vadd.s32 %v2641_v32, %v2622_v53 }
 0x24b   : > { %v1209_v21 = vsel %vm5796_vm7, %v1206_v49, %v1208_v57  ;;  %v1212_v11 = vsel %vm1200_vm12, %v1194_v2, %v1211_v4  ;;  %v1182_v3 = vshrl.u32 %v5860_v26, %v1181_v18  ;;  %vm5811_vm1 = vcmp.lt.s32.totalorder %v4646_v44, 0 }
 0x24c   : > { %v5078_v10 = vsub.s32 %v2650_v61, %v2653_v22  ;;  %v1213_v19 = vsel %vm5796_vm7, %v1210_v60, %v1212_v11  ;;  %v1239_v12 = vand.u32 65535, %v1209_v21  ;;  %v1240_v63 = vshrl.u32 %v1209_v21, 16 }
 0x24d   : > { %v1217_v53 = vand.u32 65535, %v1213_v19  ;;  %v1218_v32 = vshrl.u32 %v1213_v19, 16  ;;  %v1203_v61 = vsel %vm1201_vm8, %v1191_v29, 2102212464  ;;  %v1202_v21 = vsel %vm1198_vm6, %v1182_v3, %v1185_v62 }
 0x24e   : > { %vm2655_vm15 = vcmp.lt.s32.totalorder %v5078_v10, 0  ;;  %v2656_v31 = vsub.s32 0, %v5078_v10  ;;  %v1241_v49 = vmul.u32 %v1239_v12, %v1215_v1  ;;  %v1242_v22 = vmul.u32 %v1240_v63, %v1215_v1 }
 0x24f   : > { %v1243_v57 = vmul.u32 %v1239_v12, %v1216_v33  ;;  %v1219_v18 = vmul.u32 %v1217_v53, %v1215_v1  ;;  %v1220_v4 = vmul.u32 %v1218_v32, %v1215_v1  ;;  %v1221_v39 = vmul.u32 %v1217_v53, %v1216_v33 }
 0x250   : > { %v2657_v2 = vsel %vm2655_vm15, %v2656_v31, %v5078_v10  ;;  %v1244_v11 = vmul.u32 %v1240_v63, %v1216_v33  ;;  %v1245_v8 = vshll.u32 %v1242_v22, 16  ;;  %v1204_v19 = vsel %vm1200_vm12, %v1188_v30, %v1203_v61 }
 0x251   : > { %v2658_v60 = vclz %v2657_v2  ;;  %v1222_v46 = vmul.u32 %v1218_v32, %v1216_v33  ;;  %v1223_v37 = vshll.u32 %v1220_v4, 16  ;;  %v1225_v29 = vshll.u32 %v1221_v39, 16 }
 0x252   : > { %v1224_v45 = vshrl.u32 %v1220_v4, 16  ;;  %v1247_v12 = vshll.u32 %v1243_v57, 16  ;;  %vm1249_vm14 = vc.u32 %v1241_v49, %v1245_v8  ;;  %vm5802_vm8 = vcmp.lt.s32.totalorder %v4618_v42, 0 }
 0x253   : > { %v3088_v0 = vadd.s32 4294967294, %v2658_v60  ;;  %vm1227_vm15 = vc.u32 %v1219_v18, %v1223_v37  ;;  %v1229_v1 = vadd.s32 %v1223_v37, %v1219_v18  ;;  %v1250_v31 = vsel %vm1249_vm14, 1, %v5847_v58 }
 0x254   : > { %v1251_v53 = vadd.s32 %v1245_v8, %v1241_v49  ;;  %v1228_v62 = vsel %vm1227_vm15, 1, %v5847_v58  ;;  %v1252_v3 = vadd.s32 %v1250_v31, %v1244_v11  ;;  %v2710_v63 = vshrl.u32 %v2709_v13, 23 }
 0x255   : > { %vm3089_vm6 = vcmp.lt.s32.totalorder %v3088_v0, 0  ;;  %v1230_v33 = vadd.s32 %v1228_v62, %v1222_v46  ;;  %vm1231_vm12 = vc.u32 %v1229_v1, %v1225_v29  ;;  %v1246_v4 = vshrl.u32 %v1242_v22, 16 }
 0x256   : > { %v2661_v30 = vsel %vm3089_vm6, 0, %v3088_v0  ;;  %vm1253_vm7 = vc.u32 %v1251_v53, %v1247_v12  ;;  %v1232_v2 = vsel %vm1231_vm12, 1, %v5847_v58  ;;  %v1226_v60 = vshrl.u32 %v1221_v39, 16 }
 0x257   : > { %v2662_v32 = vsub.s32 32, %v2661_v30  ;;  %v2666_v61 = vsub.s32 4294967266, %v2661_v30  ;;  %v1234_v27 = vadd.s32 %v1232_v2, %v1230_v33  ;;  %v1254_v37 = vsel %vm1253_vm7, 1, %v5847_v58 }
 0x258   : > { %v3090_v18 = vadd.s32 4294967169, %v2710_v63  ;;  %v1248_v28 = vshrl.u32 %v1243_v57, 16  ;;  %v1256_v16 = vadd.s32 %v1254_v37, %v1252_v3  ;;  %v2663_v13 = vshll.u32 %v5078_v10, %v2661_v30 }
 0x259   : > { %v2664_v8 = vshrl.u32 %v2646_v20, %v2662_v32  ;;  %v2667_v49 = vadd.s32 127, %v2666_v61  ;;  %v1235_v0 = vadd.s32 %v1234_v27, %v1224_v45  ;;  %v5102_v46 = vadd.s32 %v1251_v53, %v1247_v12 }
 0x25a   : > { %v2716_v11 = vadd.s32 1, %v3090_v18  ;;  %v5904_v29 = vsub.s32 4294967266, %v5043_v23  ;;  %v1257_v22 = vadd.s32 %v1256_v16, %v1246_v4  ;;  %v5905_v39 = vand.u32 2147483647, %v5051_v36 }
 0x25b   : > { %v2668_v31 = vshll.u32 %v2667_v49, 23  ;;  %vm5801_vm7 = vcmp.lt.s32.totalorder %v4481_v25, 0  ;;  %v2665_v20 = vor.u32 %v2664_v8, %v2663_v13  ;;  %vm5906_vm14 = vcmp.lt.s32.totalorder %v5039_v24, 2 }
 0x25c   : > { %v1127_v1 = vadd.s32 127, %v5904_v29  ;;  %v2713_v62 = vand.u32 8388607, %v5905_v39  ;;  %v1205_v57 = vsel %vm5906_vm14, %v1202_v21, %v1204_v19  ;;  %v5111_v3 = vadd.s32 %v1235_v0, %v1226_v60 }
 0x25d   : > { %vm2717_vm15 = vcmp.gt.s32.totalorder %v2716_v11, 0  ;;  %v5907_v27 = vxor.u32 2147483648, %v5029_v48  ;;  %v2669_v10 = vor.u32 4788187, %v2668_v31  ;;  %v1258_v16 = vadd.s32 %v1257_v22, %v1248_v28 }
 0x25e   : > { %v2718_v12 = vsel %vm2717_vm15, %v2716_v11, 0  ;;  %v5908_v53 = vand.u32 2147483647, %v4618_v42  ;;  %v1123_v24 = vshll.u32 %v4978_v41, %v5043_v23  ;;  %v5911_v21 = vsub.s32 32, %v5043_v23 }
 0x25f   : > { %v2521_v45 = vsel %vm5802_vm8, %v5907_v27, %v5029_v48  ;;  %vm1261_vm12 = vc.u32 %v5111_v3, %v5102_v46  ;;  %v2720_v48 = vand.u32 31, %v2718_v12  ;;  %v1128_v30 = vshll.u32 %v1127_v1, 23 }
 0x260   : > { %vm5120_vm6 = vcmp.le.f32.partialorder %v5908_v53, 0.7853982  ;;  %v1124_v19 = vshrl.u32 %v5033_v9, %v5911_v21  ;;  %v1259_v28 = vmul.u32 %v5055_v17, %v1205_v57  ;;  %v1262_v33 = vadd.s32 1, %v1258_v16 }
 0x261   : > { %v2714_v32 = vor.u32 8388608, %v2713_v62  ;;  %v2670_v61 = vand.u32 2147483647, %v2669_v10  ;;  %v2672_v2 = vcvt.s32.f32 %v2665_v20  ;;  %v5132_v4 = vshrl.u32 %v2718_v12, 5 }
 0x262   : > { %v2721_v60 = vsub.s32 32, %v2720_v48  ;;  %v1263_v37 = vsel %vm1261_vm12, %v1262_v33, %v1258_v16  ;;  %v2723_v41 = vshll.u32 %v5860_v26, %v2720_v48  ;;  %v2726_v23 = vshll.u32 %v5836_v6, %v2720_v48 }
 0x263   : > { %v2729_v9 = vshll.u32 %v5837_v50, %v2720_v48  ;;  %v1264_v18 = vadd.s32 %v1263_v37, %v1259_v28  ;;  %v2732_v17 = vshll.u32 %v5838_v34, %v2720_v48  ;;  %v2735_v11 = vshll.u32 %v5839_v56, %v2720_v48 }
 0x264   : > { %v2724_v8 = vshrl.u32 %v5836_v6, %v2721_v60  ;;  %v2727_v49 = vshrl.u32 %v5837_v50, %v2721_v60  ;;  %v2730_v13 = vshrl.u32 %v5838_v34, %v2721_v60  ;;  %v2733_v0 = vshrl.u32 %v5839_v56, %v2721_v60 }
 0x265   : > { %v2736_v29 = vshrl.u32 %v5840_v7, %v2721_v60  ;;  %v2673_v1 = vmul.f32 %v2672_v2, %v2670_v61  ;;  %v1265_v31 = vadd.s32 536870912, %v1264_v18  ;;  %v5912_v6 = vxor.u32 2147483648, %v4976_v14 }
 0x266   : > { %v5145_v22 = vor.u32 %v2724_v8, %v2723_v41  ;;  %v5147_v39 = vor.u32 %v2727_v49, %v2726_v23  ;;  %v5156_v34 = vor.u32 %v2730_v13, %v2729_v9  ;;  %v2734_v56 = vor.u32 %v2733_v0, %v2732_v17 }
 0x267   : > { %v5154_v50 = vsel %vm5801_vm7, %v5912_v6, %v4976_v14  ;;  %v2737_v62 = vor.u32 %v2736_v29, %v2735_v11  ;;  %v1125_v7 = vor.u32 %v1124_v19, %v1123_v24  ;;  %v1129_v20 = vor.u32 4788187, %v1128_v30 }
 0x268   : > { %v5158_v57 = vshrl.u32 %v1265_v31, 30  ;;  %vm5804_vm15 = vcmp.lt.s32.totalorder %v5132_v4, 1  ;;  %v5164_v27 = vsel %vm5120_vm6, %v4618_v42, %v2521_v45  ;;  %v5913_v10 = vand.u32 2147483647, %v4766_v15 }
 0x269   : > { %vm5807_vm7 = vcmp.lt.s32.totalorder %v5132_v4, 4  ;;  %v2746_v16 = vsel %vm5804_vm15, %v5145_v22, %v5147_v39  ;;  %v5177_v12 = vshll.u32 %v2714_v32, 8  ;;  %v2674_v53 = vxor.u32 2147483648, %v2673_v1 }
 0x26a   : > { %vm5168_vm12 = vcmp.le.f32.partialorder %v5913_v10, 0.7853982  ;;  %v1267_v24 = vshll.u32 %v5158_v57, 30  ;;  %vm5806_vm8 = vcmp.lt.s32.totalorder %v5132_v4, 3  ;;  %v2747_v45 = vsel %vm5807_vm7, %v2734_v56, 920167782 }
 0x26b   : > { %vm5805_vm14 = vcmp.lt.s32.totalorder %v5132_v4, 2  ;;  %v2748_v21 = vsel %vm5806_vm8, %v5156_v34, %v2747_v45  ;;  %v2750_v19 = vsel %vm5804_vm15, %v5147_v39, %v5156_v34  ;;  %v2751_v48 = vsel %vm5807_vm7, %v2737_v62, 1326507024 }
 0x26c   : > { %v1130_v30 = vand.u32 2147483647, %v1129_v20  ;;  %v1132_v28 = vcvt.s32.f32 %v1125_v7  ;;  %v1268_v33 = vsub.s32 %v1264_v18, %v1267_v24  ;;  %v2749_v32 = vsel %vm5805_vm14, %v2746_v16, %v2748_v21 }
 0x26d   : > { %v2752_v61 = vsel %vm5806_vm8, %v2734_v56, %v2751_v48  ;;  %v2755_v2 = vand.u32 65535, %v5177_v12  ;;  %v2779_v37 = vand.u32 65535, %v2749_v32  ;;  %v2780_v41 = vshrl.u32 %v2749_v32, 16 }
 0x26e   : > { %vm1269_vm11 = vcmp.lt.s32.totalorder %v1268_v33, 0  ;;  %v1270_v23 = vsub.s32 0, %v1268_v33  ;;  %v2753_v9 = vsel %vm5805_vm14, %v2750_v19, %v2752_v61  ;;  %v2756_v8 = vshrl.u32 %v5177_v12, 16 }
 0x26f   : > { %vm5916_vm15 = vcmp.lt.s32.totalorder %v4766_v15, 0  ;;  %v2757_v49 = vand.u32 65535, %v2753_v9  ;;  %v2758_v17 = vshrl.u32 %v2753_v9, 16  ;;  %v2782_v13 = vmul.u32 %v2780_v41, %v2755_v2 }
 0x270   : > { %v2675_v18 = vsel %vm5916_vm15, %v2674_v53, %v2673_v1  ;;  %v5203_v0 = vmul.f32 %v1132_v28, %v1130_v30  ;;  %v1260_v11 = vadd.s32 %v5102_v46, %v5111_v3  ;;  %v1271_v29 = vsel %vm1269_vm11, %v1270_v23, %v1268_v33 }
 0x271   : > { %v2783_v31 = vmul.u32 %v2779_v37, %v2756_v8  ;;  %v1272_v6 = vclz %v1271_v29  ;;  %v2722_v56 = vshrl.u32 %v5860_v26, %v2721_v60  ;;  %v2760_v62 = vmul.u32 %v2758_v17, %v2755_v2 }
 0x272   : > { %v2761_v7 = vmul.u32 %v2757_v49, %v2756_v8  ;;  %v5211_v20 = vsel %vm5168_vm12, %v4766_v15, %v2675_v18  ;;  %v2781_v1 = vmul.u32 %v2779_v37, %v2755_v2  ;;  %v2784_v10 = vmul.u32 %v2780_v41, %v2756_v8 }
 0x273   : > { %v2785_v16 = vshll.u32 %v2782_v13, 16  ;;  %v5917_v53 = vand.u32 2147483647, %v4481_v25  ;;  %v3061_v46 = vadd.s32 4294967294, %v1272_v6  ;;  %v2759_v3 = vmul.u32 %v2757_v49, %v2755_v2 }
 0x274   : > { %v2762_v45 = vmul.u32 %v2758_v17, %v2756_v8  ;;  %v2763_v26 = vshll.u32 %v2760_v62, 16  ;;  %v2765_v60 = vshll.u32 %v2761_v7, 16  ;;  %v2787_v21 = vshll.u32 %v2783_v31, 16 }
 0x275   : > { %vm5215_vm15 = vcmp.le.f32.partialorder %v5917_v53, 0.7853982  ;;  %vm2789_vm11 = vc.u32 %v2781_v1, %v2785_v16  ;;  %v2791_v19 = vadd.s32 %v2785_v16, %v2781_v1  ;;  %vm3062_vm14 = vcmp.lt.s32.totalorder %v3061_v46, 0 }
 0x276   : > { %vm2767_vm8 = vc.u32 %v2759_v3, %v2763_v26  ;;  %v2769_v48 = vadd.s32 %v2763_v26, %v2759_v3  ;;  %v2790_v30 = vsel %vm2789_vm11, 1, %v5847_v58  ;;  %v1275_v28 = vsel %vm3062_vm14, 0, %v3061_v46 }
 0x277   : > { %v2768_v32 = vsel %vm2767_vm8, 1, %v5847_v58  ;;  %v2792_v61 = vadd.s32 %v2790_v30, %v2784_v10  ;;  %vm2793_vm7 = vc.u32 %v2791_v19, %v2787_v21  ;;  %v1276_v37 = vsub.s32 32, %v1275_v28 }
 0x278   : > { %v1280_v41 = vsub.s32 4294967266, %v1275_v28  ;;  %vm5920_vm13 = vcmp.lt.s32.totalorder %v5132_v4, 4  ;;  %v2770_v23 = vadd.s32 %v2768_v32, %v2762_v45  ;;  %v1277_v9 = vshll.u32 %v1268_v33, %v1275_v28 }
 0x279   : > { %v2743_v2 = vsel %vm5920_vm13, %v5156_v34, 2102212464  ;;  %vm2771_vm9 = vc.u32 %v2769_v48, %v2765_v60  ;;  %v2786_v8 = vshrl.u32 %v2782_v13, 16  ;;  %v2794_v18 = vsel %vm2793_vm7, 1, %v5847_v58 }
 0x27a   : > { %v1278_v49 = vshrl.u32 %v1260_v11, %v1276_v37  ;;  %v1281_v17 = vadd.s32 127, %v1280_v41  ;;  %v2772_v29 = vsel %vm2771_vm9, 1, %v5847_v58  ;;  %v2796_v6 = vadd.s32 %v2794_v18, %v2792_v61 }
 0x27b   : > { %vm5921_vm8 = vcmp.lt.s32.totalorder %v5132_v4, 1  ;;  %vm5922_vm13 = vcmp.lt.s32.totalorder %v5132_v4, 3  ;;  %v2764_v33 = vshrl.u32 %v2760_v62, 16  ;;  %v2774_v10 = vadd.s32 %v2772_v29, %v2770_v23 }
 0x27c   : > { %v2742_v1 = vsel %vm5921_vm8, %v2722_v56, %v5145_v22  ;;  %v2744_v34 = vsel %vm5922_vm13, %v5147_v39, %v2743_v2  ;;  %v1279_v13 = vor.u32 %v1278_v49, %v1277_v9  ;;  %v1282_v16 = vshll.u32 %v1281_v17, 23 }
 0x27d   : > { %v2788_v53 = vshrl.u32 %v2783_v31, 16  ;;  %v2797_v46 = vadd.s32 %v2796_v6, %v2786_v8  ;;  %v5235_v11 = vmul.f32 %v5024_v38, %v5024_v38  ;;  %v5241_v58 = vsel %vm5215_vm15, %v4481_v25, %v5154_v50 }
 0x27e   : > { %v2766_v22 = vshrl.u32 %v2761_v7, 16  ;;  %v2775_v56 = vadd.s32 %v2774_v10, %v2764_v33  ;;  %v5245_v39 = vmul.f32 %v5164_v27, %v5164_v27  ;;  %v1283_v62 = vor.u32 4788187, %v1282_v16 }
 0x27f   : > { %vm5923_vm9 = vcmp.lt.s32.totalorder %v5132_v4, 2  ;;  %v2798_v3 = vadd.s32 %v2797_v46, %v2788_v53  ;;  %v5924_v45 = vand.u32 2147483647, %v4646_v44  ;;  %v1134_v50 = vxor.u32 2147483648, %v5203_v0 }
 0x280   : > { %v2745_v31 = vsel %vm5923_vm9, %v2742_v1, %v2744_v34  ;;  %v5258_v7 = vmul.f32 %v5211_v20, %v5211_v20  ;;  %v5260_v60 = vadd.s32 %v2775_v56, %v2766_v22  ;;  %v5262_v48 = vadd.s32 %v2791_v19, %v2787_v21 }
 0x281   : > { %vm5251_vm7 = vcmp.le.f32.partialorder %v5924_v45, 0.7853982  ;;  %v5266_v4 = vmul.f32 %v5241_v58, %v5241_v58  ;;  %v1284_v30 = vand.u32 2147483647, %v1283_v62  ;;  %v1286_v28 = vcvt.s32.f32 %v1279_v13 }
 0x282   : > { %v2802_v32 = vadd.s32 1, %v2798_v3  ;;  %v5927_v61 = vand.u32 2147483647, %v4961_v59  ;;  %vm1168_vm11 = vcmp.lt.s32.totalorder %v4961_v59, 0  ;;  %v2799_v41 = vmul.u32 %v5177_v12, %v2745_v31 }
 0x283   : > { %vm2801_vm8 = vc.u32 %v5260_v60, %v5262_v48  ;;  %v1287_v21 = vmul.f32 %v1286_v28, %v1284_v30  ;;  %v2527_v2 = vmul.f32 -0.001358992, %v5245_v39  ;;  %v2534_v23 = vmul.f32 -0.00019511016, %v5245_v39 }
 0x284   : > { %vm5270_vm14 = vcmp.le.f32.partialorder %v5927_v61, 0.7853982  ;;  %v2803_v19 = vsel %vm2801_vm8, %v2802_v32, %v2798_v3  ;;  %v1135_v9 = vsel %vm5811_vm1, %v1134_v50, %v5203_v0  ;;  %v2681_v18 = vmul.f32 -0.001358992, %v5258_v7 }
 0x285   : > { %v2804_v8 = vadd.s32 %v2803_v19, %v2799_v41  ;;  %v2688_v49 = vmul.f32 -0.00019511016, %v5258_v7  ;;  %v1288_v17 = vxor.u32 2147483648, %v1287_v21  ;;  %v2676_v12 = vsub.s32 4, %v5058_v40 }
 0x286   : > { %v2528_v29 = vadd.f32 0.041655596, %v2527_v2  ;;  %v2535_v6 = vadd.f32 0.008332121, %v2534_v23  ;;  %v2522_v33 = vsub.s32 4, %v4852_v5  ;;  %v2368_v10 = vsub.s32 4, %v4461_v51 }
 0x287   : > { %v2805_v1 = vadd.s32 536870912, %v2804_v8  ;;  %v2689_v34 = vadd.f32 0.008332121, %v2688_v49  ;;  %v1289_v13 = vsel %vm1168_vm11, %v1288_v17, %v1287_v21  ;;  %v2682_v0 = vadd.f32 0.041655596, %v2681_v18 }
 0x288   : > { %v2529_v16 = vmul.f32 %v2528_v29, %v5245_v39  ;;  %v2536_v53 = vmul.f32 %v2535_v6, %v5245_v39  ;;  %v5296_v46 = vsel %vm5270_vm14, %v4961_v59, %v1289_v13  ;;  %v2373_v62 = vmul.f32 -0.001358992, %v4939_v55 }
 0x289   : > { %v2806_v22 = vshrl.u32 %v2805_v1, 30  ;;  %v2690_v56 = vmul.f32 %v2689_v34, %v5258_v7  ;;  %v5303_v31 = vsel %vm5251_vm7, %v4646_v44, %v1135_v9  ;;  %v1290_v3 = vsub.s32 4, %v5158_v57 }
 0x28a   : > { %v5308_v45 = vmul.f32 %v5296_v46, %v5296_v46  ;;  %vm5930_vm9 = vcmp.lt.s32.totalorder %v4766_v15, 0  ;;  %v5931_v30 = vand.u32 2147483647, %v5051_v36  ;;  %vm5934_vm1 = vcmp.lt.s32.totalorder %v4618_v42, 0 }
 0x28b   : > { %v2677_v50 = vsel %vm5930_vm9, %v2676_v12, %v5058_v40  ;;  %v2807_v32 = vshll.u32 %v2806_v22, 30  ;;  %v2523_v61 = vsel %vm5934_vm1, %v2522_v33, %v4852_v5  ;;  %vm5935_vm13 = vcmp.lt.s32.totalorder %v4214_v35, 0 }
 0x28c   : > { %vm5315_vm8 = vcmp.le.f32.partialorder %v5931_v30, 0.7853982  ;;  %v2369_v41 = vsel %vm5935_vm13, %v2368_v10, %v4461_v51  ;;  %v2214_v21 = vsub.s32 4, %v4102_v43  ;;  %v1302_v40 = vmul.f32 -0.00019511016, %v5308_v45 }
 0x28d   : > { %v2683_v19 = vmul.f32 %v2682_v0, %v5258_v7  ;;  %v2530_v2 = vadd.f32 -0.4999988, %v2529_v16  ;;  %v2537_v23 = vadd.f32 -0.16666654, %v2536_v53  ;;  %v5330_v9 = vsub.s32 %v2804_v8, %v2807_v32 }
 0x28e   : > { %v2830_v18 = vsub.s32 4, %v2806_v22  ;;  %v2691_v49 = vadd.f32 -0.16666654, %v2690_v56  ;;  %v2374_v17 = vadd.f32 0.041655596, %v2373_v62  ;;  %v5334_v5 = vmul.f32 %v5303_v31, %v5303_v31 }
 0x28f   : > { %v5339_v51 = vsel %vm1168_vm11, %v1290_v3, %v5158_v57  ;;  %v1303_v12 = vadd.f32 0.008332121, %v1302_v40  ;;  %v2679_v29 = vsel %vm5168_vm12, 0, %v2677_v50  ;;  %vm2809_vm1 = vcmp.lt.s32.totalorder %v5330_v9, 0 }
 0x290   : > { %v2810_v8 = vsub.s32 0, %v5330_v9  ;;  %v2525_v6 = vsel %vm5120_vm6, 0, %v2523_v61  ;;  %vm5936_vm13 = vcmp.lt.s32.totalorder %v3880_v52, 0  ;;  %v2684_v57 = vadd.f32 -0.4999988, %v2683_v19  ;;  %v2867_v19 = vpop.permute.xlu0 %2866 }
 0x291   : > { %v5352_v1 = vsel %vm5936_vm13, %v2214_v21, %v4102_v43  ;;  %v2531_v34 = vmul.f32 %v2530_v2, %v5245_v39  ;;  %v2538_v33 = vmul.f32 %v2537_v23, %v5245_v39  ;;  %v2371_v14 = vsel %vm4863_vm4, 0, %v2369_v41 }
 0x292   : > { %v2811_v10 = vsel %vm2809_vm1, %v2810_v8, %v5330_v9  ;;  %vm5937_vm12 = vcmp.lt.s32.totalorder %v5051_v36, 0  ;;  %v2692_v63 = vmul.f32 %v2691_v49, %v5258_v7  ;;  %v2375_v0 = vmul.f32 %v2374_v17, %v4939_v55 }
 0x293   : > { %v2831_v13 = vsel %vm5937_vm12, %v2830_v18, %v2806_v22  ;;  %v1304_v43 = vmul.f32 %v1303_v12, %v5308_v45  ;;  %v2812_v16 = vclz %v2811_v10  ;;  %v5364_v53 = vand.u32 3, %v2679_v29  ;;  %v3163_v18 = vld [vmem:[%s3348_s17] sm:$0x7] }
 0x294   : > { %v5366_v56 = vand.u32 3, %v2525_v6  ;;  %v2800_v47 = vadd.s32 %v5262_v48, %v5260_v60  ;;  %v2380_v39 = vmul.f32 -0.00019511016, %v4939_v55  ;;  %v5371_v62 = vand.u32 3, %v2371_v14 }
 0x295   : > { %v2217_v22 = vsel %vm4614_vm3, 0, %v5352_v1  ;;  %v3091_v3 = vadd.s32 4294967294, %v2812_v16  ;;  %v2833_v50 = vsel %vm5315_vm8, 0, %v2831_v13  ;;  %v2685_v30 = vmul.f32 %v2684_v57, %v5258_v7 }
 0x296   : > { %v2539_v32 = vadd.f32 1.0, %v2538_v33  ;;  %v2693_v61 = vadd.f32 1.0, %v2692_v63  ;;  %v5379_v41 = vadd.f32 1.0, %v2531_v34  ;;  %v2376_v60 = vadd.f32 -0.4999988, %v2375_v0 }
 0x297   : > { %v2381_v48 = vadd.f32 0.008332121, %v2380_v39  ;;  %v1305_v21 = vadd.f32 -0.16666654, %v1304_v43  ;;  %vm3092_vm4 = vcmp.lt.s32.totalorder %v3091_v3, 0  ;;  %v2862_v40 = vstv %s5319_s9  ;;  %s2934_s9 = scalar_lea.sflag [#allocation3], %s254_s14 }
 0x298   : > { %v2873_v2 = vstv %s5341_s10  ;;  %v2815_v23 = vsel %vm3092_vm4, 0, %v3091_v3  ;;  %v2863_v49 = vmul.f32 %v3163_v18, %v2862_v40  ;;  %v2686_v7 = vadd.f32 1.0, %v2685_v30  ;;  %s3193_s10 = sshra.s32 %s2949_s29, 4  ;;  %s3194_s10 = int_to_ptr.hbm [resolvable:$true] %s3193_s10 }
 0x299   : > { %v2874_v17 = vmul.f32 %v3163_v18, %v2873_v2  ;;  %v2382_v12 = vmul.f32 %v2381_v48, %v4939_v55  ;;  %v2816_v29 = vsub.s32 32, %v2815_v23  ;;  %v2820_v8 = vsub.s32 4294967266, %v2815_v23  ;;  %s3195_s17 = scalar_lea.hbm %s3194_s10, 4  ;;  %p3200_p3 = scmp.lt.s32.totalorder %s3194_s10, %s5704_s6 }
 0x29a   : > { %vm2698_vm6 = vcmp.eq.s32.totalorder %v5364_v53, 0  ;;  %v2540_v6 = vmul.f32 %v2539_v32, %v5164_v27  ;;  %v2869_v57 = vperm.slane %v2863_v49, 0  ;;  %v2694_v34 = vmul.f32 %v2693_v61, %v5211_v20  ;;  %v5938_v20 = vld [vmem:[#allocation39_spill] sm:$0xff]  ;;  %p3196_p0 = scmp.ne.s32.totalorder %s3194_s10, %s3195_s17  ;;  %p3201_p4 = scmp.lt.s32.totalorder %s3199_s12, %s3195_s17 }
 0x29b   : > { %vm2544_vm11 = vcmp.eq.s32.totalorder %v5366_v56, 0  ;;  %v2377_v33 = vmul.f32 %v2376_v60, %v4939_v55  ;;  %v2383_v14 = vadd.f32 -0.16666654, %v2382_v12  ;;  %v1306_v10 = vmul.f32 %v1305_v21, %v5308_v45 }
 0x29c   : > { %v2817_v13 = vshll.u32 %v5330_v9, %v2815_v23  ;;  %v2818_v63 = vshrl.u32 %v2800_v47, %v2816_v29  ;;  %v2821_v0 = vadd.s32 127, %v2820_v8  ;;  %vm2701_vm9 = vcmp.eq.s32.totalorder %v5364_v53, 2  ;;  %p3197_p1 = pnand %p3196_p0, %p3329_p5  ;;  %p3202_p7 = por %p3201_p4, %p3200_p3 }
 0x29d   : > { %v2870_v43 = vsub.f32 %v2867_v19, %v2869_v57  ;;  %v2879_v16 = vperm.slane %v2874_v17, 1  ;;  %vm2547_vm1 = vcmp.eq.s32.totalorder %v5366_v56, 2  ;;  %v2384_v27 = vmul.f32 %v2383_v14, %v4939_v55  ;;  %v2877_v55 = vpop.permute.xlu0 %2876 }
 0x29e   : > { %v2219_v39 = vmul.f32 -0.001358992, %v5938_v20  ;;  %v2819_v3 = vor.u32 %v2818_v63, %v2817_v13  ;;  %v2822_v30 = vshll.u32 %v2821_v0, 23  ;;  %v5396_v32 = vand.u32 3, %v2833_v50  ;;  %v5939_v50 = vld [vmem:[#allocation46_spill] sm:$0xff]  ;;  %p3198_p2 = pneg %p3197_p1 }
 0x29f   : > { %v2226_v9 = vmul.f32 -0.00019511016, %v5938_v20  ;;  %v2699_v47 = vxor.u32 2147483648, %v2694_v34  ;;  %v2378_v61 = vadd.f32 1.0, %v2377_v33  ;;  %v2385_v60 = vadd.f32 1.0, %v2384_v27 }
 0x2a0   : > { %v1307_v48 = vadd.f32 1.0, %v1306_v10  ;;  %v2823_v21 = vor.u32 4788187, %v2822_v30  ;;  %v2702_v40 = vxor.u32 2147483648, %v2686_v7  ;;  %v2545_v19 = vxor.u32 2147483648, %v2540_v6  ;;  %p3203_p8 = pnand %p3202_p7, %p3198_p2 }
 0x2a1   : > { %v2871_v2 = vmul.f32 %v2870_v43, %v2870_v43  ;;  %v2880_v23 = vsub.f32 %v2877_v55, %v2879_v16  ;;  %v2386_v18 = vmul.f32 %v2385_v60, %v5939_v50  ;;  %v2220_v49 = vadd.f32 0.041655596, %v2219_v39 }
 0x2a2   : > { %v2824_v17 = vand.u32 2147483647, %v2823_v21  ;;  %v2826_v12 = vcvt.s32.f32 %v2819_v3  ;;  %v2548_v29 = vxor.u32 2147483648, %v5379_v41  ;;  %vm2389_vm12 = vcmp.lt.s32.totalorder %v5371_v62, 2 }
 0x2a3   : > { %v2227_v8 = vadd.f32 0.008332121, %v2226_v9  ;;  %v2881_v57 = vmul.f32 %v2880_v23, %v2880_v23  ;;  %v2700_v33 = vsel %vm2698_vm6, %v2686_v7, %v2699_v47  ;;  %v2394_v14 = vxor.u32 2147483648, %v2378_v61  ;;  %v5940_v9 = vld [vmem:[#allocation15_spill] sm:$0xff] }
 0x2a4   : > { %v2221_v10 = vmul.f32 %v2220_v49, %v5938_v20  ;;  %v2827_v13 = vmul.f32 %v2826_v12, %v2824_v17  ;;  %v2546_v63 = vsel %vm2544_vm11, %v5379_v41, %v2545_v19  ;;  %v2391_v0 = vxor.u32 2147483648, %v2386_v18  ;;  %v5946_v49 = vld [vmem:[#allocation10_spill] sm:$0xff] }
 0x2a5   : > { %v2228_v43 = vmul.f32 %v2227_v8, %v5938_v20  ;;  %v2882_v16 = vadd.f32 %v2881_v57, %v2871_v2  ;;  %v2703_v27 = vsel %vm2701_vm9, %v2702_v40, %v2694_v34  ;;  %vm2393_vm6 = vcmp.eq.s32.totalorder %v5371_v62, 2  ;;  %v5945_v2 = vld [vmem:[#allocation30_spill] sm:$0xff] }
 0x2a6   : > { %v2222_v7 = vadd.f32 -0.4999988, %v2221_v10  ;;  %v2828_v39 = vxor.u32 2147483648, %v2827_v13  ;;  %v2549_v3 = vsel %vm2547_vm1, %v2548_v29, %v2540_v6  ;;  %vm2387_vm13 = vweird.f32 %v4214_v35  ;;  %v5948_v8 = vld [vmem:[#allocation38_spill] sm:$0xff] }
 0x2a7   : > { %v2229_v30 = vadd.f32 -0.16666654, %v2228_v43  ;;  %v2060_v47 = vsub.s32 4, %v5940_v9  ;;  %v5422_v41 = vmul.f32 %v1307_v48, %v5296_v46  ;;  %v2883_v60 = vmul.f32 -0.5, %v2882_v16 }
 0x2a8   : > { %vm5941_vm11 = vcmp.lt.s32.totalorder %v5364_v53, 2  ;;  %vm5942_vm9 = vcmp.lt.s32.totalorder %v5366_v56, 2  ;;  %vm5943_vm4 = vcmp.lt.s32.totalorder %v5051_v36, 0  ;;  %vm5944_vm1 = vcmp.eq.s32.totalorder %v5371_v62, 0 }
 0x2a9   : > { %v2704_v21 = vsel %vm5941_vm11, %v2700_v33, %v2703_v27  ;;  %v2550_v34 = vsel %vm5942_vm9, %v2546_v63, %v2549_v3  ;;  %v2829_v55 = vsel %vm5943_vm4, %v2828_v39, %v2827_v13  ;;  %v2392_v6 = vsel %vm5944_vm1, %v2378_v61, %v2391_v0  ;;  %v5952_v0 = vld [vmem:[#allocation41_spill] sm:$0xff] }
 0x2aa   : > { %v2395_v40 = vsel %vm2393_vm6, %v2394_v14, %v2386_v18  ;;  %v2230_v19 = vmul.f32 %v2229_v30, %v5938_v20  ;;  %v5436_v46 = vsel %vm5315_vm8, %v5051_v36, %v2829_v55  ;;  %v2884_v48 = vmul.f32 1.442695, %v2883_v60 }
 0x2ab   : > { %v2223_v53 = vmul.f32 %v2222_v7, %v5938_v20  ;;  %v2065_v56 = vmul.f32 -0.001358992, %v5945_v2  ;;  %v2834_v23 = vmul.f32 %v5436_v46, %v5436_v46  ;;  %vm5947_vm4 = vcmp.lt.s32.totalorder %v5946_v49, 0 }
 0x2ac   : > { %v2231_v50 = vadd.f32 1.0, %v2230_v19  ;;  %v2061_v61 = vsel %vm5947_vm4, %v2060_v47, %v5940_v9  ;;  %v2072_v18 = vmul.f32 -0.00019511016, %v5945_v2  ;;  %3161 = vpow2.f32 %v2884_v48 }
 0x2ad   : > { %v2396_v28 = vsel %vm2389_vm12, %v2392_v6, %v2395_v40  ;;  %v2234_v20 = vand.u32 3, %v2217_v22  ;;  %v2066_v17 = vadd.f32 0.041655596, %v2065_v56  ;;  %v2842_v12 = vmul.f32 -0.00019511016, %v2834_v23 }
 0x2ae   : > { %v2835_v29 = vmul.f32 -0.001358992, %v2834_v23  ;;  %v2232_v57 = vmul.f32 %v2231_v50, %v5948_v8  ;;  %v2073_v33 = vadd.f32 0.008332121, %v2072_v18  ;;  %vm5949_vm8 = vweird.f32 %v4766_v15  ;;  %v5954_v8 = vld [vmem:[#allocation33_spill] sm:$0xff] }
 0x2af   : > { %v5455_v14 = vsel %vm5949_vm8, nan, %v2704_v21  ;;  %vm5950_vm6 = vweird.f32 %v4618_v42  ;;  %v2224_v62 = vadd.f32 1.0, %v2223_v53  ;;  %v2067_v54 = vmul.f32 %v2066_v17, %v5945_v2 }
 0x2b0   : > { %v5459_v10 = vsel %vm5950_vm6, nan, %v2550_v34  ;;  %v2843_v13 = vadd.f32 0.008332121, %v2842_v12  ;;  %v2836_v1 = vadd.f32 0.041655596, %v2835_v29  ;;  %v2063_v63 = vsel %vm4223_vm5, 0, %v2061_v61 }
 0x2b1   : > { %v1906_v43 = vsub.s32 4, %v5952_v0  ;;  %v5467_v16 = vsel %vm2387_vm13, nan, %v2396_v28  ;;  %v2068_v15 = vadd.f32 -0.4999988, %v2067_v54  ;;  %v2074_v27 = vmul.f32 %v2073_v33, %v5945_v2 }
 0x2b2   : > { %v1911_v42 = vmul.f32 -0.001358992, %v5266_v4  ;;  %v2844_v7 = vmul.f32 %v2843_v13, %v2834_v23  ;;  %v2837_v39 = vmul.f32 %v2836_v1, %v2834_v23  ;;  %vm2235_vm3 = vcmp.lt.s32.totalorder %v2234_v20, 2  ;;  %v3162_v30 = vpop.eup %3161  ;;  %v5955_v13 = vld [vmem:[#allocation28_spill] sm:$0xff] }
 0x2b3   : > { %v2237_v3 = vxor.u32 2147483648, %v2232_v57  ;;  %vm2236_vm12 = vcmp.eq.s32.totalorder %v2234_v20, 0  ;;  %v2240_v9 = vxor.u32 2147483648, %v2224_v62  ;;  %v2075_v47 = vadd.f32 -0.16666654, %v2074_v27  ;;  %2907 = vmatpush.msrb.mxu1 %v3162_v30 }
 0x2b4   : > { %v1912_v60 = vadd.f32 0.041655596, %v1911_v42  ;;  %v2845_v21 = vadd.f32 -0.16666654, %v2844_v7  ;;  %v2838_v34 = vadd.f32 -0.4999988, %v2837_v39  ;;  %vm2233_vm5 = vweird.f32 %v3880_v52 }
 0x2b5   : > { %vm2239_vm13 = vcmp.eq.s32.totalorder %v2234_v20, 2  ;;  %vm5953_vm11 = vcmp.lt.s32.totalorder %v4481_v25, 0  ;;  %vm2852_vm9 = vcmp.eq.s32.totalorder %v5396_v32, 0  ;;  %vm2855_vm1 = vcmp.eq.s32.totalorder %v5396_v32, 2  ;;  %v5957_v42 = vld [vmem:[#allocation23_spill] sm:$0xff] }
 0x2b6   : > { %v1907_v35 = vsel %vm5953_vm11, %v1906_v43, %v5952_v0  ;;  %v2069_v55 = vmul.f32 %v2068_v15, %v5945_v2  ;;  %v2076_v6 = vmul.f32 %v2075_v47, %v5945_v2  ;;  %v1913_v40 = vmul.f32 %v1912_v60, %v5266_v4  ;;  %v5956_v0 = vld [vmem:[#allocation45_spill] sm:$0xff] }
 0x2b7   : > { %v1918_v19 = vmul.f32 -0.00019511016, %v5266_v4  ;;  %v2846_v48 = vmul.f32 %v2845_v21, %v2834_v23  ;;  %v2839_v53 = vmul.f32 %v2838_v34, %v2834_v23  ;;  %vm2851_vm4 = vcmp.lt.s32.totalorder %v5396_v32, 2 }
 0x2b8   : > { %v2238_v56 = vsel %vm2236_vm12, %v2224_v62, %v2237_v3  ;;  %v2080_v50 = vand.u32 3, %v2063_v63  ;;  %vm2849_vm8 = vweird.f32 %v5051_v36  ;;  %v2241_v61 = vsel %vm2239_vm13, %v2240_v9, %v2232_v57 }
 0x2b9   : > { %v2077_v18 = vadd.f32 1.0, %v2076_v6  ;;  %v1914_v28 = vadd.f32 -0.4999988, %v1913_v40  ;;  %v1919_v17 = vadd.f32 0.008332121, %v1918_v19  ;;  %v2847_v12 = vadd.f32 1.0, %v2846_v48 }
 0x2ba   : > { %v2840_v29 = vadd.f32 1.0, %v2839_v53  ;;  %v1909_v2 = vsel %vm5215_vm15, 0, %v1907_v35  ;;  %v1752_v33 = vsub.s32 4, %v5954_v8  ;;  %v2242_v23 = vsel %vm2235_vm3, %v2238_v56, %v2241_v61  ;;  %v5960_v61 = vld [vmem:[#allocation21_spill] sm:$0xff] }
 0x2bb   : > { %v2070_v54 = vadd.f32 1.0, %v2069_v55  ;;  %v2078_v1 = vmul.f32 %v2077_v18, %v5955_v13  ;;  %v1920_v62 = vmul.f32 %v1919_v17, %v5266_v4  ;;  %v2848_v22 = vmul.f32 %v2847_v12, %v5436_v46  ;;  %v5961_v12 = vld [vmem:[#allocation35_spill] sm:$0xff] }
 0x2bc   : > { %v2856_v57 = vxor.u32 2147483648, %v2840_v29  ;;  %vm2081_vm6 = vcmp.lt.s32.totalorder %v2080_v50, 2  ;;  %v1915_v63 = vmul.f32 %v1914_v28, %v5266_v4  ;;  %v1757_v43 = vmul.f32 -0.001358992, %v5956_v0 }
 0x2bd   : > { %vm2082_vm12 = vcmp.eq.s32.totalorder %v2080_v50, 0  ;;  %vm2085_vm13 = vcmp.eq.s32.totalorder %v2080_v50, 2  ;;  %v1921_v24 = vadd.f32 -0.16666654, %v1920_v62  ;;  %v1926_v15 = vand.u32 3, %v1909_v2 }
 0x2be   : > { %v2853_v27 = vxor.u32 2147483648, %v2848_v22  ;;  %v2083_v20 = vxor.u32 2147483648, %v2078_v1  ;;  %vm5958_vm15 = vcmp.lt.s32.totalorder %v5957_v42, 0  ;;  %v1758_v39 = vadd.f32 0.041655596, %v1757_v43 }
 0x2bf   : > { %v1753_v7 = vsel %vm5958_vm15, %v1752_v33, %v5954_v8  ;;  %v2243_v46 = vsel %vm2233_vm5, nan, %v2242_v23  ;;  %vm2079_vm3 = vweird.f32 %v5946_v49  ;;  %v2086_v3 = vxor.u32 2147483648, %v2070_v54  ;;  %v5962_v23 = vld [vmem:[#allocation14_spill] sm:$0xff] }
 0x2c0   : > { %v1922_v30 = vmul.f32 %v1921_v24, %v5266_v4  ;;  %v1764_v9 = vmul.f32 -0.00019511016, %v5956_v0  ;;  %v2854_v47 = vsel %vm2852_vm9, %v2840_v29, %v2853_v27  ;;  %v2857_v60 = vsel %vm2855_vm1, %v2856_v57, %v2848_v22 }
 0x2c1   : > { %v1916_v21 = vadd.f32 1.0, %v1915_v63  ;;  %v1759_v34 = vmul.f32 %v1758_v39, %v5956_v0  ;;  %v2858_v52 = vsel %vm2851_vm4, %v2854_v47, %v2857_v60  ;;  %v1755_v6 = vsel %vm4704_vm10, 0, %v1753_v7  ;;  %v5967_v47 = vld [vmem:[#allocation25_spill] sm:$0xff] }
 0x2c2   : > { %v1923_v35 = vadd.f32 1.0, %v1922_v30  ;;  %v1765_v40 = vadd.f32 0.008332121, %v1764_v9  ;;  %v2859_v4 = vsel %vm2849_vm8, nan, %v2858_v52  ;;  %v2084_v19 = vsel %vm2082_vm12, %v2070_v54, %v2083_v20  ;;  %v5965_v20 = vld [vmem:[#allocation13_spill] sm:$0xff] }
 0x2c3   : > { %vm1927_vm5 = vcmp.lt.s32.totalorder %v1926_v15, 2  ;;  %v1760_v48 = vadd.f32 -0.4999988, %v1759_v34  ;;  %2912 = vmatpush.msra.mxu2 %v2859_v4  ;;  %v2087_v53 = vsel %vm2085_vm13, %v2086_v3, %v2078_v1  ;;  %v1598_v18 = vsub.s32 4, %v5960_v61  ;;  %v5966_v3 = vld [vmem:[#allocation43_spill] sm:$0xff] }
 0x2c4   : > { %v1924_v56 = vmul.f32 %v1923_v35, %v5241_v58  ;;  %v1766_v32 = vmul.f32 %v1765_v40, %v5956_v0  ;;  %v1772_v17 = vand.u32 3, %v1755_v6  ;;  %v1603_v29 = vmul.f32 -0.001358992, %v5961_v12  ;;  %v5968_v35 = vld [vmem:[#allocation9_spill] sm:$0xff] }
 0x2c5   : > { %v1761_v28 = vmul.f32 %v1760_v48, %v5956_v0  ;;  %v1610_v36 = vmul.f32 -0.00019511016, %v5961_v12  ;;  %2913 = vmatpush.msra.mxu2 %v5455_v14  ;;  %v2088_v2 = vsel %vm2081_vm6, %v2084_v19, %v2087_v53  ;;  %vm1925_vm10 = vweird.f32 %v4481_v25 }
 0x2c6   : > { %v1929_v8 = vxor.u32 2147483648, %v1924_v56  ;;  %v1932_v33 = vxor.u32 2147483648, %v1916_v21  ;;  %v1767_v58 = vadd.f32 -0.16666654, %v1766_v32  ;;  %vm1928_vm11 = vcmp.eq.s32.totalorder %v1926_v15, 0 }
 0x2c7   : > { %vm5963_vm9 = vcmp.lt.s32.totalorder %v5962_v23, 0  ;;  %v1604_v13 = vadd.f32 0.041655596, %v1603_v29  ;;  %v1611_v1 = vadd.f32 0.008332121, %v1610_v36  ;;  %2914 = vmatpush.msra.mxu2 %v5459_v10  ;;  %vm1931_vm1 = vcmp.eq.s32.totalorder %v1926_v15, 2 }
 0x2c8   : > { %v1599_v54 = vsel %vm5963_vm9, %v1598_v18, %v5960_v61  ;;  %v1930_v62 = vsel %vm1928_vm11, %v1916_v21, %v1929_v8  ;;  %v1762_v22 = vadd.f32 1.0, %v1761_v28  ;;  %v1768_v14 = vmul.f32 %v1767_v58, %v5956_v0  ;;  %v5970_v18 = vld [vmem:[#allocation32_spill] sm:$0xff] }
 0x2c9   : > { %v2089_v50 = vsel %vm2079_vm3, nan, %v2088_v2  ;;  %vm1771_vm4 = vweird.f32 %v5957_v42  ;;  %vm1773_vm8 = vcmp.lt.s32.totalorder %v1772_v17, 2  ;;  %v1605_v57 = vmul.f32 %v1604_v13, %v5961_v12  ;;  %2915 = vmatpush.msra.mxu2 %v5467_v16 }
 0x2ca   : > { %v1612_v63 = vmul.f32 %v1611_v1, %v5961_v12  ;;  %v1933_v43 = vsel %vm1931_vm1, %v1932_v33, %v1924_v56  ;;  %v1769_v24 = vadd.f32 1.0, %v1768_v14  ;;  %v1601_v27 = vsel %vm4272_vm2, 0, %v1599_v54 }
 0x2cb   : > { %v1444_v7 = vsub.s32 4, %v5965_v20  ;;  %v1934_v0 = vsel %vm1927_vm5, %v1930_v62, %v1933_v43  ;;  %vm1774_vm6 = vcmp.eq.s32.totalorder %v1772_v17, 0  ;;  %v1606_v49 = vadd.f32 -0.4999988, %v1605_v57  ;;  %2916 = vmatpush.msra.mxu2 %v2243_v46 }
 0x2cc   : > { %v1613_v39 = vadd.f32 -0.16666654, %v1612_v63  ;;  %v1770_v30 = vmul.f32 %v1769_v24, %v5966_v3  ;;  %v1778_v9 = vxor.u32 2147483648, %v1762_v22  ;;  %v1449_v60 = vmul.f32 -0.001358992, %v5967_v47  ;;  %v5972_v63 = vld [vmem:[#allocation47_spill] sm:$0xff] }
 0x2cd   : > { %v1456_v16 = vmul.f32 -0.00019511016, %v5967_v47  ;;  %vm1777_vm12 = vcmp.eq.s32.totalorder %v1772_v17, 2  ;;  %v1607_v21 = vmul.f32 %v1606_v49, %v5961_v12  ;;  %v1618_v52 = vand.u32 3, %v1601_v27  ;;  %2917 = vmatpush.msra.mxu2 %v2089_v50 }
 0x2ce   : > { %v1614_v34 = vmul.f32 %v1613_v39, %v5961_v12  ;;  %v1775_v15 = vxor.u32 2147483648, %v1770_v30  ;;  %vm5969_vm2 = vcmp.lt.s32.totalorder %v5968_v35, 0  ;;  %v1450_v46 = vadd.f32 0.041655596, %v1449_v60 }
 0x2cf   : > { %v1445_v55 = vsel %vm5969_vm2, %v1444_v7, %v5965_v20  ;;  %v1457_v6 = vadd.f32 0.008332121, %v1456_v16  ;;  %v1935_v40 = vsel %vm1925_vm10, nan, %v1934_v0  ;;  %v1608_v4 = vadd.f32 1.0, %v1607_v21 }
 0x2d0   : > { %v1615_v19 = vadd.f32 1.0, %v1614_v34  ;;  %vm1617_vm13 = vweird.f32 %v5962_v23  ;;  %2918 = vmatpush.msra.mxu2 %v1935_v40  ;;  %v1776_v48 = vsel %vm1774_vm6, %v1762_v22, %v1775_v15  ;;  %v1779_v53 = vsel %vm1777_vm12, %v1778_v9, %v1770_v30  ;;  %v5975_v9 = vld [vmem:[#allocation36_spill] sm:$0xff] }
 0x2d1   : > { %v1451_v56 = vmul.f32 %v1450_v46, %v5967_v47  ;;  %v1458_v32 = vmul.f32 %v1457_v6, %v5967_v47  ;;  %v1780_v61 = vsel %vm1773_vm8, %v1776_v48, %v1779_v53  ;;  %v1624_v12 = vxor.u32 2147483648, %v1608_v4 }
 0x2d2   : > { %v1616_v28 = vmul.f32 %v1615_v19, %v5970_v18  ;;  %v1447_v25 = vsel %vm3948_vm0, 0, %v1445_v55  ;;  %v1781_v36 = vsel %vm1771_vm4, nan, %v1780_v61  ;;  %vm1619_vm15 = vcmp.lt.s32.totalorder %v1618_v52, 2  ;;  %v5976_v19 = vld [vmem:[#allocation34_spill] sm:$0xff] }
 0x2d3   : > { %v1452_v2 = vadd.f32 -0.4999988, %v1451_v56  ;;  %v1459_v8 = vadd.f32 -0.16666654, %v1458_v32  ;;  %2919 = vmatpush.msra.mxu2 %v1781_v36  ;;  %vm1620_vm3 = vcmp.eq.s32.totalorder %v1618_v52, 0  ;;  %vm1623_vm5 = vcmp.eq.s32.totalorder %v1618_v52, 2 }
 0x2d4   : > { %v1621_v33 = vxor.u32 2147483648, %v1616_v28  ;;  %v1295_v58 = vmul.f32 -0.001358992, %v5308_v45  ;;  %v1464_v13 = vand.u32 3, %v1447_v25  ;;  %v1293_v1 = vsel %vm5270_vm14, 0, %v5339_v51  ;;  %v5973_v51 = vld [vmem:[#allocation22_spill] sm:$0xff] }
 0x2d5   : > { %v1453_v17 = vmul.f32 %v1452_v2, %v5967_v47  ;;  %v1460_v54 = vmul.f32 %v1459_v8, %v5967_v47  ;;  %v1625_v62 = vsel %vm1623_vm5, %v1624_v12, %v1616_v28  ;;  %vm1463_vm0 = vweird.f32 %v5968_v35  ;;  %v5978_v36 = vld [vmem:[#allocation44_spill] sm:$0xff] }
 0x2d6   : > { %v1622_v42 = vsel %vm1620_vm3, %v1608_v4, %v1621_v33  ;;  %v1296_v22 = vadd.f32 0.041655596, %v1295_v58  ;;  %v1136_v43 = vsub.s32 4, %v5972_v63  ;;  %v1310_v27 = vand.u32 3, %v1293_v1  ;;  %v5979_v58 = vld [vmem:[#allocation48_spill] sm:$0xff] }
 0x2d7   : > { %v1626_v14 = vsel %vm1619_vm15, %v1622_v42, %v1625_v62  ;;  %v1454_v50 = vadd.f32 1.0, %v1453_v17  ;;  %v1461_v57 = vadd.f32 1.0, %v1460_v54  ;;  %v1141_v37 = vmul.f32 -0.001358992, %v5334_v5  ;;  %v5981_v42 = vld [vmem:[#allocation24_spill] sm:$0xff]  ;;  %v5982_v62 = vld [vmem:[#allocation31_spill] sm:$0xff] }
 0x2d8   : > { %v1627_v24 = vsel %vm1617_vm13, nan, %v1626_v14  ;;  %v1297_v10 = vmul.f32 %v1296_v22, %v5308_v45  ;;  %vm1465_vm14 = vcmp.lt.s32.totalorder %v1464_v13, 2  ;;  %v1148_v0 = vmul.f32 -0.00019511016, %v5334_v5 }
 0x2d9   : > { %2920 = vmatpush.msra.mxu2 %v1627_v24  ;;  %v1462_v20 = vmul.f32 %v1461_v57, %v5973_v51  ;;  %v1470_v7 = vxor.u32 2147483648, %v1454_v50  ;;  %vm1466_vm10 = vcmp.eq.s32.totalorder %v1464_v13, 0  ;;  %vm1469_vm11 = vcmp.eq.s32.totalorder %v1464_v13, 2  ;;  %v5983_v51 = vld [vmem:[#allocation18_spill] sm:$0xff] }
 0x2da   : > { %v1298_v49 = vadd.f32 -0.4999988, %v1297_v10  ;;  %v1142_v39 = vadd.f32 0.041655596, %v1141_v37  ;;  %vm1309_vm9 = vweird.f32 %v4961_v59  ;;  %vm5974_vm1 = vcmp.lt.s32.totalorder %v4646_v44, 0 }
 0x2db   : > { %v1467_v3 = vxor.u32 2147483648, %v1462_v20  ;;  %v1137_v23 = vsel %vm5974_vm1, %v1136_v43, %v5972_v63  ;;  %v1149_v30 = vadd.f32 0.008332121, %v1148_v0  ;;  %v982_v47 = vsub.s32 4, %v5975_v9 }
 0x2dc   : > { %v1299_v60 = vmul.f32 %v1298_v49, %v5308_v45  ;;  %vm1311_vm4 = vcmp.lt.s32.totalorder %v1310_v27, 2  ;;  %v1313_v16 = vxor.u32 2147483648, %v5422_v41  ;;  %v1143_v21 = vmul.f32 %v1142_v39, %v5334_v5 }
 0x2dd   : > { %v1468_v34 = vsel %vm1466_vm10, %v1454_v50, %v1467_v3  ;;  %v1471_v52 = vsel %vm1469_vm11, %v1470_v7, %v1462_v20  ;;  %vm1312_vm8 = vcmp.eq.s32.totalorder %v1310_v27, 0  ;;  %v1150_v15 = vmul.f32 %v1149_v30, %v5334_v5 }
 0x2de   : > { %v1472_v55 = vsel %vm1465_vm14, %v1468_v34, %v1471_v52  ;;  %v1300_v46 = vadd.f32 1.0, %v1299_v60  ;;  %v1139_v6 = vsel %vm5251_vm7, 0, %v1137_v23  ;;  %v1144_v40 = vadd.f32 -0.4999988, %v1143_v21  ;;  %v5986_v34 = vld [vmem:[#allocation37_spill] sm:$0xff] }
 0x2df   : > { %v1473_v45 = vsel %vm1463_vm0, nan, %v1472_v55  ;;  %v1151_v4 = vadd.f32 -0.16666654, %v1150_v15  ;;  %vm5977_vm6 = vcmp.lt.s32.totalorder %v5976_v19, 0  ;;  %v987_v53 = vmul.f32 -0.001358992, %v5235_v11 }
 0x2e0   : > { %v983_v48 = vsel %vm5977_vm6, %v982_v47, %v5975_v9  ;;  %2921 = vmatpush.msra.mxu2 %v1473_v45  ;;  %v1314_v56 = vsel %vm1312_vm8, %v1300_v46, %v1313_v16  ;;  %v1316_v32 = vxor.u32 2147483648, %v1300_v46  ;;  %v1145_v61 = vmul.f32 %v1144_v40, %v5334_v5  ;;  %v5985_v9 = vld [vmem:[#allocation19_spill] sm:$0xff] }
 0x2e1   : > { %v994_v18 = vmul.f32 -0.00019511016, %v5235_v11  ;;  %vm1315_vm12 = vcmp.eq.s32.totalorder %v1310_v27, 2  ;;  %v1152_v26 = vmul.f32 %v1151_v4, %v5334_v5  ;;  %v1156_v28 = vand.u32 3, %v1139_v6  ;;  %v5988_v6 = vld [vmem:[#allocation16_spill] sm:$0xff] }
 0x2e2   : > { %v988_v35 = vadd.f32 0.041655596, %v987_v53  ;;  %v1317_v12 = vsel %vm1315_vm12, %v1316_v32, %v5422_v41  ;;  %v1146_v29 = vadd.f32 1.0, %v1145_v61  ;;  %v833_v2 = vmul.f32 -0.001358992, %v5978_v36 }
 0x2e3   : > { %v995_v25 = vadd.f32 0.008332121, %v994_v18  ;;  %v1318_v8 = vsel %vm1311_vm4, %v1314_v56, %v1317_v12  ;;  %v1153_v33 = vadd.f32 1.0, %v1152_v26  ;;  %vm5980_vm7 = vnez %v5979_v58 }
 0x2e4   : > { %v985_v17 = vsel %vm5980_vm7, 0, %v983_v48  ;;  %v989_v54 = vmul.f32 %v988_v35, %v5235_v11  ;;  %v1319_v13 = vsel %vm1309_vm9, nan, %v1318_v8  ;;  %v1162_v5 = vxor.u32 2147483648, %v1146_v29 }
 0x2e5   : > { %v996_v1 = vmul.f32 %v995_v25, %v5235_v11  ;;  %v828_v41 = vsub.s32 4, %v5981_v42  ;;  %v5606_v22 = vmul.f32 %v5982_v62, %v5982_v62  ;;  %2922 = vmatpush.msra.mxu2 %v1319_v13  ;;  %v1154_v14 = vmul.f32 %v1153_v33, %v5303_v31 }
 0x2e6   : > { %vm1157_vm2 = vcmp.lt.s32.totalorder %v1156_v28, 2  ;;  %v990_v50 = vadd.f32 -0.4999988, %v989_v54  ;;  %vm1158_vm13 = vcmp.eq.s32.totalorder %v1156_v28, 0  ;;  %vm1161_vm15 = vcmp.eq.s32.totalorder %v1156_v28, 2 }
 0x2e7   : > { %v997_v57 = vadd.f32 -0.16666654, %v996_v1  ;;  %v834_v63 = vadd.f32 0.041655596, %v833_v2  ;;  %v1159_v59 = vxor.u32 2147483648, %v1154_v14  ;;  %v1002_v24 = vand.u32 3, %v985_v17 }
 0x2e8   : > { %v991_v43 = vmul.f32 %v990_v50, %v5235_v11  ;;  %v840_v10 = vmul.f32 -0.00019511016, %v5978_v36  ;;  %v1163_v27 = vsel %vm1161_vm15, %v1162_v5, %v1154_v14  ;;  %vm5984_vm3 = vcmp.lt.s32.totalorder %v5983_v51, 0  ;;  %v5991_v2 = vld [vmem:[#allocation40_spill] sm:$0xff]  ;;  %v5992_v1 = vld [vmem:[#allocation27_spill] sm:$0xff] }
 0x2e9   : > { %v998_v37 = vmul.f32 %v997_v57, %v5235_v11  ;;  %v829_v20 = vsel %vm5984_vm3, %v828_v41, %v5981_v42  ;;  %v835_v31 = vmul.f32 %v834_v63, %v5978_v36  ;;  %v1160_v7 = vsel %vm1158_vm13, %v1146_v29, %v1159_v59  ;;  %v5989_v29 = vld [vmem:[#allocation12_spill] sm:$0xff]  ;;  %v5994_v41 = vld [vmem:[#allocation11_spill] sm:$0xff] }
 0x2ea   : > { %v992_v0 = vadd.f32 1.0, %v991_v43  ;;  %v841_v49 = vadd.f32 0.008332121, %v840_v10  ;;  %v679_v39 = vmul.f32 -0.001358992, %v5606_v22  ;;  %vm1155_vm5 = vweird.f32 %v4646_v44 }
 0x2eb   : > { %v1164_v3 = vsel %vm1157_vm2, %v1160_v7, %v1163_v27  ;;  %v999_v23 = vadd.f32 1.0, %v998_v37  ;;  %v836_v30 = vadd.f32 -0.4999988, %v835_v31  ;;  %v5621_v11 = vmul.f32 %v5985_v9, %v5985_v9 }
 0x2ec   : > { %v1165_v47 = vsel %vm1155_vm5, nan, %v1164_v3  ;;  %v842_v60 = vmul.f32 %v841_v49, %v5978_v36  ;;  %v1008_v21 = vxor.u32 2147483648, %v992_v0  ;;  %vm5987_vm0 = vnez %v5986_v34 }
 0x2ed   : > { %2923 = vmatpush.msra.mxu2 %v1165_v47  ;;  %v1000_v16 = vmul.f32 %v999_v23, %v5024_v38  ;;  %v831_v52 = vsel %vm5987_vm0, 0, %v829_v20  ;;  %v837_v44 = vmul.f32 %v836_v30, %v5978_v36  ;;  %vm1003_vm14 = vcmp.lt.s32.totalorder %v1002_v24, 2  ;;  %v5997_v47 = vld [vmem:[#allocation17_spill] sm:$0xff] }
 0x2ee   : > { %vm1004_vm10 = vcmp.eq.s32.totalorder %v1002_v24, 0  ;;  %v843_v15 = vadd.f32 -0.16666654, %v842_v60  ;;  %v680_v55 = vadd.f32 0.041655596, %v679_v39  ;;  %vm1007_vm11 = vcmp.eq.s32.totalorder %v1002_v24, 2 }
 0x2ef   : > { %v1005_v46 = vxor.u32 2147483648, %v1000_v16  ;;  %v674_v40 = vsub.s32 4, %v5988_v6  ;;  %v686_v45 = vmul.f32 -0.00019511016, %v5606_v22  ;;  %v838_v4 = vadd.f32 1.0, %v837_v44 }
 0x2f0   : > { %v844_v48 = vmul.f32 %v843_v15, %v5978_v36  ;;  %v848_v38 = vand.u32 3, %v831_v52  ;;  %v681_v53 = vmul.f32 %v680_v55, %v5606_v22  ;;  %v1009_v32 = vsel %vm1007_vm11, %v1008_v21, %v1000_v16 }
 0x2f1   : > { %v1006_v56 = vsel %vm1004_vm10, %v992_v0, %v1005_v46  ;;  %v687_v61 = vadd.f32 0.008332121, %v686_v45  ;;  %v525_v18 = vmul.f32 -0.001358992, %v5621_v11  ;;  %vm1001_vm9 = vweird.f32 %v5976_v19  ;;  %v2887_v19 = vld [vmem:[%s5703_s5] sm:$0xf] }
 0x2f2   : > { %v1010_v26 = vsel %vm1003_vm14, %v1006_v56, %v1009_v32  ;;  %v845_v28 = vadd.f32 1.0, %v844_v48  ;;  %v682_v35 = vadd.f32 -0.4999988, %v681_v53  ;;  %vm5990_vm1 = vcmp.lt.s32.totalorder %v5989_v29, 0  ;;  %v5995_v0 = vld [vmem:[#allocation8_spill] sm:$0xff] }
 0x2f3   : > { %v1011_v12 = vsel %vm1001_vm9, nan, %v1010_v26  ;;  %v675_v25 = vsel %vm5990_vm1, %v674_v40, %v5988_v6  ;;  %v688_v36 = vmul.f32 %v687_v61, %v5606_v22  ;;  %v854_v33 = vxor.u32 2147483648, %v838_v4 }
 0x2f4   : > { %2924 = vmatpush.msra.mxu2 %v1011_v12  ;;  %v846_v8 = vmul.f32 %v845_v28, %v5991_v2  ;;  %v683_v58 = vmul.f32 %v682_v35, %v5606_v22  ;;  %v526_v17 = vadd.f32 0.041655596, %v525_v18  ;;  %vm850_vm4 = vcmp.eq.s32.totalorder %v848_v38, 0 }
 0x2f5   : > { %vm853_vm8 = vcmp.eq.s32.totalorder %v848_v38, 2  ;;  %v689_v54 = vadd.f32 -0.16666654, %v688_v36  ;;  %v532_v13 = vmul.f32 -0.00019511016, %v5621_v11  ;;  %vm5993_vm6 = vnez %v5992_v1 }
 0x2f6   : > { %v851_v5 = vxor.u32 2147483648, %v846_v8  ;;  %v677_v42 = vsel %vm5993_vm6, 0, %v675_v25  ;;  %v520_v14 = vsub.s32 4, %v5994_v41  ;;  %v527_v50 = vmul.f32 %v526_v17, %v5621_v11 }
 0x2f7   : > { %v684_v57 = vadd.f32 1.0, %v683_v58  ;;  %v690_v63 = vmul.f32 %v689_v54, %v5606_v22  ;;  %v533_v59 = vadd.f32 0.008332121, %v532_v13  ;;  %vm2888_vm12 = vcmask 64512  }
 0x2f8   : > { %vm849_vm7 = vcmp.lt.s32.totalorder %v848_v38, 2  ;;  %v852_v43 = vsel %vm850_vm4, %v838_v4, %v851_v5  ;;  %v855_v24 = vsel %vm853_vm8, %v854_v33, %v846_v8  ;;  %v528_v10 = vadd.f32 -0.4999988, %v527_v50  ;;  %3094 = vmatmul.msk.f32.vlgmr.msrb.gmra.mxu1 %vm2888_vm12, %v2887_v19  ;;  %v2886_v4 = vld [vmem:[%s5702_s4] sm:$0xf] }
 0x2f9   : > { %vm847_vm2 = vweird.f32 %v5983_v51  ;;  %v856_v27 = vsel %vm849_vm7, %v852_v43, %v855_v24  ;;  %v691_v37 = vadd.f32 1.0, %v690_v63  ;;  %v534_v20 = vmul.f32 %v533_v59, %v5621_v11 }
 0x2fa   : > { %v857_v31 = vsel %vm847_vm2, nan, %v856_v27  ;;  %v694_v7 = vand.u32 3, %v677_v42  ;;  %vm5996_vm13 = vcmp.lt.s32.totalorder %v5995_v0, 0  ;;  %v529_v22 = vmul.f32 %v528_v10, %v5621_v11 }
 0x2fb   : > { %v521_v49 = vsel %vm5996_vm13, %v520_v14, %v5994_v41  ;;  %2925 = vmatpush.msra.mxu2 %v857_v31  ;;  %v692_v39 = vmul.f32 %v691_v37, %v5982_v62  ;;  %v700_v3 = vxor.u32 2147483648, %v684_v57  ;;  %v535_v23 = vadd.f32 -0.16666654, %v534_v20 }
 0x2fc   : > { %vm5998_vm15 = vnez %v5997_v47  ;;  %v530_v60 = vadd.f32 1.0, %v529_v22  ;;  %vm696_vm3 = vcmp.eq.s32.totalorder %v694_v7, 0  ;;  %vm699_vm5 = vcmp.eq.s32.totalorder %v694_v7, 2 }
 0x2fd   : > { %v697_v30 = vxor.u32 2147483648, %v692_v39  ;;  %v523_v51 = vsel %vm5998_vm15, 0, %v521_v49  ;;  %v536_v16 = vmul.f32 %v535_v23, %v5621_v11  ;;  %vm695_vm0 = vcmp.lt.s32.totalorder %v694_v7, 2 }
 0x2fe   : > { %v701_v34 = vsel %vm699_vm5, %v700_v3, %v692_v39  ;;  %vm693_vm14 = vweird.f32 %v5989_v29  ;;  %v540_v15 = vand.u32 3, %v523_v51  ;;  %v546_v46 = vxor.u32 2147483648, %v530_v60 }
 0x2ff   : > { %v698_v21 = vsel %vm696_vm3, %v684_v57, %v697_v30  ;;  %v537_v52 = vadd.f32 1.0, %v536_v16  ;;  %vm539_vm1 = vweird.f32 %v5995_v0 }
 0x300   : > { %v702_v44 = vsel %vm695_vm0, %v698_v21, %v701_v34  ;;  %vm542_vm10 = vcmp.eq.s32.totalorder %v540_v15, 0  ;;  %vm545_vm11 = vcmp.eq.s32.totalorder %v540_v15, 2  ;;  %vm541_vm9 = vcmp.lt.s32.totalorder %v540_v15, 2 }
 0x301   : > { %v703_v62 = vsel %vm693_vm14, nan, %v702_v44  ;;  %v538_v55 = vmul.f32 %v537_v52, %v5985_v9 }
 0x302   : > { %2926 = vmatpush.msra.mxu2 %v703_v62 }
 0x303   : > { %v543_v6 = vxor.u32 2147483648, %v538_v55  ;;  %v547_v40 = vsel %vm545_vm11, %v546_v46, %v538_v55 }
 0x305   : > { %v544_v11 = vsel %vm542_vm10, %v530_v60, %v543_v6 }
 0x306   : > { %v548_v45 = vsel %vm541_vm9, %v544_v11, %v547_v40 }
 0x307   : > { %v549_v48 = vsel %vm539_vm1, nan, %v548_v45 }
 0x308   : > { %2927 = vmatpush.msra.mxu2 %v549_v48 }
 0x309   : > { %2928 = vmatmul.f32.vlgmr.msra.gmra.mxu2 %v2886_v4 }
 0x375   : > { %v2909_v9 = vpop.f32.mrf.mxu1 }
 0x38c   : > { %v2929_v38 = vpop.f32.mrf.mxu2 }
 0x38d   : > { %v2930_v53 = vadd.f32 %v2929_v38, %v2909_v9 }
 0x38f   : > { %2932 = vst [vmem:[%s256_s26] sm:$0xf] %v2930_v53 }
 0x390   : > { %3206 = shalt.err (!%p3203_p8)
}
 0x391   : > { %3105 = dma.vmem_to_hbm [thread:$0]  (%p3329_p5), %s2947_s28, 64, %s2949_s29, %s2934_s9  }
 0x392 PF: > { %p3117_p9 = scmp.ge.s32.totalorder %s3245_s24, 2  ;;  %s2960_s14 = sand.u32 1, %s3233_s21  }
 0x393   : > { %s2961_s16 = scalar_lea.sflag [#allocation3], %s2960_s14 }
 0x394   : > { %p3112_p10 = pnand %p3117_p9, %p3333_p6 }
 0x396   : > { %p3113_p11 = pneg %p3112_p10 }
 0x398   : > { %3228 = dma.done.wait (%p3113_p11), %s2961_s16, 64  }
 0x399   : > { %3230 = vsyncadd (%p3113_p11), %s2961_s16, 4294967232  ;;  %p17_p12 = scmp.ge.s32.totalorder %s3316_s27, 5   ;;  %s5999_s21 = smov %s3237_s22 }
 0x39a   : > { %s6000_s22 = smov %s3241_s23  ;;  %s6001_s23 = smov %s3327_s30 }
 0x39b   : > { %s6002_s24 = smov %s3316_s27  ;;  %19 = sbr.rel (!%p17_p12) target bundleno = 4 (0x4), region = 84 }
 0x3a0   :  { %2967 = vsyncpa [#allocation3], 1 }
 0x3a1   :  { %2969 = vsyncpa [#allocation3 + $0x1], 1 }
 0x3a2   :  { %2970 = vsyncpa [#allocation4], 1 }
 0x3a3   :  { %2972 = vsyncpa [#allocation4 + $0x1], 1 }

</bundles_post_ra>
